<compile_context>
chip_gen: v6e
topology: v6e:2x2x1
jax: 0.10.0
libtpu: 0.0.40
codegen_flags: <defaults>
</compile_context>

<pallas_src>
import functools

import jax
import jax.numpy as jnp
from jax.experimental import pallas as pl
from jax.experimental.pallas import tpu as pltpu

EMD_DIM = 200


def _round_up(v, m):
    return ((v + m - 1) // m) * m


def atom_encoder_kernel(x_ref, emb_ref, o_ref, *, row_block):
    # x_ref  : [tile_n, C]            int32   (index tile)
    # emb_ref: [C*EMD_PAD, H_PAD]     float32 (fused, zero-padded tables; constant block)
    # o_ref  : [tile_n, H_PAD]        float32 (lane-dense: H_PAD % 128 == 0)
    tile_n, n_ch = x_ref.shape
    k_fused, _ = emb_ref.shape
    emd_pad = k_fused // n_ch
    n_sub = tile_n // row_block

    # Full fused table (block never changes across the grid).
    table = emb_ref[...]
    # Shared vocab iota for the one-hot compares.
    lane_iota = jax.lax.broadcasted_iota(jnp.int32, (row_block, emd_pad), 1)

    def body(s, carry):
        r0 = pl.multiple_of(s * row_block, row_block)
        # One sublane-aligned load of the index sub-block; all C column
        # extracts come from this in-register value.
        xb = x_ref[pl.ds(r0, row_block), :]                        # [RB, C] int32

        # Per-channel one-hots concatenated along lanes -> rows of the fused
        # table (channel c lives in rows [c*EMD_PAD, (c+1)*EMD_PAD)).
        onehot = jnp.concatenate(
            [(lane_iota == xb[:, c:c + 1]).astype(jnp.float32)
             for c in range(n_ch)],
            axis=1)                                                # [RB, C*EMD_PAD]

        # Single fused MXU matmul: gather + channel-sum in one pass.
        o_ref[pl.ds(r0, row_block), :] = jnp.dot(
            onehot, table, preferred_element_type=jnp.float32)
        return carry

    jax.lax.fori_loop(0, n_sub, body, 0, unroll=True)


def atom_encoder(x, emb_tables, *, tile_n=512, row_block=256):
    """x: [N, C] int32, emb_tables: [C, EMD_DIM, H] f32 -> [N, H] f32."""
    n, c = x.shape
    c2, emd, h = emb_tables.shape
    assert c == c2 and emd == EMD_DIM

    row_block = min(row_block, tile_n)
    assert row_block % 8 == 0, "row_block must be a multiple of 8 (sublane)"
    assert tile_n % row_block == 0, "tile_n must be a multiple of row_block"

    # Zero-pad the vocab axis to a multiple of 256 (full MXU K passes) and the
    # hidden axis to a multiple of 128 (lane-dense output stores).
    emd_pad = _round_up(emd, 256)
    h_pad = _round_up(h, 128)
    emb_p = jnp.pad(
        emb_tables.astype(jnp.float32),
        ((0, 0), (0, emd_pad - emd), (0, h_pad - h)))
    emb_fused = emb_p.reshape(c * emd_pad, h_pad)                  # [C*EMD_PAD, H_PAD]

    # Pad N up to a multiple of tile_n (padded rows use index 0 and are
    # sliced off afterwards).
    n_pad = _round_up(n, tile_n)
    x_p = x if n_pad == n else jnp.pad(x, ((0, n_pad - n), (0, 0)))
    grid = (n_pad // tile_n,)

    kernel = functools.partial(atom_encoder_kernel, row_block=row_block)
    out_padded = pl.pallas_call(
        kernel,
        out_shape=jax.ShapeDtypeStruct((n_pad, h_pad), jnp.float32),
        grid_spec=pltpu.PrefetchScalarGridSpec(
            num_scalar_prefetch=0,
            grid=grid,
            in_specs=[
                pl.BlockSpec((tile_n, c), lambda i: (i, 0)),             # index tile
                pl.BlockSpec((c * emd_pad, h_pad), lambda i: (0, 0)),    # fused tables
            ],
            out_specs=pl.BlockSpec((tile_n, h_pad), lambda i: (i, 0)),
        ),
        compiler_params=pltpu.CompilerParams(
            dimension_semantics=("parallel",),
        ),
    )(x_p, emb_fused)

    return out_padded[:n, :h]


def atom_encoder_ref(x, emb_tables):
    # pure-JAX reference matching the PyTorch forward
    out = 0
    for c in range(x.shape[1]):
        out = out + jnp.take(emb_tables[c], x[:, c], axis=0)
    return out


def xavier_uniform(key, shape, dtype=jnp.float32):
    fan_in, fan_out = shape[0], shape[1]
    limit = (6.0 / (fan_in + fan_out)) ** 0.5
    return jax.random.uniform(key, shape, dtype, minval=-limit, maxval=limit)


if __name__ == "__main__":
    # N atoms, C=4 categorical feature columns, hidden=32 (as in the module).
    # N=1024 with tile_n=512 -> grid of 2 parallel steps.
    N, C, H = 1024, 4, 32
    key = jax.random.PRNGKey(0)
    k_idx, *k_embs = jax.random.split(key, 1 + C)

    # deterministic parameter init (xavier_uniform, like the PyTorch __init__)
    emb_tables = jnp.stack(
        [xavier_uniform(k, (EMD_DIM, H)) for k in k_embs], axis=0
    )  # [C, EMD_DIM, H]

    # integer categorical features in [0, EMD_DIM)
    x = jax.random.randint(k_idx, (N, C), 0, EMD_DIM, dtype=jnp.int32)

    out = jax.block_until_ready(atom_encoder(x, emb_tables))
    ref = atom_encoder_ref(x, emb_tables)
    assert out.shape == (N, H)
    assert jnp.allclose(out, ref, atol=1e-5, rtol=1e-5)

    print("KERNEL_OK")
</pallas_src>

<mosaic_0001>
module attributes {stable_mosaic.version = 11 : i64} {
  func.func @atom_encoder_kernel(%arg0: i32, %arg1: memref<512x4xi32, #tpu.memory_space<vmem>>, %arg2: memref<1024x128xf32, #tpu.memory_space<vmem>>, %arg3: memref<512x128xf32, #tpu.memory_space<vmem>>) attributes {dimension_semantics = [#tpu.dimension_semantics<parallel>], iteration_bounds = array<i64: 2>, scalar_prefetch = 0 : i64, scratch_operands = 0 : i64, tpu.core_type = #tpu.core_type<tc>, window_params = [{transform_indices = @transform_0, window_bounds = array<i64: 512, 4>}, {pipeline_mode = #tpu.pipeline_mode<synchronous>, transform_indices = @transform_1, window_bounds = array<i64: 1024, 128>}, {transform_indices = @transform_2, window_bounds = array<i64: 512, 128>}]} {
    %c0 = arith.constant 0 : index
    %c0_0 = arith.constant 0 : index
    %0 = vector.load %arg2[%c0, %c0_0] : memref<1024x128xf32, #tpu.memory_space<vmem>>, vector<1024x128xf32>
    %1 = tpu.iota {dimensions = array<i32: 1>} : vector<256x256xi32>
    %c0_i32 = arith.constant 0 : i32
    %c256_i32 = arith.constant 256 : i32
    %2 = arith.muli %c0_i32, %c256_i32 : i32
    %3 = tpu.assume_multiple %2, 256 : i32
    %4 = arith.index_cast %3 : i32 to index
    %c0_1 = arith.constant 0 : index
    %5 = vector.load %arg1[%4, %c0_1] : memref<512x4xi32, #tpu.memory_space<vmem>>, vector<256x4xi32>
    %6 = vector.extract_strided_slice %5 {offsets = [0, 0], sizes = [256, 1], strides = [1, 1]} : vector<256x4xi32> to vector<256x1xi32>
    %7 = vector.broadcast %6 : vector<256x1xi32> to vector<256x256xi32>
    %8 = arith.cmpi eq, %1, %7 : vector<256x256xi32>
    %9 = arith.extui %8 : vector<256x256xi1> to vector<256x256xi32>
    %10 = arith.sitofp %9 : vector<256x256xi32> to vector<256x256xf32>
    %11 = vector.extract_strided_slice %5 {offsets = [0, 1], sizes = [256, 1], strides = [1, 1]} : vector<256x4xi32> to vector<256x1xi32>
    %12 = vector.broadcast %11 : vector<256x1xi32> to vector<256x256xi32>
    %13 = arith.cmpi eq, %1, %12 : vector<256x256xi32>
    %14 = arith.extui %13 : vector<256x256xi1> to vector<256x256xi32>
    %15 = arith.sitofp %14 : vector<256x256xi32> to vector<256x256xf32>
    %16 = vector.extract_strided_slice %5 {offsets = [0, 2], sizes = [256, 1], strides = [1, 1]} : vector<256x4xi32> to vector<256x1xi32>
    %17 = vector.broadcast %16 : vector<256x1xi32> to vector<256x256xi32>
    %18 = arith.cmpi eq, %1, %17 : vector<256x256xi32>
    %19 = arith.extui %18 : vector<256x256xi1> to vector<256x256xi32>
    %20 = arith.sitofp %19 : vector<256x256xi32> to vector<256x256xf32>
    %21 = vector.extract_strided_slice %5 {offsets = [0, 3], sizes = [256, 1], strides = [1, 1]} : vector<256x4xi32> to vector<256x1xi32>
    %22 = vector.broadcast %21 : vector<256x1xi32> to vector<256x256xi32>
    %23 = arith.cmpi eq, %1, %22 : vector<256x256xi32>
    %24 = arith.extui %23 : vector<256x256xi1> to vector<256x256xi32>
    %25 = arith.sitofp %24 : vector<256x256xi32> to vector<256x256xf32>
    %26 = tpu.concatenate %10, %15, %20, %25 in 1 : vector<256x256xf32>, vector<256x256xf32>, vector<256x256xf32>, vector<256x256xf32> -> vector<256x1024xf32>
    %cst = arith.constant dense<0.000000e+00> : vector<256x128xf32>
    %27 = tpu.matmul %26, %0, %cst {dimension_numbers = #tpu.dot_dimension_numbers<[1], [0], [0], [1], [0, 0, 1, 1], [], []>} : vector<256x1024xf32>, vector<1024x128xf32>, vector<256x128xf32> -> vector<256x128xf32>
    %28 = arith.index_cast %3 : i32 to index
    %c0_2 = arith.constant 0 : index
    %29 = vector.load %arg3[%28, %c0_2] : memref<512x128xf32, #tpu.memory_space<vmem>>, vector<256x128xf32>
    tpu.vector_store %arg3[%28, %c0_2], %27 {strides = array<i32>} : memref<512x128xf32, #tpu.memory_space<vmem>>, vector<256x128xf32>,
    %c1_i32 = arith.constant 1 : i32
    %c256_i32_3 = arith.constant 256 : i32
    %30 = arith.muli %c1_i32, %c256_i32_3 : i32
    %31 = tpu.assume_multiple %30, 256 : i32
    %32 = arith.index_cast %31 : i32 to index
    %c0_4 = arith.constant 0 : index
    %33 = vector.load %arg1[%32, %c0_4] : memref<512x4xi32, #tpu.memory_space<vmem>>, vector<256x4xi32>
    %34 = vector.extract_strided_slice %33 {offsets = [0, 0], sizes = [256, 1], strides = [1, 1]} : vector<256x4xi32> to vector<256x1xi32>
    %35 = vector.broadcast %34 : vector<256x1xi32> to vector<256x256xi32>
    %36 = arith.cmpi eq, %1, %35 : vector<256x256xi32>
    %37 = arith.extui %36 : vector<256x256xi1> to vector<256x256xi32>
    %38 = arith.sitofp %37 : vector<256x256xi32> to vector<256x256xf32>
    %39 = vector.extract_strided_slice %33 {offsets = [0, 1], sizes = [256, 1], strides = [1, 1]} : vector<256x4xi32> to vector<256x1xi32>
    %40 = vector.broadcast %39 : vector<256x1xi32> to vector<256x256xi32>
    %41 = arith.cmpi eq, %1, %40 : vector<256x256xi32>
    %42 = arith.extui %41 : vector<256x256xi1> to vector<256x256xi32>
    %43 = arith.sitofp %42 : vector<256x256xi32> to vector<256x256xf32>
    %44 = vector.extract_strided_slice %33 {offsets = [0, 2], sizes = [256, 1], strides = [1, 1]} : vector<256x4xi32> to vector<256x1xi32>
    %45 = vector.broadcast %44 : vector<256x1xi32> to vector<256x256xi32>
    %46 = arith.cmpi eq, %1, %45 : vector<256x256xi32>
    %47 = arith.extui %46 : vector<256x256xi1> to vector<256x256xi32>
    %48 = arith.sitofp %47 : vector<256x256xi32> to vector<256x256xf32>
    %49 = vector.extract_strided_slice %33 {offsets = [0, 3], sizes = [256, 1], strides = [1, 1]} : vector<256x4xi32> to vector<256x1xi32>
    %50 = vector.broadcast %49 : vector<256x1xi32> to vector<256x256xi32>
    %51 = arith.cmpi eq, %1, %50 : vector<256x256xi32>
    %52 = arith.extui %51 : vector<256x256xi1> to vector<256x256xi32>
    %53 = arith.sitofp %52 : vector<256x256xi32> to vector<256x256xf32>
    %54 = tpu.concatenate %38, %43, %48, %53 in 1 : vector<256x256xf32>, vector<256x256xf32>, vector<256x256xf32>, vector<256x256xf32> -> vector<256x1024xf32>
    %cst_5 = arith.constant dense<0.000000e+00> : vector<256x128xf32>
    %55 = tpu.matmul %54, %0, %cst_5 {dimension_numbers = #tpu.dot_dimension_numbers<[1], [0], [0], [1], [0, 0, 1, 1], [], []>} : vector<256x1024xf32>, vector<1024x128xf32>, vector<256x128xf32> -> vector<256x128xf32>
    %56 = arith.index_cast %31 : i32 to index
    %c0_6 = arith.constant 0 : index
    %57 = vector.load %arg3[%56, %c0_6] : memref<512x128xf32, #tpu.memory_space<vmem>>, vector<256x128xf32>
    tpu.vector_store %arg3[%56, %c0_6], %55 {strides = array<i32>} : memref<512x128xf32, #tpu.memory_space<vmem>>, vector<256x128xf32>,
    %c2_i32 = arith.constant 2 : i32
    return
  }
  func.func @transform_0(%arg0: i32) -> (i32, i32) {
    %c0_i32 = arith.constant 0 : i32
    %c0_i32_0 = arith.constant 0 : i32
    return %arg0, %c0_i32 : i32, i32
  }
  func.func @transform_1(%arg0: i32) -> (i32, i32) {
    %c0_i32 = arith.constant 0 : i32
    %c0_i32_0 = arith.constant 0 : i32
    %c0_i32_1 = arith.constant 0 : i32
    return %c0_i32, %c0_i32_0 : i32, i32
  }
  func.func @transform_2(%arg0: i32) -> (i32, i32) {
    %c0_i32 = arith.constant 0 : i32
    %c0_i32_0 = arith.constant 0 : i32
    return %arg0, %c0_i32 : i32, i32
  }
}

</mosaic_0001>

<bundles_post_ra>
// kernel: tpu_custom_call.1
= control target key start
LH: loop header
LB: loop body
LE: loop exit
PB: predicated region body
PF: predicated region fallthrough
CT: control target
= control target key end

     0   :  { %7 = vsyncpa [#allocation3], 0  ;;  %s9899_s0 = inlined_call_operand.vmem [shape: s32[1024,4], index: 0, kind: input, shape index: {}]   ;;  %s9900_s1 = inlined_call_operand.vmem [shape: f32[1024,128], index: 1, kind: input, shape index: {}]   ;;  %s9901_s2 = inlined_call_operand.hbm [shape: f32[1024,128], index: 2, kind: output, shape index: {}]  }
   0x1   :  { %9 = vsyncpa [#allocation3 + $0x1], 0  ;;  %s6084_s9 = smov 0   ;;  %s6086_s10 = smov 0  }
   0x2   :  { %s6088_s11 = smov 0   ;;  %s6090_s12 = smov 0  }
   0x3 LB: > { %s6105_s13 = sadd.s32 4294967295, %s6058_s12   ;;  %s4586_s14 = sadd.s32 4294967294, %s6058_s12   ;;  %s6058_s12 = sphi %s6090_s12, %s9955_s12   ;;  %s6054_s11 = sphi %s6088_s11, %s9954_s11   ;;  %s6050_s10 = sphi %s6086_s10, %s9953_s10   ;;  %s6046_s9 = sphi %s6084_s9, %s9952_s9  }
   0x4   : > { %s6109_s15 = sadd.s32 1, %s6058_s12   ;;  %s69_s16 = sadd.s32 1, %s6054_s11 }
   0x5   : > { %s66_s17 = ssub.s32 %s6058_s12, %s6109_s15  ;;  %p79_p0 = scmp.ne.s32.totalorder %s6054_s11, %s6050_s10 }
   0x6   : > { %p67_p1 = scmp.eq.s32.totalorder %s66_s17, 0  ;;  %p80_p2 = scmp.eq.s32.totalorder %s6105_s13, 1 }
   0x7   : > { %p85_p3 = scmp.ne.s32.totalorder %s6050_s10, %s6046_s9  ;;  %p86_p4 = scmp.eq.s32.totalorder %s4586_s14, 1 }
   0x8   : > { %s6120_s18 = scalar_select %p67_p1, %s6054_s11, %s69_s16  }
   0x9   : > { %p6122_p5 = por %p80_p2, %p79_p0  ;;  %p6126_p6 = por %p86_p4, %p85_p3 }
   0xa   : > { %p4589_p7 = scmp.ge.s32.totalorder %s6058_s12, 1  ;;  %p116_p8 = scmp.lt.s32.totalorder %s6058_s12, 3 }
   0xc   : > { %p117_p9 = pnand %p4589_p7, %p116_p8 }
   0xe   : > { %120 = sbr.rel (%p117_p9) target bundleno = 1062 (0x426), region = 28 }
  0x13   : > { %s4591_s21 = sshll.u32 %s6105_s13, 6  ;;  %v160_v0 = vld [vmem:[%s9900_s1 + $0x78] sm:$0xff]  ;;  %v9906_v1 = vmov 0   ;;  %v9912_v2 = vmov 0.0   ;;  %v159_v3 = vld [vmem:[%s9900_s1 + $0x70] sm:$0xff]  ;;  %v158_v4 = vld [vmem:[%s9900_s1 + $0x68] sm:$0xff] }
  0x14   : > { %5735 = vset.pattern.permute.xlu1 %v9906_v1  ;;  %5734 = vset.pattern.permute.xlu0 %v9906_v1  ;;  %p139_p10 = scmp.lt.s32.totalorder %s4591_s21, 127  ;;  %v157_v7 = vld [vmem:[%s9900_s1 + $0x60] sm:$0xff]  ;;  %v156_v10 = vld [vmem:[%s9900_s1 + $0x58] sm:$0xff]  ;;  %v155_v11 = vld [vmem:[%s9900_s1 + $0x50] sm:$0xff]  ;;  %s135_s23 = sand.u32 1, %s6050_s10  }
  0x15   : > { %1460 = vmatprep.subr.mxu0 %v9912_v2  ;;  %1685 = vmatprep.subr.mxu1 %v9912_v2  ;;  %v154_v14 = vld [vmem:[%s9900_s1 + $0x48] sm:$0xff]  ;;  %v153_v17 = vld [vmem:[%s9900_s1 + $0x40] sm:$0xff]  ;;  %v152_v18 = vld [vmem:[%s9900_s1 + $0x38] sm:$0xff]  ;;  %s8635_s24 = sshll.u32 %s135_s23, 9  ;;  %s6066_s16 = smov [#allocation2]  }
  0x16   : > { %s9957_s21 = smov (!%p139_p10, %s4591_s21), 127  ;;  %1461 = vmatpush1.msra.mxu0 %v160_v0  ;;  %v192_v21 = vld [vmem:[%s9900_s1 + $0x178] sm:$0xff]  ;;  %v191_v22 = vld [vmem:[%s9900_s1 + $0x170] sm:$0xff]  ;;  %v190_v24 = vld [vmem:[%s9900_s1 + $0x168] sm:$0xff]  ;;  %s8678_s29 = scalar_lea.vmem [#allocation2], %s8635_s24 }
  0x17   : > { %1462 = vmatprep.subr.mxu0 %v9912_v2  ;;  %s4592_s28 = sshll.u32 %s9957_s21, 3  ;;  %1686 = vmatpush1.msra.mxu1 %v192_v21  ;;  %v151_v23 = vld [vmem:[%s9900_s1 + $0x30] sm:$0xff]  ;;  %v150_v27 = vld [vmem:[%s9900_s1 + $0x28] sm:$0xff]  ;;  %v189_v28 = vld [vmem:[%s9900_s1 + $0x160] sm:$0xff]  ;;  %s4524_s5 = sshll.u32 %s8678_s29, 4  ;;  %s9854_s5 = int_to_ptr.vmem [resolvable:$true] %s4524_s5 }
  0x18   : > { %1463 = vmatpush1.msra.mxu0 %v159_v3  ;;  %s6150_s3 = scalar_lea.vmem %s9899_s0, %s4592_s28  ;;  %1687 = vmatprep.subr.mxu1 %v9912_v2  ;;  %v149_v29 = vld [vmem:[%s9900_s1 + $0x20] sm:$0xff]  ;;  %v188_v32 = vld [vmem:[%s9900_s1 + $0x158] sm:$0xff]  ;;  %v187_v34 = vld [vmem:[%s9900_s1 + $0x150] sm:$0xff]  ;;  %s5998_s14 = scalar_lea.vmem %s9854_s5, 8192 }
  0x19   : > { %1464 = vmatprep.subr.mxu0 %v9912_v2  ;;  %v6154_v5 = vld [vmem:[%s6150_s3 + $0x10] sm:$0xff]  ;;  %v6157_v6 = vld [vmem:[%s6150_s3] sm:$0xff]  ;;  %v6165_v8 = vld [vmem:[%s6150_s3 + $0x18] sm:$0xff]  ;;  %1688 = vmatpush1.msra.mxu1 %v191_v22  ;;  %p5999_p11 = scmp.ne.s32.totalorder %s9854_s5, %s5998_s14  ;;  %s6002_s17 = sshll.u32 %s6066_s16, 4  ;;  %s6003_s17 = int_to_ptr.vmem [resolvable:$false] %s6002_s17 }
  0x1a   : > { %1465 = vmatpush1.msra.mxu0 %v158_v4  ;;  %315 = vperm.xlu1 %5735, %v6154_v5   ;;  %v6168_v9 = vld [vmem:[%s6150_s3 + $0x8] sm:$0xff]  ;;  %v6184_v13 = vld [vmem:[%s6150_s3 + $0x20] sm:$0xff]  ;;  %v6193_v15 = vld [vmem:[%s6150_s3 + $0x38] sm:$0xff]  ;;  %s6004_s21 = scalar_lea.vmem %s6003_s17, 16384  ;;  %p6005_p0 = scmp.lt.s32.totalorder %s9854_s5, %s6003_s17 }
  0x1b   : > { %309 = vperm.xlu0 %5734, %v6157_v6   ;;  %1466 = vmatprep.subr.mxu0 %v9912_v2  ;;  %v6181_v12 = vld [vmem:[%s6150_s3 + $0x28] sm:$0xff]  ;;  %v6196_v16 = vld [vmem:[%s6150_s3 + $0x30] sm:$0xff]  ;;  %v6212_v20 = vld [vmem:[%s6150_s3 + $0x40] sm:$0xff]  ;;  %p6000_p12 = pnand %p5999_p11, %p6122_p5  ;;  %p6006_p1 = scmp.lt.s32.totalorder %s6004_s21, %s5998_s14 }
  0x1c   : > { %1467 = vmatpush1.msra.mxu0 %v157_v7  ;;  %v6209_v19 = vld [vmem:[%s6150_s3 + $0x48] sm:$0xff]  ;;  %v6231_v25 = vld [vmem:[%s6150_s3 + $0x58] sm:$0xff]  ;;  %v6234_v26 = vld [vmem:[%s6150_s3 + $0x50] sm:$0xff]  ;;  %1689 = vmatprep.subr.mxu1 %v9912_v2 }
  0x1d   : > { %1468 = vmatprep.subr.mxu0 %v9912_v2  ;;  %1690 = vmatpush1.msra.mxu1 %v190_v24  ;;  %v6251_v30 = vld [vmem:[%s6150_s3 + $0x68] sm:$0xff]  ;;  %v6254_v31 = vld [vmem:[%s6150_s3 + $0x60] sm:$0xff]  ;;  %v148_v33 = vld [vmem:[%s9900_s1 + $0x18] sm:$0xff]  ;;  %p6001_p13 = pneg %p6000_p12  ;;  %p6007_p2 = por %p6006_p1, %p6005_p0 }
  0x1e   : > { %318 = vperm.xlu1 %5735, %v6165_v8   ;;  %1469 = vmatpush1.msra.mxu0 %v156_v10  ;;  %v6271_v35 = vld [vmem:[%s6150_s3 + $0x78] sm:$0xff]  ;;  %v6274_v36 = vld [vmem:[%s6150_s3 + $0x70] sm:$0xff]  ;;  %v186_v38 = vld [vmem:[%s9900_s1 + $0x148] sm:$0xff] }
  0x1f   : > { %312 = vperm.xlu0 %5734, %v6168_v9   ;;  %1470 = vmatprep.subr.mxu0 %v9912_v2  ;;  %v147_v37 = vld [vmem:[%s9900_s1 + $0x10] sm:$0xff]  ;;  %v146_v39 = vld [vmem:[%s9900_s1 + $0x8] sm:$0xff]  ;;  %v6294_v41 = vld [vmem:[%s6150_s3 + $0x80] sm:$0xff]  ;;  %p6008_p3 = pnand %p6007_p2, %p6001_p13 }
  0x20   : > { %1471 = vmatpush1.msra.mxu0 %v155_v11  ;;  %1691 = vmatprep.subr.mxu1 %v9912_v2  ;;  %v6291_v40 = vld [vmem:[%s6150_s3 + $0x88] sm:$0xff]  ;;  %v185_v42 = vld [vmem:[%s9900_s1 + $0x140] sm:$0xff]  ;;  %v184_v44 = vld [vmem:[%s9900_s1 + $0x138] sm:$0xff] }
  0x21   : > { %1472 = vmatprep.subr.mxu0 %v9912_v2  ;;  %1692 = vmatpush1.msra.mxu1 %v189_v28  ;;  %v145_v43 = vld [vmem:[%s9900_s1] sm:$0xff]  ;;  %v6311_v45 = vld [vmem:[%s6150_s3 + $0x98] sm:$0xff]  ;;  %v6314_v46 = vld [vmem:[%s6150_s3 + $0x90] sm:$0xff] }
  0x22   : > { %324 = vperm.xlu1 %5735, %v6181_v12   ;;  %1473 = vmatpush1.msra.mxu0 %v154_v14  ;;  %v176_v47 = vld [vmem:[%s9900_s1 + $0xf8] sm:$0xff]  ;;  %v183_v48 = vld [vmem:[%s9900_s1 + $0x130] sm:$0xff]  ;;  %v6331_v50 = vld [vmem:[%s6150_s3 + $0xa8] sm:$0xff] }
  0x23   : > { %321 = vperm.xlu0 %5734, %v6184_v13   ;;  %1474 = vmatprep.subr.mxu0 %v9912_v2  ;;  %v175_v49 = vld [vmem:[%s9900_s1 + $0xf0] sm:$0xff]  ;;  %v6334_v51 = vld [vmem:[%s6150_s3 + $0xa0] sm:$0xff]  ;;  %v182_v52 = vld [vmem:[%s9900_s1 + $0x128] sm:$0xff] }
  0x24   : > { %1475 = vmatpush1.msra.mxu0 %v153_v17  ;;  %1693 = vmatprep.subr.mxu1 %v9912_v2  ;;  %v174_v53 = vld [vmem:[%s9900_s1 + $0xe8] sm:$0xff]  ;;  %v181_v54 = vld [vmem:[%s9900_s1 + $0x120] sm:$0xff]  ;;  %v6351_v55 = vld [vmem:[%s6150_s3 + $0xb8] sm:$0xff] }
  0x25   : > { %1476 = vmatprep.subr.mxu0 %v9912_v2  ;;  %1694 = vmatpush1.msra.mxu1 %v188_v32  ;;  %v6354_v56 = vld [vmem:[%s6150_s3 + $0xb0] sm:$0xff]  ;;  %v173_v57 = vld [vmem:[%s9900_s1 + $0xe0] sm:$0xff]  ;;  %v180_v58 = vld [vmem:[%s9900_s1 + $0x118] sm:$0xff] }
  0x26   : > { %330 = vperm.xlu1 %5735, %v6193_v15   ;;  %1477 = vmatpush1.msra.mxu0 %v152_v18  ;;  %v172_v59 = vld [vmem:[%s9900_s1 + $0xd8] sm:$0xff]  ;;  %v6371_v60 = vld [vmem:[%s6150_s3 + $0xc8] sm:$0xff]  ;;  %v6374_v61 = vld [vmem:[%s6150_s3 + $0xc0] sm:$0xff] }
  0x27   : > { %327 = vperm.xlu0 %5734, %v6196_v16   ;;  %1478 = vmatprep.subr.mxu0 %v9912_v2  ;;  %v179_v62 = vld [vmem:[%s9900_s1 + $0x110] sm:$0xff]  ;;  %v178_v0 = vld [vmem:[%s9900_s1 + $0x108] sm:$0xff]  ;;  %v6391_v3 = vld [vmem:[%s6150_s3 + $0xd8] sm:$0xff] }
  0x28   : > { %1479 = vmatpush1.msra.mxu0 %v151_v23  ;;  %1695 = vmatprep.subr.mxu1 %v9912_v2  ;;  %v171_v63 = vld [vmem:[%s9900_s1 + $0xd0] sm:$0xff]  ;;  %v170_v7 = vld [vmem:[%s9900_s1 + $0xc8] sm:$0xff]  ;;  %v177_v10 = vld [vmem:[%s9900_s1 + $0x100] sm:$0xff] }
  0x29   : > { %1480 = vmatprep.subr.mxu0 %v9912_v2  ;;  %1696 = vmatpush1.msra.mxu1 %v187_v34  ;;  %v6394_v4 = vld [vmem:[%s6150_s3 + $0xd0] sm:$0xff]  ;;  %v169_v11 = vld [vmem:[%s9900_s1 + $0xc0] sm:$0xff]  ;;  %v6411_v14 = vld [vmem:[%s6150_s3 + $0xe8] sm:$0xff] }
  0x2a   : > { %336 = vperm.xlu1 %5735, %v6209_v19   ;;  %1481 = vmatpush1.msra.mxu0 %v150_v27  ;;  %v6414_v17 = vld [vmem:[%s6150_s3 + $0xe0] sm:$0xff]  ;;  %v208_v18 = vld [vmem:[%s9900_s1 + $0x1f8] sm:$0xff]  ;;  %v207_v22 = vld [vmem:[%s9900_s1 + $0x1f0] sm:$0xff] }
  0x2b   : > { %333 = vperm.xlu0 %5734, %v6212_v20   ;;  %1482 = vmatprep.subr.mxu0 %v9912_v2  ;;  %v168_v21 = vld [vmem:[%s9900_s1 + $0xb8] sm:$0xff]  ;;  %v6434_v24 = vld [vmem:[%s6150_s3 + $0xf0] sm:$0xff]  ;;  %v206_v28 = vld [vmem:[%s9900_s1 + $0x1e8] sm:$0xff] }
  0x2c   : > { %1483 = vmatpush1.msra.mxu0 %v149_v29  ;;  %1697 = vmatprep.subr.mxu1 %v9912_v2  ;;  %v6431_v23 = vld [vmem:[%s6150_s3 + $0xf8] sm:$0xff]  ;;  %v167_v27 = vld [vmem:[%s9900_s1 + $0xb0] sm:$0xff]  ;;  %v166_v29 = vld [vmem:[%s9900_s1 + $0xa8] sm:$0xff] }
  0x2d   : > { %1484 = vmatprep.subr.mxu0 %v9912_v2  ;;  %1698 = vmatpush1.msra.mxu1 %v186_v38  ;;  %v205_v32 = vld [vmem:[%s9900_s1 + $0x1e0] sm:$0xff]  ;;  %v164_v38 = vld [vmem:[%s9900_s1 + $0x98] sm:$0xff] }
  0x2e   : > { %342 = vperm.xlu1 %5735, %v6231_v25   ;;  %1485 = vmatpush1.msra.mxu0 %v148_v33  ;;  %v9908_v33 = vmov 1   ;;  %v165_v34 = vld [vmem:[%s9900_s1 + $0xa0] sm:$0xff] }
  0x2f   : > { %339 = vperm.xlu0 %5734, %v6234_v26   ;;  %1486 = vmatprep.subr.mxu0 %v9912_v2 }
  0x30   : > { %1487 = vmatpush1.msra.mxu0 %v147_v37  ;;  %1699 = vmatprep.subr.mxu1 %v9912_v2  ;;  %v204_v37 = vld [vmem:[%s9900_s1 + $0x1d8] sm:$0xff] }
  0x31   : > { %1488 = vmatprep.subr.mxu0 %v9912_v2  ;;  %1700 = vmatpush1.msra.mxu1 %v185_v42  ;;  %v163_v42 = vld [vmem:[%s9900_s1 + $0x90] sm:$0xff] }
  0x32   : > { %348 = vperm.xlu1 %5735, %v6251_v30   ;;  %1489 = vmatpush1.msra.mxu0 %v146_v39  ;;  %v203_v39 = vld [vmem:[%s9900_s1 + $0x1d0] sm:$0xff] }
  0x33   : > { %345 = vperm.xlu0 %5734, %v6254_v31   ;;  %1490 = vmatprep.subr.mxu0 %v9912_v2 }
  0x34   : > { %1491 = vmatpush1.msra.mxu0 %v145_v43  ;;  %1701 = vmatprep.subr.mxu1 %v9912_v2  ;;  %v202_v43 = vld [vmem:[%s9900_s1 + $0x1c8] sm:$0xff] }
  0x35   : > { %1492 = vmatprep.subr.mxu0 %v9912_v2  ;;  %1702 = vmatpush1.msra.mxu1 %v184_v44  ;;  %v162_v44 = vld [vmem:[%s9900_s1 + $0x88] sm:$0xff] }
  0x36   : > { %354 = vperm.xlu1 %5735, %v6271_v35   ;;  %1493 = vmatpush2.msra.mxu0 %v176_v47  ;;  %v201_v47 = vld [vmem:[%s9900_s1 + $0x1c0] sm:$0xff] }
  0x37   : > { %351 = vperm.xlu0 %5734, %v6274_v36   ;;  %1703 = vmatprep.subr.mxu1 %v9912_v2 }
  0x38   : > { %1494 = vmatprep.subr.mxu0 %v9912_v2  ;;  %1704 = vmatpush1.msra.mxu1 %v183_v48  ;;  %v161_v48 = vld [vmem:[%s9900_s1 + $0x80] sm:$0xff] }
  0x39   : > { %1495 = vmatpush2.msra.mxu0 %v175_v49  ;;  %1705 = vmatprep.subr.mxu1 %v9912_v2  ;;  %v200_v49 = vld [vmem:[%s9900_s1 + $0x1b8] sm:$0xff] }
  0x3a   : > { %360 = vperm.xlu1 %5735, %v6291_v40   ;;  %1496 = vmatprep.subr.mxu0 %v9912_v2 }
  0x3b   : > { %357 = vperm.xlu0 %5734, %v6294_v41   ;;  %1706 = vmatpush1.msra.mxu1 %v182_v52  ;;  %v199_v52 = vld [vmem:[%s9900_s1 + $0x1b0] sm:$0xff] }
  0x3c   : > { %1497 = vmatpush2.msra.mxu0 %v174_v53  ;;  %1707 = vmatprep.subr.mxu1 %v9912_v2  ;;  %v198_v53 = vld [vmem:[%s9900_s1 + $0x1a8] sm:$0xff] }
  0x3d   : > { %1498 = vmatprep.subr.mxu0 %v9912_v2  ;;  %1708 = vmatpush1.msra.mxu1 %v181_v54  ;;  %v197_v54 = vld [vmem:[%s9900_s1 + $0x1a0] sm:$0xff] }
  0x3e   : > { %366 = vperm.xlu1 %5735, %v6311_v45   ;;  %1499 = vmatpush2.msra.mxu0 %v173_v57  ;;  %v196_v57 = vld [vmem:[%s9900_s1 + $0x198] sm:$0xff] }
  0x3f   : > { %363 = vperm.xlu0 %5734, %v6314_v46   ;;  %1709 = vmatprep.subr.mxu1 %v9912_v2 }
  0x40   : > { %1500 = vmatprep.subr.mxu0 %v9912_v2  ;;  %1710 = vmatpush1.msra.mxu1 %v180_v58  ;;  %v195_v58 = vld [vmem:[%s9900_s1 + $0x190] sm:$0xff] }
  0x41   : > { %1501 = vmatpush2.msra.mxu0 %v172_v59  ;;  %1711 = vmatprep.subr.mxu1 %v9912_v2  ;;  %v194_v59 = vld [vmem:[%s9900_s1 + $0x188] sm:$0xff] }
  0x42   : > { %372 = vperm.xlu1 %5735, %v6331_v50   ;;  %1502 = vmatprep.subr.mxu0 %v9912_v2 }
  0x43   : > { %369 = vperm.xlu0 %5734, %v6334_v51   ;;  %1712 = vmatpush1.msra.mxu1 %v179_v62  ;;  %v193_v62 = vld [vmem:[%s9900_s1 + $0x180] sm:$0xff] }
  0x44   : > { %1503 = vmatpush2.msra.mxu0 %v171_v63  ;;  %1713 = vmatprep.subr.mxu1 %v9912_v2  ;;  %v273_v63 = vlaneseq }
  0x45   : > { %1504 = vmatprep.subr.mxu0 %v9912_v2  ;;  %1714 = vmatpush1.msra.mxu1 %v178_v0 }
  0x46   : > { %378 = vperm.xlu1 %5735, %v6351_v55   ;;  %1505 = vmatpush2.msra.mxu0 %v170_v7  ;;  %v6554_v0 = vand.u32 127, %v273_v63 }
  0x47   : > { %375 = vperm.xlu0 %5734, %v6354_v56   ;;  %1715 = vmatprep.subr.mxu1 %v9912_v2 }
  0x48   : > { %1506 = vmatprep.subr.mxu0 %v9912_v2  ;;  %1716 = vmatpush1.msra.mxu1 %v177_v10  ;;  %v6559_v7 = vadd.s32 128, %v6554_v0 }
  0x49   : > { %1507 = vmatpush2.msra.mxu0 %v169_v11  ;;  %1717 = vmatprep.subr.mxu1 %v9912_v2 }
  0x4a   : > { %384 = vperm.xlu1 %5735, %v6371_v60   ;;  %1508 = vmatprep.subr.mxu0 %v9912_v2 }
  0x4b   : > { %381 = vperm.xlu0 %5734, %v6374_v61   ;;  %1718 = vmatpush2.msra.mxu1 %v208_v18  ;;  %v224_v18 = vld [vmem:[%s9900_s1 + $0x278] sm:$0xff] }
  0x4c   : > { %1509 = vmatpush2.msra.mxu0 %v168_v21  ;;  %1719 = vmatprep.subr.mxu1 %v9912_v2  ;;  %v9910_v21 = vmov 1.0  }
  0x4d   : > { %1510 = vmatprep.subr.mxu0 %v9912_v2  ;;  %1720 = vmatpush2.msra.mxu1 %v207_v22 }
  0x4e   : > { %390 = vperm.xlu1 %5735, %v6391_v3   ;;  %1511 = vmatpush2.msra.mxu0 %v167_v27 }
  0x4f   : > { %387 = vperm.xlu0 %5734, %v6394_v4   ;;  %1721 = vmatprep.subr.mxu1 %v9912_v2 }
  0x50   : > { %1512 = vmatprep.subr.mxu0 %v9912_v2  ;;  %1722 = vmatpush2.msra.mxu1 %v206_v28  ;;  %v9904_v28 = vmov 2  }
  0x51   : > { %1513 = vmatpush2.msra.mxu0 %v166_v29  ;;  %1723 = vmatprep.subr.mxu1 %v9912_v2  ;;  %v223_v29 = vld [vmem:[%s9900_s1 + $0x270] sm:$0xff] }
  0x52   : > { %396 = vperm.xlu1 %5735, %v6411_v14   ;;  %1514 = vmatprep.subr.mxu0 %v9912_v2 }
  0x53   : > { %393 = vperm.xlu0 %5734, %v6414_v17   ;;  %1724 = vmatpush2.msra.mxu1 %v205_v32 }
  0x54   : > { %1515 = vmatpush2.msra.mxu0 %v165_v34  ;;  %1725 = vmatprep.subr.mxu1 %v9912_v2 }
  0x55   : > { %1516 = vmatprep.subr.mxu0 %v9912_v2  ;;  %1726 = vmatpush2.msra.mxu1 %v204_v37  ;;  %v222_v37 = vld [vmem:[%s9900_s1 + $0x268] sm:$0xff] }
  0x56   : > { %402 = vperm.xlu1 %5735, %v6431_v23   ;;  %1517 = vmatpush2.msra.mxu0 %v164_v38 }
  0x57   : > { %399 = vperm.xlu0 %5734, %v6434_v24   ;;  %1727 = vmatprep.subr.mxu1 %v9912_v2 }
  0x58   : > { %1518 = vmatprep.subr.mxu0 %v9912_v2  ;;  %1728 = vmatpush2.msra.mxu1 %v203_v39 }
  0x59   : > { %1519 = vmatpush2.msra.mxu0 %v163_v42  ;;  %1729 = vmatprep.subr.mxu1 %v9912_v2 }
  0x5a   : > { %5737 = vset.pattern.permute.xlu1 %v9908_v33  ;;  %1520 = vmatprep.subr.mxu0 %v9912_v2 }
  0x5b   : > { %5736 = vset.pattern.permute.xlu0 %v9908_v33  ;;  %600 = vperm.xlu1 %5737, %v6168_v9  }
  0x5c   : > { %597 = vperm.xlu0 %5736, %v6157_v6   ;;  %1730 = vmatpush2.msra.mxu1 %v202_v43 }
  0x5d   : > { %1521 = vmatpush2.msra.mxu0 %v162_v44  ;;  %1731 = vmatprep.subr.mxu1 %v9912_v2 }
  0x5e   : > { %1522 = vmatprep.subr.mxu0 %v9912_v2  ;;  %1732 = vmatpush2.msra.mxu1 %v201_v47 }
  0x5f   : > { %603 = vperm.xlu1 %5737, %v6154_v5   ;;  %1523 = vmatpush2.msra.mxu0 %v161_v48 }
  0x60   : > { %606 = vperm.xlu0 %5736, %v6165_v8   ;;  %1733 = vmatprep.subr.mxu1 %v9912_v2 }
  0x61   : > { %1734 = vmatpush2.msra.mxu1 %v200_v49  ;;  %1910 = vmatprep.subr.mxu0 %v9912_v2 }
  0x62   : > { %1735 = vmatprep.subr.mxu1 %v9912_v2 }
  0x63   : > { %609 = vperm.xlu1 %5737, %v6184_v13   ;;  %1736 = vmatpush2.msra.mxu1 %v199_v52 }
  0x64   : > { %612 = vperm.xlu0 %5736, %v6181_v12   ;;  %1737 = vmatprep.subr.mxu1 %v9912_v2 }
  0x65   : > { %1738 = vmatpush2.msra.mxu1 %v198_v53 }
  0x66   : > { %1739 = vmatprep.subr.mxu1 %v9912_v2 }
  0x67   : > { %615 = vperm.xlu1 %5737, %v6196_v16   ;;  %1740 = vmatpush2.msra.mxu1 %v197_v54 }
  0x68   : > { %618 = vperm.xlu0 %5736, %v6193_v15   ;;  %1741 = vmatprep.subr.mxu1 %v9912_v2 }
  0x69   : > { %1742 = vmatpush2.msra.mxu1 %v196_v57 }
  0x6a   : > { %1743 = vmatprep.subr.mxu1 %v9912_v2 }
  0x6b   : > { %621 = vperm.xlu1 %5737, %v6212_v20   ;;  %1744 = vmatpush2.msra.mxu1 %v195_v58 }
  0x6c   : > { %624 = vperm.xlu0 %5736, %v6209_v19   ;;  %1745 = vmatprep.subr.mxu1 %v9912_v2 }
  0x6d   : > { %1746 = vmatpush2.msra.mxu1 %v194_v59 }
  0x6e   : > { %1747 = vmatprep.subr.mxu1 %v9912_v2 }
  0x6f   : > { %627 = vperm.xlu1 %5737, %v6234_v26   ;;  %1748 = vmatpush2.msra.mxu1 %v193_v62 }
  0x70   : > { %630 = vperm.xlu0 %5736, %v6231_v25   ;;  %2135 = vmatprep.subr.mxu1 %v9912_v2 }
  0x73   : > { %633 = vperm.xlu1 %5737, %v6254_v31  }
  0x74   : > { %636 = vperm.xlu0 %5736, %v6251_v30  }
  0x77   : > { %639 = vperm.xlu1 %5737, %v6274_v36  }
  0x78   : > { %642 = vperm.xlu0 %5736, %v6271_v35  }
  0x7b   : > { %645 = vperm.xlu1 %5737, %v6294_v41  }
  0x7c   : > { %648 = vperm.xlu0 %5736, %v6291_v40  }
  0x7f   : > { %651 = vperm.xlu1 %5737, %v6314_v46  }
  0x80   : > { %654 = vperm.xlu0 %5736, %v6311_v45  }
  0x83   : > { %657 = vperm.xlu1 %5737, %v6334_v51  }
  0x84   : > { %660 = vperm.xlu0 %5736, %v6331_v50  }
  0x87   : > { %663 = vperm.xlu1 %5737, %v6354_v56  }
  0x88   : > { %666 = vperm.xlu0 %5736, %v6351_v55  }
  0x8b   : > { %669 = vperm.xlu1 %5737, %v6374_v61  }
  0x8c   : > { %672 = vperm.xlu0 %5736, %v6371_v60  }
  0x8f   : > { %675 = vperm.xlu1 %5737, %v6394_v4  }
  0x90   : > { %678 = vperm.xlu0 %5736, %v6391_v3  }
  0x93   : > { %681 = vperm.xlu1 %5737, %v6414_v17  }
  0x94   : > { %684 = vperm.xlu0 %5736, %v6411_v14  }
  0x95   : > { %v316_v10 = vpop.permute.xlu1 %315 }
  0x96   : > { %v310_v11 = vpop.permute.xlu0 %309  ;;  %vm409_vm4 = vcmp.eq.s32.totalorder %v6559_v7, %v316_v10  ;;  %vm408_vm5 = vcmp.eq.s32.totalorder %v6554_v0, %v316_v10 }
  0x97   : > { %vm405_vm0 = vcmp.eq.s32.totalorder %v6559_v7, %v310_v11  ;;  %vm404_vm1 = vcmp.eq.s32.totalorder %v6554_v0, %v310_v11  ;;  %687 = vperm.xlu1 %5737, %v6434_v24  }
  0x98   : > { %4849 = vmatprep.mubr.msk.f32.mxu0 %vm405_vm0, %v9910_v21  ;;  %690 = vperm.xlu0 %5736, %v6431_v23  }
  0x99   : > { %4850 = vmatmul.mubr.msk.f32.vlgmr.msra.gmra.mxu0 %vm404_vm1, %v9910_v21  ;;  %v319_v22 = vpop.permute.xlu1 %318 }
  0x9a   : > { %v313_v27 = vpop.permute.xlu0 %312  ;;  %1911 = vmatpush1.msra.mxu0 %v224_v18  ;;  %vm411_vm6 = vcmp.eq.s32.totalorder %v6559_v7, %v319_v22  ;;  %vm410_vm8 = vcmp.eq.s32.totalorder %v6554_v0, %v319_v22 }
  0x9b   : > { %vm407_vm2 = vcmp.eq.s32.totalorder %v6559_v7, %v313_v27  ;;  %vm406_vm3 = vcmp.eq.s32.totalorder %v6554_v0, %v313_v27  ;;  %1912 = vmatprep.subr.mxu0 %v9912_v2  ;;  %5738 = vset.pattern.permute.xlu1 %v9904_v28 }
  0x9c   : > { %4851 = vmatprep.mubr.msk.f32.mxu0 %vm407_vm2, %v9910_v21  ;;  %885 = vperm.xlu1 %5738, %v6157_v6  }
  0x9d   : > { %4852 = vmatmul.mubr.msk.f32.gmra.mxu0 %vm406_vm3, %v9910_v21  ;;  %v325_v32 = vpop.permute.xlu1 %324  ;;  %5739 = vset.pattern.permute.xlu0 %v9904_v28  ;;  %v5871_v28 = vld [vmem:[%s9900_s1 + $0x80] sm:$0xff] }
  0x9e   : > { %4853 = vmatprep.mubr.msk.f32.mxu0 %vm409_vm4, %v9910_v21  ;;  %v322_v34 = vpop.permute.xlu0 %321  ;;  %888 = vperm.xlu0 %5739, %v6168_v9   ;;  %vm415_vm10 = vcmp.eq.s32.totalorder %v6559_v7, %v325_v32  ;;  %vm414_vm12 = vcmp.eq.s32.totalorder %v6554_v0, %v325_v32 }
  0x9f   : > { %1913 = vmatpush1.msra.mxu0 %v223_v29  ;;  %vm413_vm7 = vcmp.eq.s32.totalorder %v6559_v7, %v322_v34  ;;  %vm412_vm9 = vcmp.eq.s32.totalorder %v6554_v0, %v322_v34  ;;  %v5810_v34 = vld [vmem:[%s6150_s3 + $0x10] sm:$0xff] }
  0xa0   : > { %891 = vperm.xlu1 %5738, %v6154_v5   ;;  %1914 = vmatprep.subr.mxu0 %v9912_v2  ;;  %v221_v5 = vld [vmem:[%s9900_s1 + $0x260] sm:$0xff] }
  0xa1   : > { %4854 = vmatmul.mubr.msk.f32.gmra.mxu0 %vm408_vm5, %v9910_v21  ;;  %v331_v38 = vpop.permute.xlu1 %330 }
  0xa2   : > { %4855 = vmatprep.mubr.msk.f32.mxu0 %vm411_vm6, %v9910_v21  ;;  %v328_v39 = vpop.permute.xlu0 %327  ;;  %897 = vperm.xlu0 %5739, %v6184_v13   ;;  %v220_v13 = vld [vmem:[%s9900_s1 + $0x258] sm:$0xff]  ;;  %vm419_vm14 = vcmp.eq.s32.totalorder %v6559_v7, %v331_v38  ;;  %vm418_vm0 = vcmp.eq.s32.totalorder %v6554_v0, %v331_v38 }
  0xa3   : > { %1915 = vmatpush1.msra.mxu0 %v222_v37  ;;  %vm417_vm11 = vcmp.eq.s32.totalorder %v6559_v7, %v328_v39  ;;  %vm416_vm13 = vcmp.eq.s32.totalorder %v6554_v0, %v328_v39  ;;  %v5811_v38 = vld [vmem:[%s6150_s3 + $0x38] sm:$0xff]  ;;  %v235_v39 = vld [vmem:[%s9900_s1 + $0x2d0] sm:$0xff] }
  0xa4   : > { %894 = vperm.xlu1 %5738, %v6165_v8   ;;  %1916 = vmatprep.subr.mxu0 %v9912_v2 }
  0xa5   : > { %4856 = vmatmul.mubr.msk.f32.gmra.mxu0 %vm410_vm8, %v9910_v21  ;;  %v6603_v42 = vpop.permute.xlu1 %336 }
  0xa6   : > { %v334_v43 = vpop.permute.xlu0 %333  ;;  %4857 = vmatprep.mubr.msk.f32.mxu0 %vm413_vm7, %v9910_v21  ;;  %903 = vperm.xlu0 %5739, %v6196_v16   ;;  %v219_v16 = vld [vmem:[%s9900_s1 + $0x250] sm:$0xff]  ;;  %vm423_vm2 = vcmp.eq.s32.totalorder %v6559_v7, %v6603_v42  ;;  %vm422_vm4 = vcmp.eq.s32.totalorder %v6554_v0, %v6603_v42 }
  0xa7   : > { %1917 = vmatpush1.msra.mxu0 %v221_v5  ;;  %vm421_vm15 = vcmp.eq.s32.totalorder %v6559_v7, %v334_v43  ;;  %vm420_vm1 = vcmp.eq.s32.totalorder %v6554_v0, %v334_v43  ;;  %v5812_v5 = vld [vmem:[%s6150_s3 + $0x20] sm:$0xff] }
  0xa8   : > { %900 = vperm.xlu1 %5738, %v6181_v12   ;;  %1918 = vmatprep.subr.mxu0 %v9912_v2 }
  0xa9   : > { %4858 = vmatmul.mubr.msk.f32.gmra.mxu0 %vm412_vm9, %v9910_v21  ;;  %v6615_v44 = vpop.permute.xlu1 %342 }
  0xaa   : > { %4859 = vmatprep.mubr.msk.f32.mxu0 %vm415_vm10, %v9910_v21  ;;  %v6618_v47 = vpop.permute.xlu0 %339  ;;  %909 = vperm.xlu0 %5739, %v6212_v20   ;;  %vm427_vm6 = vcmp.eq.s32.totalorder %v6559_v7, %v6615_v44  ;;  %vm426_vm8 = vcmp.eq.s32.totalorder %v6554_v0, %v6615_v44  ;;  %v234_v44 = vld [vmem:[%s9900_s1 + $0x2c8] sm:$0xff] }
  0xab   : > { %1919 = vmatpush1.msra.mxu0 %v220_v13  ;;  %vm425_vm3 = vcmp.eq.s32.totalorder %v6559_v7, %v6618_v47  ;;  %vm424_vm5 = vcmp.eq.s32.totalorder %v6554_v0, %v6618_v47  ;;  %v5813_v13 = vld [vmem:[%s6150_s3 + $0x48] sm:$0xff]  ;;  %v5814_v47 = vld [vmem:[%s6150_s3 + $0x30] sm:$0xff] }
  0xac   : > { %906 = vperm.xlu1 %5738, %v6193_v15   ;;  %1920 = vmatprep.subr.mxu0 %v9912_v2  ;;  %v218_v15 = vld [vmem:[%s9900_s1 + $0x248] sm:$0xff] }
  0xad   : > { %4860 = vmatmul.mubr.msk.f32.gmra.mxu0 %vm414_vm12, %v9910_v21  ;;  %v6629_v48 = vpop.permute.xlu1 %348 }
  0xae   : > { %v6631_v49 = vpop.permute.xlu0 %345  ;;  %4861 = vmatprep.mubr.msk.f32.mxu0 %vm417_vm11, %v9910_v21  ;;  %915 = vperm.xlu0 %5739, %v6234_v26   ;;  %vm431_vm10 = vcmp.eq.s32.totalorder %v6559_v7, %v6629_v48  ;;  %vm430_vm12 = vcmp.eq.s32.totalorder %v6554_v0, %v6629_v48 }
  0xaf   : > { %1921 = vmatpush1.msra.mxu0 %v219_v16  ;;  %vm429_vm7 = vcmp.eq.s32.totalorder %v6559_v7, %v6631_v49  ;;  %vm428_vm9 = vcmp.eq.s32.totalorder %v6554_v0, %v6631_v49  ;;  %v5815_v49 = vld [vmem:[%s6150_s3 + $0x58] sm:$0xff] }
  0xb0   : > { %912 = vperm.xlu1 %5738, %v6209_v19   ;;  %1922 = vmatprep.subr.mxu0 %v9912_v2  ;;  %v217_v19 = vld [vmem:[%s9900_s1 + $0x240] sm:$0xff] }
  0xb1   : > { %4862 = vmatmul.mubr.msk.f32.gmra.mxu0 %vm416_vm13, %v9910_v21  ;;  %v6643_v20 = vpop.permute.xlu1 %354 }
  0xb2   : > { %4863 = vmatprep.mubr.msk.f32.mxu0 %vm419_vm14, %v9910_v21  ;;  %v6646_v52 = vpop.permute.xlu0 %351  ;;  %921 = vperm.xlu0 %5739, %v6254_v31   ;;  %vm435_vm14 = vcmp.eq.s32.totalorder %v6559_v7, %v6643_v20 }
  0xb3   : > { %1923 = vmatpush1.msra.mxu0 %v218_v15  ;;  %vm433_vm11 = vcmp.eq.s32.totalorder %v6559_v7, %v6646_v52  ;;  %vm432_vm13 = vcmp.eq.s32.totalorder %v6554_v0, %v6646_v52  ;;  %v233_v15 = vld [vmem:[%s9900_s1 + $0x2c0] sm:$0xff] }
  0xb4   : > { %918 = vperm.xlu1 %5738, %v6231_v25   ;;  %1924 = vmatprep.subr.mxu0 %v9912_v2  ;;  %v216_v25 = vld [vmem:[%s9900_s1 + $0x238] sm:$0xff] }
  0xb5   : > { %4864 = vmatmul.mubr.msk.f32.gmra.mxu0 %vm418_vm0, %v9910_v21  ;;  %v6657_v26 = vpop.permute.xlu1 %360  ;;  %vm434_vm0 = vcmp.eq.s32.totalorder %v6554_v0, %v6643_v20  ;;  %v5816_v20 = vld [vmem:[%s6150_s3 + $0x40] sm:$0xff] }
  0xb6   : > { %v6659_v53 = vpop.permute.xlu0 %357  ;;  %4865 = vmatprep.mubr.msk.f32.mxu0 %vm421_vm15, %v9910_v21  ;;  %927 = vperm.xlu0 %5739, %v6274_v36  }
  0xb7   : > { %1925 = vmatpush1.msra.mxu0 %v217_v19  ;;  %vm437_vm15 = vcmp.eq.s32.totalorder %v6559_v7, %v6659_v53 }
  0xb8   : > { %924 = vperm.xlu1 %5738, %v6251_v30   ;;  %1926 = vmatprep.subr.mxu0 %v9912_v2  ;;  %v215_v30 = vld [vmem:[%s9900_s1 + $0x230] sm:$0xff] }
  0xb9   : > { %4866 = vmatmul.mubr.msk.f32.gmra.mxu0 %vm420_vm1, %v9910_v21  ;;  %v6672_v31 = vpop.permute.xlu1 %366  ;;  %vm436_vm1 = vcmp.eq.s32.totalorder %v6554_v0, %v6659_v53  ;;  %v232_v53 = vld [vmem:[%s9900_s1 + $0x2b8] sm:$0xff] }
  0xba   : > { %4867 = vmatprep.mubr.msk.f32.mxu0 %vm423_vm2, %v9910_v21  ;;  %v6675_v54 = vpop.permute.xlu0 %363  ;;  %933 = vperm.xlu0 %5739, %v6294_v41  }
  0xbb   : > { %1927 = vmatpush1.msra.mxu0 %v216_v25  ;;  %v5818_v25 = vld [vmem:[%s6150_s3 + $0x50] sm:$0xff] }
  0xbc   : > { %930 = vperm.xlu1 %5738, %v6271_v35   ;;  %1928 = vmatprep.subr.mxu0 %v9912_v2  ;;  %v214_v35 = vld [vmem:[%s9900_s1 + $0x228] sm:$0xff] }
  0xbd   : > { %4868 = vmatmul.mubr.msk.f32.gmra.mxu0 %vm422_vm4, %v9910_v21  ;;  %v6688_v36 = vpop.permute.xlu1 %372  ;;  %vm439_vm4 = vcmp.eq.s32.totalorder %v6559_v7, %v6657_v26 }
  0xbe   : > { %v6690_v57 = vpop.permute.xlu0 %369  ;;  %4869 = vmatprep.mubr.msk.f32.mxu0 %vm425_vm3, %v9910_v21  ;;  %939 = vperm.xlu0 %5739, %v6314_v46   ;;  %v212_v46 = vld [vmem:[%s9900_s1 + $0x218] sm:$0xff] }
  0xbf   : > { %1929 = vmatpush1.msra.mxu0 %v215_v30  ;;  %v5819_v30 = vld [vmem:[%s6150_s3 + $0x78] sm:$0xff] }
  0xc0   : > { %936 = vperm.xlu1 %5738, %v6291_v40   ;;  %1930 = vmatprep.subr.mxu0 %v9912_v2  ;;  %v213_v40 = vld [vmem:[%s9900_s1 + $0x220] sm:$0xff] }
  0xc1   : > { %4870 = vmatmul.mubr.msk.f32.gmra.mxu0 %vm424_vm5, %v9910_v21  ;;  %v6704_v41 = vpop.permute.xlu1 %378 }
  0xc2   : > { %4871 = vmatprep.mubr.msk.f32.mxu0 %vm427_vm6, %v9910_v21  ;;  %v6707_v58 = vpop.permute.xlu0 %375  ;;  %945 = vperm.xlu0 %5739, %v6334_v51   ;;  %vm441_vm6 = vcmp.eq.s32.totalorder %v6559_v7, %v6675_v54 }
  0xc3   : > { %1931 = vmatpush1.msra.mxu0 %v214_v35 }
  0xc4   : > { %1932 = vmatprep.subr.mxu0 %v9912_v2  ;;  %942 = vperm.xlu1 %5738, %v6311_v45   ;;  %v211_v45 = vld [vmem:[%s9900_s1 + $0x210] sm:$0xff] }
  0xc5   : > { %4872 = vmatmul.mubr.msk.f32.gmra.mxu0 %vm426_vm8, %v9910_v21  ;;  %v6724_v51 = vpop.permute.xlu1 %384 }
  0xc6   : > { %v6726_v59 = vpop.permute.xlu0 %381  ;;  %4873 = vmatprep.mubr.msk.f32.mxu0 %vm429_vm7, %v9910_v21  ;;  %1933 = vmatpush1.msra.mxu0 %v213_v40  ;;  %vm438_vm7 = vcmp.eq.s32.totalorder %v6554_v0, %v6657_v26  ;;  %v5817_v26 = vld [vmem:[%s6150_s3 + $0x68] sm:$0xff] }
  0xc7   : > { %951 = vperm.xlu0 %5739, %v6354_v56   ;;  %1934 = vmatprep.subr.mxu0 %v9912_v2  ;;  %v209_v56 = vld [vmem:[%s9900_s1 + $0x200] sm:$0xff]  ;;  %v230_v40 = vld [vmem:[%s9900_s1 + $0x2a8] sm:$0xff] }
  0xc8   : > { %1935 = vmatpush1.msra.mxu0 %v212_v46  ;;  %948 = vperm.xlu1 %5738, %v6331_v50   ;;  %v210_v50 = vld [vmem:[%s9900_s1 + $0x208] sm:$0xff]  ;;  %v5822_v46 = vld [vmem:[%s6150_s3 + $0x70] sm:$0xff] }
  0xc9   : > { %4874 = vmatmul.mubr.msk.f32.gmra.mxu0 %vm428_vm9, %v9910_v21  ;;  %v6740_v62 = vpop.permute.xlu1 %390  ;;  %1936 = vmatprep.subr.mxu0 %v9912_v2  ;;  %vm440_vm9 = vcmp.eq.s32.totalorder %v6554_v0, %v6675_v54 }
  0xca   : > { %4875 = vmatprep.mubr.msk.f32.mxu0 %vm431_vm10, %v9910_v21  ;;  %v6743_v63 = vpop.permute.xlu0 %387  ;;  %1937 = vmatpush1.msra.mxu0 %v211_v45  ;;  %v5823_v45 = vld [vmem:[%s6150_s3 + $0x98] sm:$0xff] }
  0xcb   : > { %957 = vperm.xlu0 %5739, %v6374_v61   ;;  %1938 = vmatprep.subr.mxu0 %v9912_v2 }
  0xcc   : > { %954 = vperm.xlu1 %5738, %v6351_v55   ;;  %1939 = vmatpush1.msra.mxu0 %v210_v50  ;;  %v240_v55 = vld [vmem:[%s9900_s1 + $0x2f8] sm:$0xff]  ;;  %v229_v50 = vld [vmem:[%s9900_s1 + $0x2a0] sm:$0xff] }
  0xcd   : > { %4876 = vmatmul.mubr.msk.f32.gmra.mxu0 %vm430_vm12, %v9910_v21  ;;  %v6760_v61 = vpop.permute.xlu1 %396  ;;  %1940 = vmatprep.subr.mxu0 %v9912_v2 }
  0xce   : > { %v6762_v10 = vpop.permute.xlu0 %393  ;;  %4877 = vmatprep.mubr.msk.f32.mxu0 %vm433_vm11, %v9910_v21  ;;  %1941 = vmatpush1.msra.mxu0 %v209_v56  ;;  %vm443_vm11 = vcmp.eq.s32.totalorder %v6559_v7, %v6672_v31  ;;  %v5824_v56 = vld [vmem:[%s6150_s3 + $0x80] sm:$0xff] }
  0xcf   : > { %963 = vperm.xlu0 %5739, %v6394_v4   ;;  %1942 = vmatprep.subr.mxu0 %v9912_v2  ;;  %v238_v4 = vld [vmem:[%s9900_s1 + $0x2e8] sm:$0xff] }
  0xd0   : > { %960 = vperm.xlu1 %5738, %v6371_v60   ;;  %1943 = vmatpush2.msra.mxu0 %v240_v55  ;;  %v239_v60 = vld [vmem:[%s9900_s1 + $0x2f0] sm:$0xff] }
  0xd1   : > { %4878 = vmatmul.mubr.msk.f32.gmra.mxu0 %vm432_vm13, %v9910_v21  ;;  %v6776_v11 = vpop.permute.xlu1 %402  ;;  %1944 = vmatprep.subr.mxu0 %v9912_v2 }
  0xd2   : > { %4879 = vmatprep.mubr.msk.f32.mxu0 %vm435_vm14, %v9910_v21  ;;  %v6779_v18 = vpop.permute.xlu0 %399  ;;  %1945 = vmatpush2.msra.mxu0 %v239_v60  ;;  %vm442_vm14 = vcmp.eq.s32.totalorder %v6554_v0, %v6672_v31  ;;  %v5825_v60 = vld [vmem:[%s6150_s3 + $0xa8] sm:$0xff] }
  0xd3   : > { %969 = vperm.xlu0 %5739, %v6414_v17   ;;  %1946 = vmatprep.subr.mxu0 %v9912_v2 }
  0xd4   : > { %966 = vperm.xlu1 %5738, %v6391_v3   ;;  %1947 = vmatpush2.msra.mxu0 %v238_v4  ;;  %v228_v4 = vld [vmem:[%s9900_s1 + $0x298] sm:$0xff] }
  0xd5   : > { %4880 = vmatmul.mubr.msk.f32.gmra.mxu0 %vm434_vm0, %v9910_v21  ;;  %1948 = vmatprep.subr.mxu0 %v9912_v2  ;;  %vm445_vm0 = vcmp.eq.s32.totalorder %v6559_v7, %v6690_v57 }
  0xd6   : > { %4881 = vmatprep.mubr.msk.f32.mxu0 %vm437_vm15, %v9910_v21  ;;  %v601_v17 = vpop.permute.xlu1 %600 }
  0xd7   : > { %975 = vperm.xlu0 %5739, %v6434_v24   ;;  %v598_v22 = vpop.permute.xlu0 %597  ;;  %v9902_v24 = vmov 3   ;;  %vm695_vm5 = vcmp.eq.s32.totalorder %v6559_v7, %v601_v17  ;;  %vm694_vm8 = vcmp.eq.s32.totalorder %v6554_v0, %v601_v17 }
  0xd8   : > { %vm693_vm2 = vcmp.eq.s32.totalorder %v6559_v7, %v598_v22  ;;  %vm692_vm3 = vcmp.eq.s32.totalorder %v6554_v0, %v598_v22  ;;  %972 = vperm.xlu1 %5738, %v6411_v14   ;;  %v237_v14 = vld [vmem:[%s9900_s1 + $0x2e0] sm:$0xff] }
  0xd9   : > { %4882 = vmatmul.mubr.msk.f32.gmra.mxu0 %vm436_vm1, %v9910_v21  ;;  %4913 = vmatprep.mubr.msk.f32.mxu1 %vm693_vm2, %v9910_v21  ;;  %vm444_vm2 = vcmp.eq.s32.totalorder %v6554_v0, %v6690_v57  ;;  %v5820_v57 = vld [vmem:[%s6150_s3 + $0x60] sm:$0xff] }
  0xda   : > { %4883 = vmatprep.mubr.msk.f32.mxu0 %vm439_vm4, %v9910_v21  ;;  %4914 = vmatmul.mubr.msk.f32.vlgmr.msra.gmra.mxu1 %vm692_vm3, %v9910_v21  ;;  %v604_v3 = vpop.permute.xlu1 %603  ;;  %vm447_vm3 = vcmp.eq.s32.totalorder %v6559_v7, %v6688_v36 }
  0xdb   : > { %5740 = vset.pattern.permute.xlu0 %v9902_v24  ;;  %v607_v27 = vpop.permute.xlu0 %606  ;;  %4915 = vmatprep.mubr.msk.f32.mxu1 %vm695_vm5, %v9910_v21  ;;  %vm697_vm10 = vcmp.eq.s32.totalorder %v6559_v7, %v604_v3  ;;  %vm696_vm13 = vcmp.eq.s32.totalorder %v6554_v0, %v604_v3  ;;  %v5827_v3 = vld [vmem:[%s6150_s3 + $0xb8] sm:$0xff] }
  0xdc   : > { %1173 = vperm.xlu0 %5740, %v6157_v6   ;;  %978 = vperm.xlu1 %5738, %v6431_v23   ;;  %vm699_vm12 = vcmp.eq.s32.totalorder %v6559_v7, %v607_v27  ;;  %vm698_vm15 = vcmp.eq.s32.totalorder %v6554_v0, %v607_v27  ;;  %v227_v27 = vld [vmem:[%s9900_s1 + $0x290] sm:$0xff] }
  0xdd   : > { %4884 = vmatmul.mubr.msk.f32.gmra.mxu0 %vm438_vm7, %v9910_v21 }
  0xde   : > { %4885 = vmatprep.mubr.msk.f32.mxu0 %vm441_vm6, %v9910_v21  ;;  %4916 = vmatmul.mubr.msk.f32.gmra.mxu1 %vm694_vm8, %v9910_v21  ;;  %v610_v6 = vpop.permute.xlu1 %609  ;;  %vm446_vm6 = vcmp.eq.s32.totalorder %v6554_v0, %v6688_v36  ;;  %vm449_vm8 = vcmp.eq.s32.totalorder %v6559_v7, %v6707_v58  ;;  %v231_v36 = vld [vmem:[%s9900_s1 + $0x2b0] sm:$0xff] }
  0xdf   : > { %v613_v29 = vpop.permute.xlu0 %612  ;;  %1949 = vmatpush2.msra.mxu0 %v237_v14  ;;  %4917 = vmatprep.mubr.msk.f32.mxu1 %vm697_vm10, %v9910_v21  ;;  %vm701_vm1 = vcmp.eq.s32.totalorder %v6559_v7, %v610_v6  ;;  %vm700_vm5 = vcmp.eq.s32.totalorder %v6554_v0, %v610_v6  ;;  %vm448_vm10 = vcmp.eq.s32.totalorder %v6554_v0, %v6707_v58  ;;  %v5821_v58 = vld [vmem:[%s6150_s3 + $0x88] sm:$0xff]  ;;  %v5828_v14 = vld [vmem:[%s6150_s3 + $0xa0] sm:$0xff] }
  0xe0   : > { %1182 = vperm.xlu0 %5740, %v6165_v8   ;;  %5741 = vset.pattern.permute.xlu1 %v9902_v24  ;;  %v256_v8 = vld [vmem:[%s9900_s1 + $0x378] sm:$0xff]  ;;  %vm703_vm4 = vcmp.eq.s32.totalorder %v6559_v7, %v613_v29  ;;  %vm702_vm7 = vcmp.eq.s32.totalorder %v6554_v0, %v613_v29  ;;  %v226_v29 = vld [vmem:[%s9900_s1 + $0x288] sm:$0xff] }
  0xe1   : > { %4886 = vmatmul.mubr.msk.f32.gmra.mxu0 %vm440_vm9, %v9910_v21  ;;  %1176 = vperm.xlu1 %5741, %v6168_v9   ;;  %v236_v9 = vld [vmem:[%s9900_s1 + $0x2d8] sm:$0xff] }
  0xe2   : > { %4887 = vmatprep.mubr.msk.f32.mxu0 %vm443_vm11, %v9910_v21  ;;  %4918 = vmatmul.mubr.msk.f32.gmra.mxu1 %vm696_vm13, %v9910_v21  ;;  %v6844_v23 = vpop.permute.xlu1 %615  ;;  %vm451_vm11 = vcmp.eq.s32.totalorder %v6559_v7, %v6704_v41 }
  0xe3   : > { %v6846_v32 = vpop.permute.xlu0 %618  ;;  %1950 = vmatprep.subr.mxu0 %v9912_v2  ;;  %4919 = vmatprep.mubr.msk.f32.mxu1 %vm699_vm12, %v9910_v21  ;;  %vm705_vm9 = vcmp.eq.s32.totalorder %v6559_v7, %v6844_v23  ;;  %vm704_vm13 = vcmp.eq.s32.totalorder %v6554_v0, %v6844_v23 }
  0xe4   : > { %1188 = vperm.xlu0 %5740, %v6181_v12   ;;  %2136 = vmatpush1.msra.mxu1 %v256_v8  ;;  %vm707_vm12 = vcmp.eq.s32.totalorder %v6559_v7, %v6846_v32  ;;  %v5829_v8 = vld [vmem:[%s6150_s3 + $0xc8] sm:$0xff] }
  0xe5   : > { %4888 = vmatmul.mubr.msk.f32.gmra.mxu0 %vm442_vm14, %v9910_v21  ;;  %1179 = vperm.xlu1 %5741, %v5810_v34   ;;  %vm450_vm14 = vcmp.eq.s32.totalorder %v6554_v0, %v6704_v41  ;;  %v5831_v34 = vld [vmem:[%s6150_s3 + $0xd8] sm:$0xff] }
  0xe6   : > { %4889 = vmatprep.mubr.msk.f32.mxu0 %vm445_vm0, %v9910_v21  ;;  %4920 = vmatmul.mubr.msk.f32.gmra.mxu1 %vm698_vm15, %v9910_v21  ;;  %v6863_v37 = vpop.permute.xlu1 %621  ;;  %vm706_vm15 = vcmp.eq.s32.totalorder %v6554_v0, %v6846_v32  ;;  %vm453_vm0 = vcmp.eq.s32.totalorder %v6559_v7, %v6726_v59 }
  0xe7   : > { %v6866_v12 = vpop.permute.xlu0 %624  ;;  %1951 = vmatpush2.msra.mxu0 %v236_v9  ;;  %4921 = vmatprep.mubr.msk.f32.mxu1 %vm701_vm1, %v9910_v21  ;;  %vm709_vm1 = vcmp.eq.s32.totalorder %v6559_v7, %v6863_v37  ;;  %v225_v9 = vld [vmem:[%s9900_s1 + $0x280] sm:$0xff] }
  0xe8   : > { %1194 = vperm.xlu0 %5740, %v5811_v38   ;;  %1952 = vmatprep.subr.mxu0 %v9912_v2 }
  0xe9   : > { %4890 = vmatmul.mubr.msk.f32.gmra.mxu0 %vm444_vm2, %v9910_v21  ;;  %1185 = vperm.xlu1 %5741, %v5812_v5   ;;  %vm452_vm2 = vcmp.eq.s32.totalorder %v6554_v0, %v6726_v59  ;;  %v5833_v5 = vld [vmem:[%s6150_s3 + $0xd0] sm:$0xff] }
  0xea   : > { %4891 = vmatprep.mubr.msk.f32.mxu0 %vm447_vm3, %v9910_v21  ;;  %4922 = vmatmul.mubr.msk.f32.gmra.mxu1 %vm700_vm5, %v9910_v21  ;;  %v6884_v42 = vpop.permute.xlu1 %627  ;;  %vm455_vm3 = vcmp.eq.s32.totalorder %v6559_v7, %v6724_v51  ;;  %vm708_vm5 = vcmp.eq.s32.totalorder %v6554_v0, %v6863_v37  ;;  %v5832_v37 = vld [vmem:[%s6150_s3 + $0xc0] sm:$0xff] }
  0xeb   : > { %v6886_v43 = vpop.permute.xlu0 %630  ;;  %1953 = vmatpush2.msra.mxu0 %v235_v39  ;;  %4923 = vmatprep.mubr.msk.f32.mxu1 %vm703_vm4, %v9910_v21  ;;  %vm711_vm4 = vcmp.eq.s32.totalorder %v6559_v7, %v6866_v12  ;;  %v254_v39 = vld [vmem:[%s9900_s1 + $0x368] sm:$0xff] }
  0xec   : > { %1200 = vperm.xlu0 %5740, %v5813_v13   ;;  %1954 = vmatprep.subr.mxu0 %v9912_v2 }
  0xed   : > { %4892 = vmatmul.mubr.msk.f32.gmra.mxu0 %vm446_vm6, %v9910_v21  ;;  %1191 = vperm.xlu1 %5741, %v5814_v47   ;;  %vm454_vm6 = vcmp.eq.s32.totalorder %v6554_v0, %v6724_v51 }
  0xee   : > { %4893 = vmatprep.mubr.msk.f32.mxu0 %vm449_vm8, %v9910_v21  ;;  %4924 = vmatmul.mubr.msk.f32.gmra.mxu1 %vm702_vm7, %v9910_v21  ;;  %v6903_v16 = vpop.permute.xlu1 %633  ;;  %vm710_vm7 = vcmp.eq.s32.totalorder %v6554_v0, %v6866_v12  ;;  %vm457_vm8 = vcmp.eq.s32.totalorder %v6559_v7, %v6743_v63 }
  0xef   : > { %v6907_v48 = vpop.permute.xlu0 %636  ;;  %1955 = vmatpush2.msra.mxu0 %v234_v44  ;;  %4925 = vmatprep.mubr.msk.f32.mxu1 %vm705_vm9, %v9910_v21  ;;  %vm713_vm9 = vcmp.eq.s32.totalorder %v6559_v7, %v6884_v42  ;;  %v253_v44 = vld [vmem:[%s9900_s1 + $0x360] sm:$0xff] }
  0xf0   : > { %1206 = vperm.xlu0 %5740, %v5815_v49   ;;  %1956 = vmatprep.subr.mxu0 %v9912_v2 }
  0xf1   : > { %4894 = vmatmul.mubr.msk.f32.gmra.mxu0 %vm448_vm10, %v9910_v21  ;;  %1197 = vperm.xlu1 %5741, %v5816_v20   ;;  %vm456_vm10 = vcmp.eq.s32.totalorder %v6554_v0, %v6743_v63 }
  0xf2   : > { %4895 = vmatprep.mubr.msk.f32.mxu0 %vm451_vm11, %v9910_v21  ;;  %4926 = vmatmul.mubr.msk.f32.gmra.mxu1 %vm704_vm13, %v9910_v21  ;;  %v6927_v52 = vpop.permute.xlu1 %639  ;;  %vm459_vm11 = vcmp.eq.s32.totalorder %v6559_v7, %v6740_v62  ;;  %vm712_vm13 = vcmp.eq.s32.totalorder %v6554_v0, %v6884_v42 }
  0xf3   : > { %v6929_v19 = vpop.permute.xlu0 %642  ;;  %1957 = vmatpush2.msra.mxu0 %v233_v15  ;;  %4927 = vmatprep.mubr.msk.f32.mxu1 %vm707_vm12, %v9910_v21  ;;  %vm715_vm12 = vcmp.eq.s32.totalorder %v6559_v7, %v6886_v43  ;;  %v252_v15 = vld [vmem:[%s9900_s1 + $0x358] sm:$0xff] }
  0xf4   : > { %1212 = vperm.xlu0 %5740, %v5817_v26   ;;  %1958 = vmatprep.subr.mxu0 %v9912_v2  ;;  %v251_v26 = vld [vmem:[%s9900_s1 + $0x350] sm:$0xff] }
  0xf5   : > { %4896 = vmatmul.mubr.msk.f32.gmra.mxu0 %vm450_vm14, %v9910_v21  ;;  %1203 = vperm.xlu1 %5741, %v5818_v25   ;;  %vm458_vm14 = vcmp.eq.s32.totalorder %v6554_v0, %v6740_v62  ;;  %v5826_v62 = vld [vmem:[%s6150_s3 + $0x90] sm:$0xff] }
  0xf6   : > { %4897 = vmatprep.mubr.msk.f32.mxu0 %vm453_vm0, %v9910_v21  ;;  %4928 = vmatmul.mubr.msk.f32.gmra.mxu1 %vm706_vm15, %v9910_v21  ;;  %v6947_v31 = vpop.permute.xlu1 %645  ;;  %vm714_vm15 = vcmp.eq.s32.totalorder %v6554_v0, %v6886_v43  ;;  %vm461_vm0 = vcmp.eq.s32.totalorder %v6559_v7, %v6762_v10  ;;  %v5835_v43 = vld [vmem:[%s6150_s3 + $0xe0] sm:$0xff] }
  0xf7   : > { %v6951_v54 = vpop.permute.xlu0 %648  ;;  %1959 = vmatpush2.msra.mxu0 %v232_v53  ;;  %4929 = vmatprep.mubr.msk.f32.mxu1 %vm709_vm1, %v9910_v21  ;;  %vm717_vm1 = vcmp.eq.s32.totalorder %v6559_v7, %v6903_v16  ;;  %v5107_v53 = vld [vmem:[%s6150_s3 + $0x110] sm:$0xff] }
  0xf8   : > { %1218 = vperm.xlu0 %5740, %v5819_v30   ;;  %1960 = vmatprep.subr.mxu0 %v9912_v2 }
  0xf9   : > { %4898 = vmatmul.mubr.msk.f32.gmra.mxu0 %vm452_vm2, %v9910_v21  ;;  %1209 = vperm.xlu1 %5741, %v5820_v57   ;;  %vm460_vm2 = vcmp.eq.s32.totalorder %v6554_v0, %v6762_v10  ;;  %v249_v57 = vld [vmem:[%s9900_s1 + $0x340] sm:$0xff] }
  0xfa   : > { %4899 = vmatprep.mubr.msk.f32.mxu0 %vm455_vm3, %v9910_v21  ;;  %4930 = vmatmul.mubr.msk.f32.gmra.mxu1 %vm708_vm5, %v9910_v21  ;;  %v6971_v35 = vpop.permute.xlu1 %651  ;;  %vm463_vm3 = vcmp.eq.s32.totalorder %v6559_v7, %v6760_v61  ;;  %vm716_vm5 = vcmp.eq.s32.totalorder %v6554_v0, %v6903_v16  ;;  %v5836_v16 = vld [vmem:[%s6150_s3 + $0xf8] sm:$0xff] }
  0xfb   : > { %v6973_v41 = vpop.permute.xlu0 %654  ;;  %1961 = vmatpush2.msra.mxu0 %v231_v36  ;;  %4931 = vmatprep.mubr.msk.f32.mxu1 %vm711_vm4, %v9910_v21  ;;  %vm719_vm4 = vcmp.eq.s32.totalorder %v6559_v7, %v6907_v48 }
  0xfc   : > { %1224 = vperm.xlu0 %5740, %v5821_v58   ;;  %1962 = vmatprep.subr.mxu0 %v9912_v2 }
  0xfd   : > { %4900 = vmatmul.mubr.msk.f32.gmra.mxu0 %vm454_vm6, %v9910_v21  ;;  %1215 = vperm.xlu1 %5741, %v5822_v46   ;;  %vm462_vm6 = vcmp.eq.s32.totalorder %v6554_v0, %v6760_v61  ;;  %v5830_v61 = vld [vmem:[%s6150_s3 + $0xb0] sm:$0xff] }
  0xfe   : > { %4901 = vmatprep.mubr.msk.f32.mxu0 %vm457_vm8, %v9910_v21  ;;  %4932 = vmatmul.mubr.msk.f32.gmra.mxu1 %vm710_vm7, %v9910_v21  ;;  %v6991_v51 = vpop.permute.xlu1 %657  ;;  %vm718_vm7 = vcmp.eq.s32.totalorder %v6554_v0, %v6907_v48  ;;  %vm465_vm8 = vcmp.eq.s32.totalorder %v6559_v7, %v6779_v18  ;;  %v5837_v48 = vld [vmem:[%s6150_s3 + $0xf0] sm:$0xff] }
  0xff   : > { %v6995_v59 = vpop.permute.xlu0 %660  ;;  %1963 = vmatpush2.msra.mxu0 %v230_v40  ;;  %4933 = vmatprep.mubr.msk.f32.mxu1 %vm713_vm9, %v9910_v21  ;;  %vm721_vm9 = vcmp.eq.s32.totalorder %v6559_v7, %v6927_v52  ;;  %v247_v40 = vld [vmem:[%s9900_s1 + $0x330] sm:$0xff] }
 0x100   : > { %1230 = vperm.xlu0 %5740, %v5823_v45   ;;  %1964 = vmatprep.subr.mxu0 %v9912_v2 }
 0x101   : > { %4902 = vmatmul.mubr.msk.f32.gmra.mxu0 %vm456_vm10, %v9910_v21  ;;  %1221 = vperm.xlu1 %5741, %v5824_v56   ;;  %vm464_vm10 = vcmp.eq.s32.totalorder %v6554_v0, %v6779_v18  ;;  %v255_v18 = vld [vmem:[%s9900_s1 + $0x370] sm:$0xff] }
 0x102   : > { %4903 = vmatprep.mubr.msk.f32.mxu0 %vm459_vm11, %v9910_v21  ;;  %4934 = vmatmul.mubr.msk.f32.gmra.mxu1 %vm712_vm13, %v9910_v21  ;;  %v7015_v63 = vpop.permute.xlu1 %663  ;;  %vm467_vm11 = vcmp.eq.s32.totalorder %v6559_v7, %v6776_v11  ;;  %vm720_vm13 = vcmp.eq.s32.totalorder %v6554_v0, %v6927_v52  ;;  %v5105_v52 = vld [vmem:[%s6150_s3 + $0x100] sm:$0xff] }
 0x103   : > { %v7017_v55 = vpop.permute.xlu0 %666  ;;  %1965 = vmatpush2.msra.mxu0 %v229_v50  ;;  %4935 = vmatprep.mubr.msk.f32.mxu1 %vm715_vm12, %v9910_v21  ;;  %vm723_vm12 = vcmp.eq.s32.totalorder %v6559_v7, %v6929_v19 }
 0x104   : > { %1236 = vperm.xlu0 %5740, %v5825_v60   ;;  %1966 = vmatprep.subr.mxu0 %v9912_v2  ;;  %v5108_v60 = vld [vmem:[%s6150_s3 + $0x118] sm:$0xff] }
 0x105   : > { %4904 = vmatmul.mubr.msk.f32.gmra.mxu0 %vm458_vm14, %v9910_v21  ;;  %1227 = vperm.xlu1 %5741, %v5826_v62   ;;  %vm466_vm14 = vcmp.eq.s32.totalorder %v6554_v0, %v6776_v11  ;;  %v5834_v11 = vld [vmem:[%s6150_s3 + $0xe8] sm:$0xff] }
 0x106   : > { %4905 = vmatprep.mubr.msk.f32.mxu0 %vm461_vm0, %v9910_v21  ;;  %4936 = vmatmul.mubr.msk.f32.gmra.mxu1 %vm714_vm15, %v9910_v21  ;;  %v7035_v17 = vpop.permute.xlu1 %669  ;;  %vm722_vm15 = vcmp.eq.s32.totalorder %v6554_v0, %v6929_v19  ;;  %vm725_vm0 = vcmp.eq.s32.totalorder %v6559_v7, %v6947_v31 }
 0x107   : > { %v7039_v22 = vpop.permute.xlu0 %672  ;;  %1967 = vmatpush2.msra.mxu0 %v228_v4  ;;  %4937 = vmatprep.mubr.msk.f32.mxu1 %vm717_vm1, %v9910_v21  ;;  %v244_v4 = vld [vmem:[%s9900_s1 + $0x318] sm:$0xff] }
 0x108   : > { %1242 = vperm.xlu0 %5740, %v5827_v3   ;;  %1968 = vmatprep.subr.mxu0 %v9912_v2 }
 0x109   : > { %4906 = vmatmul.mubr.msk.f32.gmra.mxu0 %vm460_vm2, %v9910_v21  ;;  %1233 = vperm.xlu1 %5741, %v5828_v14  }
 0x10a   : > { %4907 = vmatprep.mubr.msk.f32.mxu0 %vm463_vm3, %v9910_v21  ;;  %4938 = vmatmul.mubr.msk.f32.gmra.mxu1 %vm716_vm5, %v9910_v21  ;;  %v7059_v10 = vpop.permute.xlu1 %675  ;;  %vm727_vm3 = vcmp.eq.s32.totalorder %v6559_v7, %v6951_v54 }
 0x10b   : > { %v7061_v6 = vpop.permute.xlu0 %678  ;;  %1969 = vmatpush2.msra.mxu0 %v227_v27  ;;  %4939 = vmatprep.mubr.msk.f32.mxu1 %vm719_vm4, %v9910_v21  ;;  %vm724_vm4 = vcmp.eq.s32.totalorder %v6554_v0, %v6947_v31  ;;  %v5106_v31 = vld [vmem:[%s6150_s3 + $0x108] sm:$0xff] }
 0x10c   : > { %1970 = vmatprep.subr.mxu0 %v9912_v2  ;;  %1248 = vperm.xlu0 %5740, %v5829_v8   ;;  %v242_v27 = vld [vmem:[%s9900_s1 + $0x308] sm:$0xff] }
 0x10d   : > { %4908 = vmatmul.mubr.msk.f32.gmra.mxu0 %vm462_vm6, %v9910_v21  ;;  %1239 = vperm.xlu1 %5741, %v5830_v61   ;;  %vm726_vm6 = vcmp.eq.s32.totalorder %v6554_v0, %v6951_v54  ;;  %v250_v54 = vld [vmem:[%s9900_s1 + $0x348] sm:$0xff] }
 0x10e   : > { %4909 = vmatprep.mubr.msk.f32.mxu0 %vm465_vm8, %v9910_v21  ;;  %4940 = vmatmul.mubr.msk.f32.gmra.mxu1 %vm718_vm7, %v9910_v21  ;;  %v7079_v23 = vpop.permute.xlu1 %681  ;;  %vm729_vm8 = vcmp.eq.s32.totalorder %v6559_v7, %v6971_v35 }
 0x10f   : > { %v7083_v32 = vpop.permute.xlu0 %684  ;;  %1971 = vmatpush2.msra.mxu0 %v226_v29  ;;  %4941 = vmatprep.mubr.msk.f32.mxu1 %vm721_vm9, %v9910_v21  ;;  %v241_v29 = vld [vmem:[%s9900_s1 + $0x300] sm:$0xff] }
 0x110   : > { %1972 = vmatprep.subr.mxu0 %v9912_v2  ;;  %1254 = vperm.xlu0 %5740, %v5831_v34  }
 0x111   : > { %4910 = vmatmul.mubr.msk.f32.gmra.mxu0 %vm464_vm10, %v9910_v21  ;;  %1245 = vperm.xlu1 %5741, %v5832_v37   ;;  %vm728_vm10 = vcmp.eq.s32.totalorder %v6554_v0, %v6971_v35 }
 0x112   : > { %4911 = vmatprep.mubr.msk.f32.mxu0 %vm467_vm11, %v9910_v21  ;;  %4942 = vmatmul.mubr.msk.f32.gmra.mxu1 %vm720_vm13, %v9910_v21  ;;  %v7106_v12 = vpop.permute.xlu1 %687  ;;  %vm731_vm11 = vcmp.eq.s32.totalorder %v6559_v7, %v6973_v41 }
 0x113   : > { %1973 = vmatpush2.msra.mxu0 %v225_v9  ;;  %4943 = vmatprep.mubr.msk.f32.mxu1 %vm723_vm12, %v9910_v21  ;;  %v7113_v38 = vpop.permute.xlu0 %690  ;;  %v272_v9 = vld [vmem:[%s9900_s1 + $0x3f8] sm:$0xff] }
 0x114   : > { %2137 = vmatprep.subr.mxu1 %v9912_v2  ;;  %1260 = vperm.xlu0 %5740, %v5834_v11   ;;  %v268_v11 = vld [vmem:[%s9900_s1 + $0x3d8] sm:$0xff] }
 0x115   : > { %4912 = vmatmul.mubr.msk.f32.gmra.mxu0 %vm466_vm14, %v9910_v21  ;;  %2138 = vmatpush1.msra.mxu1 %v255_v18  ;;  %vm730_vm14 = vcmp.eq.s32.totalorder %v6554_v0, %v6973_v41  ;;  %v248_v41 = vld [vmem:[%s9900_s1 + $0x338] sm:$0xff]  ;;  %v270_v18 = vld [vmem:[%s9900_s1 + $0x3e8] sm:$0xff] }
 0x116   : > { %1251 = vperm.xlu1 %5741, %v5833_v5   ;;  %2139 = vmatprep.subr.mxu1 %v9912_v2  ;;  %v269_v5 = vld [vmem:[%s9900_s1 + $0x3e0] sm:$0xff] }
 0x117   : > { %4944 = vmatmul.mubr.msk.f32.gmra.mxu1 %vm722_vm15, %v9910_v21  ;;  %v886_v42 = vpop.permute.xlu1 %885  ;;  %3577 = vmatprep.subr.mxu0 %v9912_v2 }
 0x118   : > { %4945 = vmatprep.mubr.msk.f32.mxu1 %vm725_vm0, %v9910_v21  ;;  %2140 = vmatpush1.msra.mxu1 %v254_v39  ;;  %vm980_vm1 = vcmp.eq.s32.totalorder %v6554_v0, %v886_v42  ;;  %vm981_vm2 = vcmp.eq.s32.totalorder %v6559_v7, %v886_v42  ;;  %vm733_vm0 = vcmp.eq.s32.totalorder %v6559_v7, %v6991_v51 }
 0x119   : > { %2141 = vmatprep.subr.mxu1 %v9912_v2  ;;  %4977 = vmatprep.mubr.msk.f32.mxu0 %vm981_vm2, %v9910_v21  ;;  %v889_v13 = vpop.permute.xlu0 %888 }
 0x11a   : > { %1257 = vperm.xlu1 %5741, %v5835_v43   ;;  %4978 = vmatmul.mubr.msk.f32.vlgmr.msra.gmra.mxu0 %vm980_vm1, %v9910_v21  ;;  %vm983_vm5 = vcmp.eq.s32.totalorder %v6559_v7, %v889_v13  ;;  %vm982_vm7 = vcmp.eq.s32.totalorder %v6554_v0, %v889_v13  ;;  %v267_v13 = vld [vmem:[%s9900_s1 + $0x3d0] sm:$0xff] }
 0x11b   : > { %4946 = vmatmul.mubr.msk.f32.gmra.mxu1 %vm724_vm4, %v9910_v21  ;;  %v892_v47 = vpop.permute.xlu1 %891  ;;  %4979 = vmatprep.mubr.msk.f32.mxu0 %vm983_vm5, %v9910_v21  ;;  %vm735_vm4 = vcmp.eq.s32.totalorder %v6559_v7, %v6995_v59 }
 0x11c   : > { %4947 = vmatprep.mubr.msk.f32.mxu1 %vm727_vm3, %v9910_v21  ;;  %2142 = vmatpush1.msra.mxu1 %v253_v44  ;;  %vm985_vm9 = vcmp.eq.s32.totalorder %v6559_v7, %v892_v47  ;;  %vm984_vm12 = vcmp.eq.s32.totalorder %v6554_v0, %v892_v47  ;;  %vm732_vm3 = vcmp.eq.s32.totalorder %v6554_v0, %v6991_v51  ;;  %v246_v51 = vld [vmem:[%s9900_s1 + $0x328] sm:$0xff] }
 0x11d   : > { %1266 = vperm.xlu0 %5740, %v5836_v16   ;;  %v898_v49 = vpop.permute.xlu0 %897  ;;  %2143 = vmatprep.subr.mxu1 %v9912_v2  ;;  %v266_v47 = vld [vmem:[%s9900_s1 + $0x3c8] sm:$0xff] }
 0x11e   : > { %1263 = vperm.xlu1 %5741, %v5837_v48   ;;  %4980 = vmatmul.mubr.msk.f32.gmra.mxu0 %vm982_vm7, %v9910_v21  ;;  %vm989_vm15 = vcmp.eq.s32.totalorder %v6559_v7, %v898_v49  ;;  %vm988_vm2 = vcmp.eq.s32.totalorder %v6554_v0, %v898_v49  ;;  %vm737_vm7 = vcmp.eq.s32.totalorder %v6559_v7, %v7015_v63  ;;  %v5112_v48 = vld [vmem:[%s6150_s3 + $0x138] sm:$0xff] }
 0x11f   : > { %4948 = vmatmul.mubr.msk.f32.gmra.mxu1 %vm726_vm6, %v9910_v21  ;;  %v895_v20 = vpop.permute.xlu1 %894  ;;  %4981 = vmatprep.mubr.msk.f32.mxu0 %vm985_vm9, %v9910_v21  ;;  %vm734_vm6 = vcmp.eq.s32.totalorder %v6554_v0, %v6995_v59  ;;  %v245_v59 = vld [vmem:[%s9900_s1 + $0x320] sm:$0xff] }
 0x120   : > { %4949 = vmatprep.mubr.msk.f32.mxu1 %vm729_vm8, %v9910_v21  ;;  %2144 = vmatpush1.msra.mxu1 %v252_v15  ;;  %vm987_vm13 = vcmp.eq.s32.totalorder %v6559_v7, %v895_v20  ;;  %vm986_vm1 = vcmp.eq.s32.totalorder %v6554_v0, %v895_v20  ;;  %v264_v15 = vld [vmem:[%s9900_s1 + $0x3b8] sm:$0xff] }
 0x121   : > { %5744 = vset.pattern.permute.xlu0 %v9906_v1  ;;  %v7166_v19 = vpop.permute.xlu0 %903  ;;  %2145 = vmatprep.subr.mxu1 %v9912_v2 }
 0x122   : > { %5742 = vset.pattern.permute.xlu1 %v9906_v1  ;;  %4982 = vmatmul.mubr.msk.f32.gmra.mxu0 %vm984_vm12, %v9910_v21  ;;  %vm993_vm9 = vcmp.eq.s32.totalorder %v6559_v7, %v7166_v19  ;;  %vm739_vm12 = vcmp.eq.s32.totalorder %v6559_v7, %v7017_v55 }
 0x123   : > { %4950 = vmatmul.mubr.msk.f32.gmra.mxu1 %vm728_vm10, %v9910_v21  ;;  %2426 = vperm.xlu1 %5742, %v5105_v52   ;;  %v901_v25 = vpop.permute.xlu1 %900  ;;  %vm992_vm10 = vcmp.eq.s32.totalorder %v6554_v0, %v7166_v19  ;;  %v262_v19 = vld [vmem:[%s9900_s1 + $0x3a8] sm:$0xff] }
 0x124   : > { %4951 = vmatprep.mubr.msk.f32.mxu1 %vm731_vm11, %v9910_v21  ;;  %4983 = vmatprep.mubr.msk.f32.mxu0 %vm987_vm13, %v9910_v21  ;;  %vm991_vm5 = vcmp.eq.s32.totalorder %v6559_v7, %v901_v25  ;;  %vm990_vm8 = vcmp.eq.s32.totalorder %v6554_v0, %v901_v25  ;;  %vm736_vm11 = vcmp.eq.s32.totalorder %v6554_v0, %v7015_v63  ;;  %v243_v63 = vld [vmem:[%s9900_s1 + $0x310] sm:$0xff] }
 0x125   : > { %2146 = vmatpush1.msra.mxu1 %v251_v26  ;;  %v7188_v30 = vpop.permute.xlu0 %909  ;;  %2432 = vperm.xlu0 %5744, %v5107_v53   ;;  %v261_v26 = vld [vmem:[%s9900_s1 + $0x3a0] sm:$0xff] }
 0x126   : > { %2147 = vmatprep.subr.mxu1 %v9912_v2  ;;  %4984 = vmatmul.mubr.msk.f32.gmra.mxu0 %vm986_vm1, %v9910_v21 }
 0x127   : > { %4952 = vmatmul.mubr.msk.f32.gmra.mxu1 %vm730_vm14, %v9910_v21  ;;  %2429 = vperm.xlu1 %5742, %v5106_v31   ;;  %v7197_v36 = vpop.permute.xlu1 %906  ;;  %vm738_vm14 = vcmp.eq.s32.totalorder %v6554_v0, %v7017_v55  ;;  %v5109_v55 = vld [vmem:[%s6150_s3 + $0x120] sm:$0xff] }
 0x128   : > { %4953 = vmatprep.mubr.msk.f32.mxu1 %vm733_vm0, %v9910_v21  ;;  %2148 = vmatpush1.msra.mxu1 %v250_v54  ;;  %vm995_vm13 = vcmp.eq.s32.totalorder %v6559_v7, %v7197_v36  ;;  %vm741_vm0 = vcmp.eq.s32.totalorder %v6559_v7, %v7035_v17  ;;  %vm994_vm1 = vcmp.eq.s32.totalorder %v6554_v0, %v7197_v36 }
 0x129   : > { %4985 = vmatprep.mubr.msk.f32.mxu0 %vm989_vm15, %v9910_v21  ;;  %2149 = vmatprep.subr.mxu1 %v9912_v2  ;;  %v7205_v35 = vpop.permute.xlu0 %915  ;;  %vm997_vm15 = vcmp.eq.s32.totalorder %v6559_v7, %v7188_v30 }
 0x12a   : > { %5745 = vset.pattern.permute.xlu0 %v9908_v33  ;;  %2150 = vmatpush1.msra.mxu1 %v249_v57 }
 0x12b   : > { %5743 = vset.pattern.permute.xlu1 %v9908_v33  ;;  %4954 = vmatmul.mubr.msk.f32.gmra.mxu1 %vm732_vm3, %v9910_v21  ;;  %v7218_v58 = vpop.permute.xlu1 %912  ;;  %vm740_vm3 = vcmp.eq.s32.totalorder %v6554_v0, %v7035_v17  ;;  %v271_v17 = vld [vmem:[%s9900_s1 + $0x3f0] sm:$0xff] }
 0x12c   : > { %2151 = vmatprep.subr.mxu1 %v9912_v2  ;;  %4955 = vmatprep.mubr.msk.f32.mxu1 %vm735_vm4, %v9910_v21  ;;  %vm743_vm4 = vcmp.eq.s32.totalorder %v6559_v7, %v7039_v22 }
 0x12d   : > { %4986 = vmatmul.mubr.msk.f32.gmra.mxu0 %vm988_vm2, %v9910_v21  ;;  %2152 = vmatpush1.msra.mxu1 %v248_v41  ;;  %v7226_v46 = vpop.permute.xlu0 %921  ;;  %vm996_vm2 = vcmp.eq.s32.totalorder %v6554_v0, %v7188_v30  ;;  %v260_v30 = vld [vmem:[%s9900_s1 + $0x398] sm:$0xff]  ;;  %v258_v41 = vld [vmem:[%s9900_s1 + $0x388] sm:$0xff] }
 0x12e   : > { %2717 = vperm.xlu1 %5743, %v5106_v31   ;;  %4987 = vmatprep.mubr.msk.f32.mxu0 %vm991_vm5, %v9910_v21  ;;  %vm999_vm5 = vcmp.eq.s32.totalorder %v6559_v7, %v7218_v58 }
 0x12f   : > { %2153 = vmatprep.subr.mxu1 %v9912_v2  ;;  %v7235_v45 = vpop.permute.xlu1 %918  ;;  %2714 = vperm.xlu0 %5745, %v5105_v52  }
 0x130   : > { %2154 = vmatpush1.msra.mxu1 %v247_v40 }
 0x131   : > { %4956 = vmatmul.mubr.msk.f32.gmra.mxu1 %vm734_vm6, %v9910_v21  ;;  %2155 = vmatprep.subr.mxu1 %v9912_v2  ;;  %v7249_v50 = vpop.permute.xlu0 %927  ;;  %vm742_vm6 = vcmp.eq.s32.totalorder %v6554_v0, %v7039_v22  ;;  %v5110_v22 = vld [vmem:[%s6150_s3 + $0x128] sm:$0xff] }
 0x132   : > { %4957 = vmatprep.mubr.msk.f32.mxu1 %vm737_vm7, %v9910_v21  ;;  %4988 = vmatmul.mubr.msk.f32.gmra.mxu0 %vm990_vm8, %v9910_v21  ;;  %vm1001_vm7 = vcmp.eq.s32.totalorder %v6559_v7, %v7205_v35  ;;  %vm745_vm8 = vcmp.eq.s32.totalorder %v6559_v7, %v7059_v10 }
 0x133   : > { %2156 = vmatpush1.msra.mxu1 %v246_v51  ;;  %2720 = vperm.xlu1 %5743, %v5107_v53   ;;  %v7255_v56 = vpop.permute.xlu1 %924  ;;  %v5113_v53 = vld [vmem:[%s6150_s3 + $0x140] sm:$0xff]  ;;  %v5114_v51 = vld [vmem:[%s6150_s3 + $0x148] sm:$0xff] }
 0x134   : > { %2157 = vmatprep.subr.mxu1 %v9912_v2  ;;  %4989 = vmatprep.mubr.msk.f32.mxu0 %vm993_vm9, %v9910_v21  ;;  %vm998_vm9 = vcmp.eq.s32.totalorder %v6554_v0, %v7218_v58 }
 0x135   : > { %2158 = vmatpush1.msra.mxu1 %v245_v59  ;;  %2723 = vperm.xlu0 %5745, %v5108_v60   ;;  %v7267_v62 = vpop.permute.xlu0 %933 }
 0x136   : > { %4958 = vmatmul.mubr.msk.f32.gmra.mxu1 %vm736_vm11, %v9910_v21  ;;  %2159 = vmatprep.subr.mxu1 %v9912_v2  ;;  %vm1000_vm11 = vcmp.eq.s32.totalorder %v6554_v0, %v7205_v35 }
 0x137   : > { %4959 = vmatprep.mubr.msk.f32.mxu1 %vm739_vm12, %v9910_v21  ;;  %4990 = vmatmul.mubr.msk.f32.gmra.mxu0 %vm992_vm10, %v9910_v21  ;;  %v7277_v3 = vpop.permute.xlu1 %930  ;;  %vm744_vm10 = vcmp.eq.s32.totalorder %v6554_v0, %v7059_v10  ;;  %vm747_vm12 = vcmp.eq.s32.totalorder %v6559_v7, %v7061_v6  ;;  %v7381_v10 = vld [vmem:[%s6150_s3 + $0x130] sm:$0xff] }
 0x138   : > { %2160 = vmatpush1.msra.mxu1 %v244_v4  ;;  %5746 = vset.pattern.permute.xlu1 %v9906_v1 }
 0x139   : > { %4991 = vmatprep.mubr.msk.f32.mxu0 %vm995_vm13, %v9910_v21  ;;  %2161 = vmatprep.subr.mxu1 %v9912_v2  ;;  %v7288_v14 = vpop.permute.xlu0 %939  ;;  %vm1003_vm13 = vcmp.eq.s32.totalorder %v6559_v7, %v7235_v45 }
 0x13a   : > { %2435 = vperm.xlu1 %5746, %v5108_v60   ;;  %2162 = vmatpush1.msra.mxu1 %v243_v63 }
 0x13b   : > { %4960 = vmatmul.mubr.msk.f32.gmra.mxu1 %vm738_vm14, %v9910_v21  ;;  %2163 = vmatprep.subr.mxu1 %v9912_v2  ;;  %v7302_v8 = vpop.permute.xlu1 %936  ;;  %vm746_vm14 = vcmp.eq.s32.totalorder %v6554_v0, %v7061_v6  ;;  %v265_v6 = vld [vmem:[%s9900_s1 + $0x3c0] sm:$0xff] }
 0x13c   : > { %4961 = vmatprep.mubr.msk.f32.mxu1 %vm741_vm0, %v9910_v21  ;;  %4992 = vmatmul.mubr.msk.f32.gmra.mxu0 %vm994_vm1, %v9910_v21  ;;  %vm749_vm0 = vcmp.eq.s32.totalorder %v6559_v7, %v7079_v23  ;;  %vm1002_vm1 = vcmp.eq.s32.totalorder %v6554_v0, %v7235_v45  ;;  %v257_v45 = vld [vmem:[%s9900_s1 + $0x380] sm:$0xff] }
 0x13d   : > { %2164 = vmatpush1.msra.mxu1 %v242_v27  ;;  %4993 = vmatprep.mubr.msk.f32.mxu0 %vm997_vm15, %v9910_v21  ;;  %v7308_v61 = vpop.permute.xlu0 %945  ;;  %vm1005_vm15 = vcmp.eq.s32.totalorder %v6559_v7, %v7226_v46 }
 0x13e   : > { %2165 = vmatprep.subr.mxu1 %v9912_v2  ;;  %2438 = vperm.xlu1 %5746, %v5109_v55  }
 0x13f   : > { %2166 = vmatpush1.msra.mxu1 %v241_v29  ;;  %5748 = vset.pattern.permute.xlu0 %v9906_v1  ;;  %v7320_v34 = vpop.permute.xlu1 %942 }
 0x140   : > { %4962 = vmatmul.mubr.msk.f32.gmra.mxu1 %vm740_vm3, %v9910_v21  ;;  %2167 = vmatprep.subr.mxu1 %v9912_v2  ;;  %vm1004_vm3 = vcmp.eq.s32.totalorder %v6554_v0, %v7226_v46 }
 0x141   : > { %4963 = vmatprep.mubr.msk.f32.mxu1 %vm743_vm4, %v9910_v21  ;;  %4994 = vmatmul.mubr.msk.f32.gmra.mxu0 %vm996_vm2, %v9910_v21  ;;  %vm748_vm2 = vcmp.eq.s32.totalorder %v6554_v0, %v7079_v23  ;;  %vm751_vm4 = vcmp.eq.s32.totalorder %v6559_v7, %v7083_v32  ;;  %v263_v23 = vld [vmem:[%s9900_s1 + $0x3b0] sm:$0xff] }
 0x142   : > { %2168 = vmatpush2.msra.mxu1 %v272_v9  ;;  %4995 = vmatprep.mubr.msk.f32.mxu0 %vm999_vm5, %v9910_v21  ;;  %v7330_v37 = vpop.permute.xlu0 %951  ;;  %vm1007_vm5 = vcmp.eq.s32.totalorder %v6559_v7, %v7255_v56 }
 0x143   : > { %2169 = vmatprep.subr.mxu1 %v9912_v2  ;;  %5747 = vset.pattern.permute.xlu1 %v9908_v33  ;;  %v7341_v39 = vpop.permute.xlu1 %948 }
 0x144   : > { %2170 = vmatpush2.msra.mxu1 %v271_v17  ;;  %2726 = vperm.xlu1 %5747, %v5109_v55   ;;  %v5839_v17 = vld [vmem:[%s9900_s1 + $0x70] sm:$0xff] }
 0x145   : > { %2171 = vmatprep.subr.mxu1 %v9912_v2  ;;  %4964 = vmatmul.mubr.msk.f32.gmra.mxu1 %vm742_vm6, %v9910_v21  ;;  %vm750_vm6 = vcmp.eq.s32.totalorder %v6554_v0, %v7083_v32 }
 0x146   : > { %4965 = vmatprep.mubr.msk.f32.mxu1 %vm745_vm8, %v9910_v21  ;;  %4996 = vmatmul.mubr.msk.f32.gmra.mxu0 %vm998_vm9, %v9910_v21  ;;  %v7360_v42 = vpop.permute.xlu0 %957  ;;  %vm1006_vm8 = vcmp.eq.s32.totalorder %v6554_v0, %v7255_v56  ;;  %vm1009_vm9 = vcmp.eq.s32.totalorder %v6559_v7, %v7249_v50  ;;  %v5115_v56 = vld [vmem:[%s6150_s3 + $0x150] sm:$0xff] }
 0x147   : > { %2172 = vmatpush2.msra.mxu1 %v270_v18  ;;  %4997 = vmatprep.mubr.msk.f32.mxu0 %vm1001_vm7, %v9910_v21  ;;  %v7362_v43 = vpop.permute.xlu1 %954  ;;  %vm753_vm7 = vcmp.eq.s32.totalorder %v6559_v7, %v7106_v12 }
 0x148   : > { %2173 = vmatprep.subr.mxu1 %v9912_v2  ;;  %2729 = vperm.xlu1 %5747, %v5110_v22  }
 0x149   : > { %2174 = vmatpush2.msra.mxu1 %v269_v5  ;;  %2441 = vperm.xlu0 %5748, %v5110_v22   ;;  %v5840_v5 = vld [vmem:[%s9900_s1 + $0x68] sm:$0xff] }
 0x14a   : > { %2175 = vmatprep.subr.mxu1 %v9912_v2  ;;  %4966 = vmatmul.mubr.msk.f32.gmra.mxu1 %vm744_vm10, %v9910_v21  ;;  %v7395_v16 = vpop.permute.xlu0 %963  ;;  %vm1008_vm10 = vcmp.eq.s32.totalorder %v6554_v0, %v7249_v50 }
 0x14b   : > { %2176 = vmatpush2.msra.mxu1 %v268_v11  ;;  %4967 = vmatprep.mubr.msk.f32.mxu1 %vm747_vm12, %v9910_v21  ;;  %v7383_v44 = vpop.permute.xlu1 %960  ;;  %vm755_vm12 = vcmp.eq.s32.totalorder %v6559_v7, %v7113_v38 }
 0x14c   : > { %4998 = vmatmul.mubr.msk.f32.gmra.mxu0 %vm1000_vm11, %v9910_v21  ;;  %2177 = vmatprep.subr.mxu1 %v9912_v2  ;;  %vm752_vm11 = vcmp.eq.s32.totalorder %v6554_v0, %v7106_v12  ;;  %v259_v12 = vld [vmem:[%s9900_s1 + $0x390] sm:$0xff] }
 0x14d   : > { %4999 = vmatprep.mubr.msk.f32.mxu0 %vm1003_vm13, %v9910_v21  ;;  %2178 = vmatpush2.msra.mxu1 %v267_v13  ;;  %vm1011_vm13 = vcmp.eq.s32.totalorder %v6559_v7, %v7277_v3 }
 0x14e   : > { %5749 = vset.pattern.permute.xlu1 %v9906_v1  ;;  %4968 = vmatmul.mubr.msk.f32.gmra.mxu1 %vm746_vm14, %v9910_v21  ;;  %v7428_v20 = vpop.permute.xlu0 %969  ;;  %vm754_vm14 = vcmp.eq.s32.totalorder %v6554_v0, %v7113_v38 }
 0x14f   : > { %2179 = vmatprep.subr.mxu1 %v9912_v2  ;;  %2444 = vperm.xlu1 %5749, %v7381_v10   ;;  %v7409_v49 = vpop.permute.xlu1 %966 }
 0x150   : > { %4969 = vmatprep.mubr.msk.f32.mxu1 %vm749_vm0, %v9910_v21  ;;  %5000 = vmatmul.mubr.msk.f32.gmra.mxu0 %vm1002_vm1, %v9910_v21  ;;  %vm1013_vm1 = vcmp.eq.s32.totalorder %v6559_v7, %v7267_v62 }
 0x151   : > { %2180 = vmatpush2.msra.mxu1 %v266_v47  ;;  %5001 = vmatprep.mubr.msk.f32.mxu0 %vm1005_vm15, %v9910_v21  ;;  %vm1010_vm15 = vcmp.eq.s32.totalorder %v6554_v0, %v7277_v3  ;;  %v5838_v3 = vld [vmem:[%s9900_s1 + $0x78] sm:$0xff] }
 0x152   : > { %2181 = vmatprep.subr.mxu1 %v9912_v2  ;;  %4970 = vmatmul.mubr.msk.f32.gmra.mxu1 %vm748_vm2, %v9910_v21  ;;  %v7461_v31 = vpop.permute.xlu0 %975 }
 0x153   : > { %2182 = vmatpush2.msra.mxu1 %v265_v6  ;;  %2447 = vperm.xlu1 %5749, %v5112_v48   ;;  %v7430_v52 = vpop.permute.xlu1 %972  ;;  %v5841_v6 = vld [vmem:[%s9900_s1 + $0x60] sm:$0xff] }
 0x154   : > { %2183 = vmatprep.subr.mxu1 %v9912_v2  ;;  %4971 = vmatprep.mubr.msk.f32.mxu1 %vm751_vm4, %v9910_v21 }
 0x155   : > { %5002 = vmatmul.mubr.msk.f32.gmra.mxu0 %vm1004_vm3, %v9910_v21  ;;  %2184 = vmatpush2.msra.mxu1 %v264_v15  ;;  %vm1012_vm3 = vcmp.eq.s32.totalorder %v6554_v0, %v7267_v62  ;;  %v5842_v15 = vld [vmem:[%s9900_s1 + $0x58] sm:$0xff] }
 0x156   : > { %5003 = vmatprep.mubr.msk.f32.mxu0 %vm1007_vm5, %v9910_v21  ;;  %2185 = vmatprep.subr.mxu1 %v9912_v2  ;;  %vm1015_vm5 = vcmp.eq.s32.totalorder %v6559_v7, %v7302_v8 }
 0x157   : > { %2186 = vmatpush2.msra.mxu1 %v263_v23  ;;  %5750 = vset.pattern.permute.xlu1 %v9908_v33  ;;  %v7451_v32 = vpop.permute.xlu1 %978  ;;  %v1174_v58 = vpop.permute.xlu0 %1173 }
 0x158   : > { %4972 = vmatmul.mubr.msk.f32.gmra.mxu1 %vm750_vm6, %v9910_v21  ;;  %2187 = vmatprep.subr.mxu1 %v9912_v2  ;;  %vm1269_vm0 = vcmp.eq.s32.totalorder %v6559_v7, %v1174_v58  ;;  %vm1268_vm2 = vcmp.eq.s32.totalorder %v6554_v0, %v1174_v58  ;;  %v5845_v58 = vld [vmem:[%s9900_s1 + $0x40] sm:$0xff] }
 0x159   : > { %4973 = vmatprep.mubr.msk.f32.mxu1 %vm753_vm7, %v9910_v21  ;;  %5004 = vmatmul.mubr.msk.f32.gmra.mxu0 %vm1006_vm8, %v9910_v21  ;;  %v7459_v25 = vpop.f32.mrf.mxu0  ;;  %vm1017_vm7 = vcmp.eq.s32.totalorder %v6559_v7, %v7288_v14  ;;  %vm1014_vm8 = vcmp.eq.s32.totalorder %v6554_v0, %v7302_v8 }
 0x15a   : > { %2188 = vmatpush2.msra.mxu1 %v262_v19  ;;  %2735 = vperm.xlu1 %5750, %v5112_v48   ;;  %v5118_v19 = vld [vmem:[%s6150_s3 + $0x168] sm:$0xff] }
 0x15b   : > { %2189 = vmatprep.subr.mxu1 %v9912_v2  ;;  %5005 = vmatprep.mubr.msk.f32.mxu0 %vm1009_vm9, %v9910_v21  ;;  %v1528_v54 = vpop.f32.mrf.mxu0  ;;  %v1183_v4 = vpop.permute.xlu0 %1182 }
 0x15c   : > { %2190 = vmatpush2.msra.mxu1 %v261_v26  ;;  %2450 = vperm.xlu0 %5748, %v5113_v53   ;;  %v1177_v36 = vpop.permute.xlu1 %1176  ;;  %v5843_v54 = vld [vmem:[%s9900_s1 + $0x50] sm:$0xff] }
 0x15d   : > { %4974 = vmatmul.mubr.msk.f32.gmra.mxu1 %vm752_vm11, %v9910_v21  ;;  %2191 = vmatprep.subr.mxu1 %v9912_v2  ;;  %v7476_v57 = vpop.f32.mrf.mxu0  ;;  %vm1271_vm4 = vcmp.eq.s32.totalorder %v6559_v7, %v1177_v36  ;;  %vm1270_vm6 = vcmp.eq.s32.totalorder %v6554_v0, %v1177_v36  ;;  %v5844_v36 = vld [vmem:[%s9900_s1 + $0x48] sm:$0xff] }
 0x15e   : > { %4975 = vmatprep.mubr.msk.f32.mxu1 %vm755_vm12, %v9910_v21  ;;  %5006 = vmatmul.mubr.msk.f32.gmra.mxu0 %vm1008_vm10, %v9910_v21  ;;  %vm1016_vm10 = vcmp.eq.s32.totalorder %v6554_v0, %v7288_v14  ;;  %vm1019_vm12 = vcmp.eq.s32.totalorder %v6559_v7, %v7320_v34  ;;  %v5116_v14 = vld [vmem:[%s6150_s3 + $0x158] sm:$0xff] }
 0x15f   : > { %2192 = vmatpush2.msra.mxu1 %v260_v30  ;;  %2738 = vperm.xlu1 %5750, %v5113_v53   ;;  %v1533_v35 = vpop.f32.mrf.mxu0  ;;  %v7547_v55 = vpop.permute.xlu0 %1188 }
 0x160   : > { %5007 = vmatprep.mubr.msk.f32.mxu0 %vm1011_vm13, %v9910_v21  ;;  %2193 = vmatprep.subr.mxu1 %v9912_v2  ;;  %v1180_v40 = vpop.permute.xlu1 %1179  ;;  %vm1275_vm13 = vcmp.eq.s32.totalorder %v6559_v7, %v1183_v4 }
 0x161   : > { %2194 = vmatpush2.msra.mxu1 %v259_v12  ;;  %5751 = vset.pattern.permute.xlu0 %v9908_v33  ;;  %v7493_v46 = vpop.f32.mrf.mxu0  ;;  %vm1273_vm9 = vcmp.eq.s32.totalorder %v6559_v7, %v1180_v40  ;;  %vm1272_vm11 = vcmp.eq.s32.totalorder %v6554_v0, %v1180_v40 }
 0x162   : > { %4976 = vmatmul.mubr.msk.f32.gmra.mxu1 %vm754_vm14, %v9910_v21  ;;  %2195 = vmatprep.subr.mxu1 %v9912_v2  ;;  %vm1274_vm14 = vcmp.eq.s32.totalorder %v6554_v0, %v1183_v4  ;;  %v5848_v4 = vld [vmem:[%s9900_s1 + $0x28] sm:$0xff] }
 0x163   : > { %5008 = vmatmul.mubr.msk.f32.gmra.mxu0 %vm1010_vm15, %v9910_v21  ;;  %2196 = vmatpush2.msra.mxu1 %v258_v41  ;;  %v1538_v38 = vpop.f32.mrf.mxu0  ;;  %v7576_v11 = vpop.permute.xlu0 %1194  ;;  %vm1018_vm15 = vcmp.eq.s32.totalorder %v6554_v0, %v7320_v34 }
 0x164   : > { %5752 = vset.pattern.permute.xlu1 %v9906_v1  ;;  %2197 = vmatprep.subr.mxu1 %v9912_v2  ;;  %v7512_v59 = vpop.permute.xlu1 %1185 }
 0x165   : > { %2453 = vperm.xlu1 %5752, %v5114_v51   ;;  %2198 = vmatpush2.msra.mxu1 %v257_v45  ;;  %v7514_v50 = vpop.f32.mrf.mxu0  ;;  %v5846_v45 = vld [vmem:[%s9900_s1 + $0x38] sm:$0xff] }
 0x166   : > { %5041 = vmatprep.mubr.msk.f32.mxu1 %vm1269_vm0, %v9910_v21  ;;  %5009 = vmatprep.mubr.msk.f32.mxu0 %vm1013_vm1, %v9910_v21  ;;  %vm1021_vm0 = vcmp.eq.s32.totalorder %v6559_v7, %v7308_v61  ;;  %vm1277_vm1 = vcmp.eq.s32.totalorder %v6559_v7, %v7512_v59 }
 0x167   : > { %5042 = vmatmul.mubr.msk.f32.vlgmr.msra.gmra.mxu1 %vm1268_vm2, %v9910_v21  ;;  %5010 = vmatmul.mubr.msk.f32.gmra.mxu0 %vm1012_vm3, %v9910_v21  ;;  %v1543_v60 = vpop.f32.mrf.mxu0  ;;  %vm1020_vm2 = vcmp.eq.s32.totalorder %v6554_v0, %v7308_v61  ;;  %vm1279_vm3 = vcmp.eq.s32.totalorder %v6559_v7, %v7547_v55  ;;  %v7610_v23 = vpop.permute.xlu0 %1200  ;;  %v5119_v61 = vld [vmem:[%s6150_s3 + $0x170] sm:$0xff] }
 0x168   : > { %5011 = vmatprep.mubr.msk.f32.mxu0 %vm1015_vm5, %v9910_v21  ;;  %2732 = vperm.xlu0 %5751, %v7381_v10   ;;  %v7530_v62 = vpop.permute.xlu1 %1191  ;;  %v7590_v10 = vld [vmem:[%s6150_s3 + $0x160] sm:$0xff]  ;;  %vm1276_vm5 = vcmp.eq.s32.totalorder %v6554_v0, %v7512_v59  ;;  %v5847_v59 = vld [vmem:[%s9900_s1 + $0x30] sm:$0xff] }
 0x169   : > { %2456 = vperm.xlu1 %5752, %v5115_v56   ;;  %5043 = vmatprep.mubr.msk.f32.mxu1 %vm1271_vm4, %v9910_v21  ;;  %v7532_v63 = vpop.f32.mrf.mxu0  ;;  %vm1023_vm4 = vcmp.eq.s32.totalorder %v6559_v7, %v7341_v39 }
 0x16a   : > { %3578 = vmatpush1.msra.mxu0 %v5838_v3  ;;  %3802 = vmatprep.subr.mxu1 %v9912_v2  ;;  %v7705_v3 = vld [vmem:[%s6150_s3 + $0x178] sm:$0xff] }
 0x16b   : > { %5012 = vmatmul.mubr.msk.f32.gmra.mxu0 %vm1014_vm8, %v9910_v21  ;;  %5044 = vmatmul.mubr.msk.f32.gmra.mxu1 %vm1270_vm6, %v9910_v21  ;;  %v1548_v27 = vpop.f32.mrf.mxu0  ;;  %vm1278_vm6 = vcmp.eq.s32.totalorder %v6554_v0, %v7547_v55  ;;  %vm1025_vm8 = vcmp.eq.s32.totalorder %v6559_v7, %v7330_v37  ;;  %v7646_v41 = vpop.permute.xlu0 %1206  ;;  %v5849_v55 = vld [vmem:[%s9900_s1 + $0x20] sm:$0xff] }
 0x16c   : > { %2741 = vperm.xlu0 %5751, %v5114_v51   ;;  %5013 = vmatprep.mubr.msk.f32.mxu0 %vm1017_vm7, %v9910_v21  ;;  %v7551_v29 = vpop.permute.xlu1 %1197  ;;  %vm1022_vm7 = vcmp.eq.s32.totalorder %v6554_v0, %v7341_v39 }
 0x16d   : > { %5753 = vset.pattern.permute.xlu1 %v9908_v33  ;;  %5045 = vmatprep.mubr.msk.f32.mxu1 %vm1273_vm9, %v9910_v21  ;;  %v7553_v8 = vpop.f32.mrf.mxu0  ;;  %vm1281_vm9 = vcmp.eq.s32.totalorder %v6559_v7, %v7530_v62 }
 0x16e   : > { %2744 = vperm.xlu1 %5753, %v5115_v56   ;;  %3579 = vmatprep.subr.mxu0 %v9912_v2 }
 0x16f   : > { %5014 = vmatmul.mubr.msk.f32.gmra.mxu0 %vm1016_vm10, %v9910_v21  ;;  %5046 = vmatmul.mubr.msk.f32.gmra.mxu1 %vm1272_vm11, %v9910_v21  ;;  %v1553_v9 = vpop.f32.mrf.mxu0  ;;  %vm1024_vm10 = vcmp.eq.s32.totalorder %v6554_v0, %v7330_v37  ;;  %vm1283_vm11 = vcmp.eq.s32.totalorder %v6559_v7, %v7576_v11  ;;  %v7677_v37 = vpop.permute.xlu0 %1212 }
 0x170   : > { %5015 = vmatprep.mubr.msk.f32.mxu0 %vm1019_vm12, %v9910_v21  ;;  %3580 = vmatpush1.msra.mxu0 %v5839_v17  ;;  %v7568_v18 = vpop.permute.xlu1 %1203  ;;  %vm1027_vm12 = vcmp.eq.s32.totalorder %v6559_v7, %v7362_v43  ;;  %v5850_v17 = vld [vmem:[%s9900_s1 + $0x18] sm:$0xff] }
 0x171   : > { %3581 = vmatprep.subr.mxu0 %v9912_v2  ;;  %5754 = vset.pattern.permute.xlu0 %v9906_v1  ;;  %v7570_v22 = vpop.f32.mrf.mxu0 }
 0x172   : > { %2747 = vperm.xlu1 %5753, %v5116_v14   ;;  %3582 = vmatpush1.msra.mxu0 %v5840_v5 }
 0x173   : > { %3583 = vmatprep.subr.mxu0 %v9912_v2  ;;  %2459 = vperm.xlu0 %5754, %v5116_v14   ;;  %v1558_v13 = vpop.f32.mrf.mxu0  ;;  %v7715_v14 = vpop.permute.xlu0 %1218 }
 0x174   : > { %5016 = vmatmul.mubr.msk.f32.gmra.mxu0 %vm1018_vm15, %v9910_v21  ;;  %5047 = vmatprep.mubr.msk.f32.mxu1 %vm1275_vm13, %v9910_v21  ;;  %v7592_v47 = vpop.permute.xlu1 %1209  ;;  %vm1280_vm13 = vcmp.eq.s32.totalorder %v6554_v0, %v7530_v62  ;;  %vm1026_vm15 = vcmp.eq.s32.totalorder %v6554_v0, %v7362_v43  ;;  %v5851_v13 = vld [vmem:[%s9900_s1 + $0x10] sm:$0xff] }
 0x175   : > { %5017 = vmatprep.mubr.msk.f32.mxu0 %vm1021_vm0, %v9910_v21  ;;  %5048 = vmatmul.mubr.msk.f32.gmra.mxu1 %vm1274_vm14, %v9910_v21  ;;  %v7594_v34 = vpop.f32.mrf.mxu0  ;;  %vm1282_vm14 = vcmp.eq.s32.totalorder %v6554_v0, %v7576_v11  ;;  %vm1029_vm0 = vcmp.eq.s32.totalorder %v6559_v7, %v7360_v42 }
 0x176   : > { %3584 = vmatpush1.msra.mxu0 %v5841_v6  ;;  %5049 = vmatprep.mubr.msk.f32.mxu1 %vm1277_vm1, %v9910_v21  ;;  %vm1285_vm1 = vcmp.eq.s32.totalorder %v6559_v7, %v7551_v29 }
 0x177   : > { %3585 = vmatprep.subr.mxu0 %v9912_v2  ;;  %5755 = vset.pattern.permute.xlu1 %v9906_v1  ;;  %v1563_v48 = vpop.f32.mrf.mxu0 }
 0x178   : > { %3586 = vmatpush1.msra.mxu0 %v5842_v15  ;;  %2462 = vperm.xlu1 %5755, %v7590_v10   ;;  %v7619_v26 = vpop.permute.xlu1 %1215  ;;  %v5852_v48 = vld [vmem:[%s9900_s1 + $0x8] sm:$0xff] }
 0x179   : > { %5018 = vmatmul.mubr.msk.f32.gmra.mxu0 %vm1020_vm2, %v9910_v21  ;;  %3587 = vmatprep.subr.mxu0 %v9912_v2  ;;  %v7621_v53 = vpop.f32.mrf.mxu0  ;;  %vm1028_vm2 = vcmp.eq.s32.totalorder %v6554_v0, %v7360_v42  ;;  %v5121_v42 = vld [vmem:[%s6150_s3 + $0x180] sm:$0xff] }
 0x17a   : > { %5019 = vmatprep.mubr.msk.f32.mxu0 %vm1023_vm4, %v9910_v21  ;;  %5050 = vmatmul.mubr.msk.f32.gmra.mxu1 %vm1276_vm5, %v9910_v21  ;;  %vm1031_vm4 = vcmp.eq.s32.totalorder %v6559_v7, %v7383_v44  ;;  %vm1284_vm5 = vcmp.eq.s32.totalorder %v6554_v0, %v7551_v29  ;;  %v7747_v29 = vpop.permute.xlu0 %1224 }
 0x17b   : > { %3588 = vmatpush1.msra.mxu0 %v5843_v54  ;;  %5051 = vmatprep.mubr.msk.f32.mxu1 %vm1279_vm3, %v9910_v21  ;;  %v1568_v30 = vpop.f32.mrf.mxu0  ;;  %vm1287_vm3 = vcmp.eq.s32.totalorder %v6559_v7, %v7610_v23  ;;  %v5854_v54 = vld [vmem:[%s9900_s1 + $0xf8] sm:$0xff] }
 0x17c   : > { %3589 = vmatprep.subr.mxu0 %v9912_v2  ;;  %2465 = vperm.xlu1 %5755, %v5118_v19   ;;  %v7638_v12 = vpop.permute.xlu1 %1221 }
 0x17d   : > { %3590 = vmatpush1.msra.mxu0 %v5844_v36  ;;  %2468 = vperm.xlu0 %5754, %v5119_v61   ;;  %v7640_v35 = vpop.f32.mrf.mxu0  ;;  %v5122_v36 = vld [vmem:[%s6150_s3 + $0x188] sm:$0xff] }
 0x17e   : > { %5020 = vmatmul.mubr.msk.f32.gmra.mxu0 %vm1022_vm7, %v9910_v21  ;;  %3591 = vmatprep.subr.mxu0 %v9912_v2  ;;  %vm1030_vm7 = vcmp.eq.s32.totalorder %v6554_v0, %v7383_v44  ;;  %v7782_v30 = vpop.permute.xlu0 %1230 }
 0x17f   : > { %5021 = vmatprep.mubr.msk.f32.mxu0 %vm1025_vm8, %v9910_v21  ;;  %5052 = vmatmul.mubr.msk.f32.gmra.mxu1 %vm1278_vm6, %v9910_v21  ;;  %v1573_v39 = vpop.f32.mrf.mxu0  ;;  %vm1286_vm6 = vcmp.eq.s32.totalorder %v6554_v0, %v7610_v23  ;;  %vm1033_vm8 = vcmp.eq.s32.totalorder %v6559_v7, %v7395_v16 }
 0x180   : > { %3592 = vmatpush1.msra.mxu0 %v5845_v58  ;;  %5053 = vmatprep.mubr.msk.f32.mxu1 %vm1281_vm9, %v9910_v21  ;;  %v7658_v40 = vpop.permute.xlu1 %1227  ;;  %vm1289_vm9 = vcmp.eq.s32.totalorder %v6559_v7, %v7568_v18  ;;  %v5855_v39 = vld [vmem:[%s9900_s1 + $0xf0] sm:$0xff] }
 0x181   : > { %3593 = vmatprep.subr.mxu0 %v9912_v2  ;;  %5756 = vset.pattern.permute.xlu1 %v9908_v33  ;;  %v7660_v51 = vpop.f32.mrf.mxu0 }
 0x182   : > { %3594 = vmatpush1.msra.mxu0 %v5846_v45  ;;  %2753 = vperm.xlu1 %5756, %v5118_v19  }
 0x183   : > { %5022 = vmatmul.mubr.msk.f32.gmra.mxu0 %vm1024_vm10, %v9910_v21  ;;  %3595 = vmatprep.subr.mxu0 %v9912_v2  ;;  %v1578_v38 = vpop.f32.mrf.mxu0  ;;  %vm1032_vm10 = vcmp.eq.s32.totalorder %v6554_v0, %v7395_v16 }
 0x184   : > { %5023 = vmatprep.mubr.msk.f32.mxu0 %vm1027_vm12, %v9910_v21  ;;  %5054 = vmatmul.mubr.msk.f32.gmra.mxu1 %vm1280_vm13, %v9910_v21  ;;  %v7683_v56 = vpop.permute.xlu1 %1233  ;;  %vm1288_vm12 = vcmp.eq.s32.totalorder %v6554_v0, %v7568_v18  ;;  %vm1291_vm13 = vcmp.eq.s32.totalorder %v6559_v7, %v7646_v41  ;;  %v5856_v18 = vld [vmem:[%s9900_s1 + $0xe8] sm:$0xff] }
 0x185   : > { %3596 = vmatpush1.msra.mxu0 %v5847_v59  ;;  %5055 = vmatprep.mubr.msk.f32.mxu1 %vm1283_vm11, %v9910_v21  ;;  %v7685_v60 = vpop.f32.mrf.mxu0  ;;  %vm1035_vm11 = vcmp.eq.s32.totalorder %v6559_v7, %v7409_v49 }
 0x186   : > { %3597 = vmatprep.subr.mxu0 %v9912_v2  ;;  %2756 = vperm.xlu1 %5756, %v5119_v61  }
 0x187   : > { %3598 = vmatpush1.msra.mxu0 %v5848_v4  ;;  %5757 = vset.pattern.permute.xlu0 %v9908_v33  ;;  %v1583_v62 = vpop.f32.mrf.mxu0 }
 0x188   : > { %5024 = vmatmul.mubr.msk.f32.gmra.mxu0 %vm1026_vm15, %v9910_v21  ;;  %3599 = vmatprep.subr.mxu0 %v9912_v2  ;;  %v7707_v43 = vpop.permute.xlu1 %1239  ;;  %vm1034_vm15 = vcmp.eq.s32.totalorder %v6554_v0, %v7409_v49  ;;  %v5857_v62 = vld [vmem:[%s9900_s1 + $0xe0] sm:$0xff] }
 0x189   : > { %5025 = vmatprep.mubr.msk.f32.mxu0 %vm1029_vm0, %v9910_v21  ;;  %5056 = vmatmul.mubr.msk.f32.gmra.mxu1 %vm1282_vm14, %v9910_v21  ;;  %v7709_v27 = vpop.f32.mrf.mxu0  ;;  %vm1290_vm14 = vcmp.eq.s32.totalorder %v6554_v0, %v7646_v41  ;;  %vm1037_vm0 = vcmp.eq.s32.totalorder %v6559_v7, %v7428_v20  ;;  %v7818_v41 = vpop.permute.xlu0 %1236 }
 0x18a   : > { %3600 = vmatpush1.msra.mxu0 %v5849_v55  ;;  %5057 = vmatprep.mubr.msk.f32.mxu1 %vm1285_vm1, %v9910_v21  ;;  %vm1293_vm1 = vcmp.eq.s32.totalorder %v6559_v7, %v7592_v47 }
 0x18b   : > { %3601 = vmatprep.subr.mxu0 %v9912_v2  ;;  %5758 = vset.pattern.permute.xlu1 %v9906_v1  ;;  %v1588_v9 = vpop.f32.mrf.mxu0 }
 0x18c   : > { %3602 = vmatpush1.msra.mxu0 %v5850_v17  ;;  %2471 = vperm.xlu1 %5758, %v7705_v3   ;;  %v7734_v5 = vpop.permute.xlu1 %1245  ;;  %v5858_v17 = vld [vmem:[%s9900_s1 + $0xd8] sm:$0xff] }
 0x18d   : > { %5026 = vmatmul.mubr.msk.f32.gmra.mxu0 %vm1028_vm2, %v9910_v21  ;;  %3603 = vmatprep.subr.mxu0 %v9912_v2  ;;  %v7736_v11 = vpop.f32.mrf.mxu0  ;;  %vm1036_vm2 = vcmp.eq.s32.totalorder %v6554_v0, %v7428_v20 }
 0x18e   : > { %5027 = vmatprep.mubr.msk.f32.mxu0 %vm1031_vm4, %v9910_v21  ;;  %5058 = vmatmul.mubr.msk.f32.gmra.mxu1 %vm1284_vm5, %v9910_v21  ;;  %vm1292_vm4 = vcmp.eq.s32.totalorder %v6554_v0, %v7592_v47  ;;  %vm1295_vm5 = vcmp.eq.s32.totalorder %v6559_v7, %v7677_v37  ;;  %v5859_v47 = vld [vmem:[%s9900_s1 + $0xd0] sm:$0xff] }
 0x18f   : > { %3604 = vmatpush1.msra.mxu0 %v5851_v13  ;;  %5059 = vmatprep.mubr.msk.f32.mxu1 %vm1287_vm3, %v9910_v21  ;;  %v1593_v6 = vpop.f32.mrf.mxu0  ;;  %vm1039_vm3 = vcmp.eq.s32.totalorder %v6559_v7, %v7430_v52 }
 0x190   : > { %3605 = vmatprep.subr.mxu0 %v9912_v2  ;;  %2474 = vperm.xlu1 %5758, %v5121_v42   ;;  %v7856_v6 = vpop.permute.xlu0 %1242 }
 0x191   : > { %3606 = vmatpush1.msra.mxu0 %v5852_v48  ;;  %2750 = vperm.xlu0 %5757, %v7590_v10   ;;  %v7755_v15 = vpop.permute.xlu1 %1251  ;;  %v7757_v19 = vpop.f32.mrf.mxu0  ;;  %v5853_v10 = vld [vmem:[%s9900_s1] sm:$0xff] }
 0x192   : > { %5028 = vmatmul.mubr.msk.f32.gmra.mxu0 %vm1030_vm7, %v9910_v21  ;;  %3607 = vmatprep.subr.mxu0 %v9912_v2  ;;  %vm1038_vm7 = vcmp.eq.s32.totalorder %v6554_v0, %v7430_v52  ;;  %v5125_v52 = vld [vmem:[%s6150_s3 + $0x1a0] sm:$0xff] }
 0x193   : > { %5029 = vmatprep.mubr.msk.f32.mxu0 %vm1033_vm8, %v9910_v21  ;;  %5060 = vmatmul.mubr.msk.f32.gmra.mxu1 %vm1286_vm6, %v9910_v21  ;;  %v1598_v44 = vpop.f32.mrf.mxu0  ;;  %vm1294_vm6 = vcmp.eq.s32.totalorder %v6554_v0, %v7677_v37  ;;  %vm1041_vm8 = vcmp.eq.s32.totalorder %v6559_v7, %v7461_v31  ;;  %v5124_v37 = vld [vmem:[%s6150_s3 + $0x198] sm:$0xff] }
 0x194   : > { %3608 = vmatpush1.msra.mxu0 %v5853_v10  ;;  %5061 = vmatprep.mubr.msk.f32.mxu1 %vm1289_vm9, %v9910_v21  ;;  %vm1297_vm9 = vcmp.eq.s32.totalorder %v6559_v7, %v7619_v26 }
 0x195   : > { %3609 = vmatprep.subr.mxu0 %v9912_v2  ;;  %5759 = vset.pattern.permute.xlu1 %v9908_v33  ;;  %v7773_v23 = vpop.permute.xlu1 %1257  ;;  %v7775_v61 = vpop.f32.mrf.mxu0 }
 0x196   : > { %3610 = vmatpush2.msra.mxu0 %v5854_v54  ;;  %2762 = vperm.xlu1 %5759, %v5121_v42   ;;  %v7848_v42 = vld [vmem:[%s6150_s3 + $0x190] sm:$0xff]  ;;  %v5860_v54 = vld [vmem:[%s9900_s1 + $0xc8] sm:$0xff] }
 0x197   : > { %5030 = vmatmul.mubr.msk.f32.gmra.mxu0 %vm1032_vm10, %v9910_v21  ;;  %3611 = vmatprep.subr.mxu0 %v9912_v2  ;;  %v1603_v16 = vpop.f32.mrf.mxu0  ;;  %vm1040_vm10 = vcmp.eq.s32.totalorder %v6554_v0, %v7461_v31 }
 0x198   : > { %5031 = vmatprep.mubr.msk.f32.mxu0 %vm1035_vm11, %v9910_v21  ;;  %5062 = vmatmul.mubr.msk.f32.gmra.mxu1 %vm1288_vm12, %v9910_v21  ;;  %vm1043_vm11 = vcmp.eq.s32.totalorder %v6559_v7, %v7451_v32  ;;  %vm1296_vm12 = vcmp.eq.s32.totalorder %v6554_v0, %v7619_v26 }
 0x199   : > { %3612 = vmatpush2.msra.mxu0 %v5855_v39  ;;  %2759 = vperm.xlu0 %5757, %v7705_v3   ;;  %v7799_v58 = vpop.permute.xlu1 %1263  ;;  %v7801_v45 = vpop.f32.mrf.mxu0 }
 0x19a   : > { %3613 = vmatprep.subr.mxu0 %v9912_v2  ;;  %5063 = vmatprep.mubr.msk.f32.mxu1 %vm1291_vm13, %v9910_v21  ;;  %v7812_v38 = vpop.f32.mrf.mxu1  ;;  %vm1299_vm13 = vcmp.eq.s32.totalorder %v6559_v7, %v7715_v14 }
 0x19b   : > { %3614 = vmatpush2.msra.mxu0 %v5856_v18  ;;  %2765 = vperm.xlu1 %5759, %v5122_v36   ;;  %v1608_v59 = vpop.f32.mrf.mxu0 }
 0x19c   : > { %5032 = vmatmul.mubr.msk.f32.gmra.mxu0 %vm1034_vm15, %v9910_v21  ;;  %3615 = vmatprep.subr.mxu0 %v9912_v2  ;;  %v1753_v49 = vpop.f32.mrf.mxu1  ;;  %v5861_v59 = vld [vmem:[%s9900_s1 + $0xc0] sm:$0xff]  ;;  %vm1042_vm15 = vcmp.eq.s32.totalorder %v6554_v0, %v7451_v32 }
 0x19d   : > { %5033 = vmatprep.mubr.msk.f32.mxu0 %vm1037_vm0, %v9910_v21  ;;  %5064 = vmatmul.mubr.msk.f32.gmra.mxu1 %vm1290_vm14, %v9910_v21  ;;  %v7824_v4 = vpop.f32.mrf.mxu0  ;;  %v7894_v49 = vpop.permute.xlu0 %1248  ;;  %vm1298_vm14 = vcmp.eq.s32.totalorder %v6554_v0, %v7715_v14  ;;  %v5865_v32 = vld [vmem:[%s9900_s1 + $0xa0] sm:$0xff]  ;;  %vm1301_vm0 = vcmp.eq.s32.totalorder %v6559_v7, %v7638_v12 }
 0x19e   : > { %9916 = vst [vmem:[#allocation5_spill] sm:$0xff] %v7824_v4  ;;  %3616 = vmatpush2.msra.mxu0 %v5857_v62  ;;  %5065 = vmatprep.mubr.msk.f32.mxu1 %vm1293_vm1, %v9910_v21  ;;  %v7830_v3 = vpop.permute.xlu1 %2426  ;;  %v7834_v55 = vpop.f32.mrf.mxu1  ;;  %vm1300_vm1 = vcmp.eq.s32.totalorder %v6554_v0, %v7638_v12 }
 0x19f   : > { %3617 = vmatprep.subr.mxu0 %v9912_v2  ;;  %5760 = vset.pattern.permute.xlu0 %v9906_v1  ;;  %v1613_v9 = vpop.f32.mrf.mxu0  ;;  %v1757_v4 = vadd.f32 %v7834_v55, %v7476_v57 }
 0x1a0   : > { %3618 = vmatpush2.msra.mxu0 %v5858_v17  ;;  %2477 = vperm.xlu0 %5760, %v5122_v36   ;;  %v1758_v13 = vpop.f32.mrf.mxu1  ;;  %v5862_v17 = vld [vmem:[%s9900_s1 + $0xb8] sm:$0xff] }
 0x1a1   : > { %3619 = vmatprep.subr.mxu0 %v9912_v2  ;;  %5034 = vmatmul.mubr.msk.f32.gmra.mxu0 %vm1036_vm2, %v9910_v21  ;;  %v7850_v20 = vpop.f32.mrf.mxu0  ;;  %v7924_v26 = vpop.permute.xlu0 %1254  ;;  %vm1303_vm2 = vcmp.eq.s32.totalorder %v6559_v7, %v7747_v29 }
 0x1a2   : > { %9917 = vst [vmem:[#allocation6_spill] sm:$0xff] %v7850_v20  ;;  %5035 = vmatprep.mubr.msk.f32.mxu0 %vm1039_vm3, %v9910_v21  ;;  %5066 = vmatmul.mubr.msk.f32.gmra.mxu1 %vm1292_vm4, %v9910_v21  ;;  %v7858_v48 = vpop.permute.xlu1 %2429  ;;  %v7864_v44 = vpop.f32.mrf.mxu1  ;;  %vm1302_vm3 = vcmp.eq.s32.totalorder %v6554_v0, %v7747_v29  ;;  %vm2522_vm4 = vcmp.eq.s32.totalorder %v6559_v7, %v7830_v3  ;;  %v5870_v29 = vld [vmem:[%s9900_s1 + $0x170] sm:$0xff] }
 0x1a3   : > { %3620 = vmatpush2.msra.mxu0 %v5859_v47  ;;  %5761 = vset.pattern.permute.xlu1 %v9906_v1  ;;  %v1618_v10 = vpop.f32.mrf.mxu0 }
 0x1a4   : > { %3621 = vmatprep.subr.mxu0 %v9912_v2  ;;  %2480 = vperm.xlu1 %5761, %v7848_v42   ;;  %v1763_v16 = vpop.f32.mrf.mxu1  ;;  %v5863_v10 = vld [vmem:[%s9900_s1 + $0xb0] sm:$0xff] }
 0x1a5   : > { %3622 = vmatpush2.msra.mxu0 %v5860_v54  ;;  %5067 = vmatprep.mubr.msk.f32.mxu1 %vm1295_vm5, %v9910_v21  ;;  %v7876_v36 = vpop.f32.mrf.mxu0  ;;  %vm2521_vm5 = vcmp.eq.s32.totalorder %v6554_v0, %v7830_v3  ;;  %v5872_v3 = vld [vmem:[%s9900_s1 + $0x168] sm:$0xff] }
 0x1a6   : > { %9918 = vst [vmem:[#allocation7_spill] sm:$0xff] %v7876_v36  ;;  %5036 = vmatmul.mubr.msk.f32.gmra.mxu0 %vm1038_vm7, %v9910_v21  ;;  %3623 = vmatprep.subr.mxu0 %v9912_v2  ;;  %v7888_v39 = vpop.f32.mrf.mxu1  ;;  %vm2524_vm7 = vcmp.eq.s32.totalorder %v6559_v7, %v7858_v48 }
 0x1a7   : > { %5037 = vmatprep.mubr.msk.f32.mxu0 %vm1041_vm8, %v9910_v21  ;;  %5068 = vmatmul.mubr.msk.f32.gmra.mxu1 %vm1294_vm6, %v9910_v21  ;;  %v1623_v18 = vpop.f32.mrf.mxu0  ;;  %vm1305_vm6 = vcmp.eq.s32.totalorder %v6559_v7, %v7658_v40  ;;  %vm2523_vm8 = vcmp.eq.s32.totalorder %v6554_v0, %v7858_v48 }
 0x1a8   : > { %3624 = vmatpush2.msra.mxu0 %v5861_v59  ;;  %5069 = vmatprep.mubr.msk.f32.mxu1 %vm1297_vm9, %v9910_v21  ;;  %v1768_v9 = vpop.f32.mrf.mxu1  ;;  %v5864_v18 = vld [vmem:[%s9900_s1 + $0xa8] sm:$0xff]  ;;  %vm1304_vm9 = vcmp.eq.s32.totalorder %v6554_v0, %v7658_v40 }
 0x1a9   : > { %3625 = vmatprep.subr.mxu0 %v9912_v2  ;;  %2483 = vperm.xlu1 %5761, %v5124_v37   ;;  %v7897_v62 = vpop.permute.xlu1 %2717  ;;  %v7904_v13 = vpop.f32.mrf.mxu0 }
 0x1aa   : > { %3626 = vmatpush2.msra.mxu0 %v5862_v17  ;;  %2486 = vperm.xlu0 %5760, %v5125_v52   ;;  %9919 = vst [vmem:[#allocation8_spill] sm:$0xff] %v7904_v13  ;;  %v7914_v31 = vpop.f32.mrf.mxu1 }
 0x1ab   : > { %5038 = vmatmul.mubr.msk.f32.gmra.mxu0 %vm1040_vm10, %v9910_v21  ;;  %3627 = vmatprep.subr.mxu0 %v9912_v2  ;;  %v1628_v47 = vpop.f32.mrf.mxu0  ;;  %vm1307_vm10 = vcmp.eq.s32.totalorder %v6559_v7, %v7782_v30 }
 0x1ac   : > { %5039 = vmatprep.mubr.msk.f32.mxu0 %vm1043_vm11, %v9910_v21  ;;  %5070 = vmatmul.mubr.msk.f32.gmra.mxu1 %vm1296_vm12, %v9910_v21  ;;  %v1773_v54 = vpop.f32.mrf.mxu1  ;;  %v5866_v47 = vld [vmem:[%s9900_s1 + $0x98] sm:$0xff]  ;;  %vm1306_vm12 = vcmp.eq.s32.totalorder %v6554_v0, %v7782_v30 }
 0x1ad   : > { %3628 = vmatpush2.msra.mxu0 %v5863_v10  ;;  %5762 = vset.pattern.permute.xlu1 %v9908_v33  ;;  %v7928_v16 = vpop.f32.mrf.mxu0  ;;  %v7957_v54 = vpop.permute.xlu0 %1260 }
 0x1ae   : > { %3629 = vmatprep.subr.mxu0 %v9912_v2  ;;  %5071 = vmatprep.mubr.msk.f32.mxu1 %vm1299_vm13, %v9910_v21  ;;  %9920 = vst [vmem:[#allocation9_spill] sm:$0xff] %v7928_v16  ;;  %v7935_v59 = vpop.permute.xlu1 %2720  ;;  %v7937_v9 = vpop.f32.mrf.mxu1  ;;  %vm1309_vm13 = vcmp.eq.s32.totalorder %v6559_v7, %v7683_v56  ;;  %v9931_v16 = vmov 0.0  }
 0x1af   : > { %3630 = vmatpush2.msra.mxu0 %v5864_v18  ;;  %2771 = vperm.xlu1 %5762, %v5124_v37   ;;  %v1633_v14 = vpop.f32.mrf.mxu0  ;;  %v5867_v18 = vld [vmem:[%s9900_s1 + $0x178] sm:$0xff] }
 0x1b0   : > { %5040 = vmatmul.mubr.msk.f32.gmra.mxu0 %vm1042_vm15, %v9910_v21  ;;  %3631 = vmatprep.subr.mxu0 %v9912_v2  ;;  %v1778_v37 = vpop.f32.mrf.mxu1  ;;  %vm1308_vm15 = vcmp.eq.s32.totalorder %v6554_v0, %v7683_v56 }
 0x1b1   : > { %5072 = vmatmul.mubr.msk.f32.gmra.mxu1 %vm1298_vm14, %v9910_v21  ;;  %3632 = vmatpush2.msra.mxu0 %v5865_v32  ;;  %v7949_v17 = vpop.f32.mrf.mxu0  ;;  %v7997_v24 = vpop.permute.xlu0 %1266 }
 0x1b2   : > { %5073 = vmatprep.mubr.msk.f32.mxu1 %vm1301_vm0, %v9910_v21  ;;  %3633 = vmatprep.subr.mxu0 %v9912_v2  ;;  %9921 = vst [vmem:[#allocation10_spill] sm:$0xff] %v7949_v17  ;;  %v7954_v10 = vpop.f32.mrf.mxu1  ;;  %vm1311_vm0 = vcmp.eq.s32.totalorder %v6559_v7, %v7818_v41 }
 0x1b3   : > { %3634 = vmatpush2.msra.mxu0 %v5866_v47  ;;  %2774 = vperm.xlu1 %5762, %v5125_v52   ;;  %v1638_v14 = vpop.f32.mrf.mxu0  ;;  %v5868_v52 = vld [vmem:[%s9900_s1 + $0x90] sm:$0xff]  ;;  %v5869_v47 = vld [vmem:[%s9900_s1 + $0x88] sm:$0xff] }
 0x1b4   : > { %3635 = vmatprep.subr.mxu0 %v9912_v2  ;;  %3803 = vmatpush1.msra.mxu1 %v5867_v18  ;;  %v1783_v12 = vpop.f32.mrf.mxu1  ;;  %v5126_v14 = vld [vmem:[%s6150_s3 + $0x1a8] sm:$0xff] }
 0x1b5   : > { %5074 = vmatmul.mubr.msk.f32.gmra.mxu1 %vm1300_vm1, %v9910_v21  ;;  %3636 = vmatpush2.msra.mxu0 %v5868_v52  ;;  %v7970_v32 = vpop.permute.xlu1 %2435  ;;  %v7976_v37 = vpop.f32.mrf.mxu0 }
 0x1b6   : > { %3637 = vmatprep.subr.mxu0 %v9912_v2  ;;  %3804 = vmatprep.subr.mxu1 %v9912_v2  ;;  %9922 = vst [vmem:[#allocation11_spill] sm:$0xff] %v7976_v37  ;;  %v7984_v18 = vpop.f32.mrf.mxu1  ;;  %v9926_v37 = vmov 1   ;;  %vm2528_vm1 = vcmp.eq.s32.totalorder %v6559_v7, %v7970_v32 }
 0x1b7   : > { %3638 = vmatpush2.msra.mxu0 %v5869_v47  ;;  %5075 = vmatprep.mubr.msk.f32.mxu1 %vm1303_vm2, %v9910_v21  ;;  %v1643_v52 = vpop.f32.mrf.mxu0  ;;  %vm1310_vm2 = vcmp.eq.s32.totalorder %v6554_v0, %v7818_v41 }
 0x1b8   : > { %3639 = vmatprep.subr.mxu0 %v9912_v2  ;;  %3805 = vmatpush1.msra.mxu1 %v5870_v29  ;;  %v1788_v47 = vpop.f32.mrf.mxu1 }
 0x1b9   : > { %5764 = vset.pattern.permute.xlu1 %v9906_v1  ;;  %5076 = vmatmul.mubr.msk.f32.gmra.mxu1 %vm1302_vm3, %v9910_v21  ;;  %v7993_v12 = vpop.permute.xlu1 %2438  ;;  %v8003_v29 = vpop.f32.mrf.mxu0  ;;  %v5127_v1 = vld [vmem:[%s6150_s3 + $0x1b0] sm:$0xff]  ;;  %vm2527_vm3 = vcmp.eq.s32.totalorder %v6554_v0, %v7970_v32 }
 0x1ba   : > { %3640 = vmatpush2.msra.mxu0 %v5871_v28  ;;  %5393 = vmatprep.mubr.msk.f32.mxu0 %vm2522_vm4, %v9910_v21  ;;  %9923 = vst [vmem:[#allocation12_spill] sm:$0xff] %v8003_v29  ;;  %v8008_v52 = vpop.f32.mrf.mxu1  ;;  %vm1313_vm4 = vcmp.eq.s32.totalorder %v6559_v7, %v7707_v43 }
 0x1bb   : > { %3806 = vmatprep.subr.mxu1 %v9912_v2  ;;  %2489 = vperm.xlu1 %5764, %v5126_v14   ;;  %v1648_v28 = vpop.f32.mrf.mxu0 }
 0x1bc   : > { %5763 = vset.pattern.permute.xlu0 %v9908_v33  ;;  %5077 = vmatprep.mubr.msk.f32.mxu1 %vm1305_vm6, %v9910_v21  ;;  %v1793_v47 = vpop.f32.mrf.mxu1  ;;  %v2433_v33 = vpop.permute.xlu0 %2432  ;;  %v5873_v28 = vld [vmem:[%s9900_s1 + $0x160] sm:$0xff]  ;;  %vm1312_vm6 = vcmp.eq.s32.totalorder %v6554_v0, %v7707_v43  ;;  %v5882_v43 = vld [vmem:[%s9900_s1 + $0x118] sm:$0xff] }
 0x1bd   : > { %5394 = vmatmul.mubr.msk.f32.vlgmr.msra.gmra.mxu0 %vm2521_vm5, %v9910_v21  ;;  %3807 = vmatpush1.msra.mxu1 %v5872_v3  ;;  %v8021_v29 = vpop.f32.mrf.mxu0  ;;  %vm2526_vm11 = vcmp.eq.s32.totalorder %v6559_v7, %v2433_v33  ;;  %v5874_v47 = vld [vmem:[%s9900_s1 + $0x158] sm:$0xff]  ;;  %vm2525_vm14 = vcmp.eq.s32.totalorder %v6554_v0, %v2433_v33  ;;  %vm2530_vm5 = vcmp.eq.s32.totalorder %v6559_v7, %v7993_v12 }
 0x1be   : > { %2768 = vperm.xlu0 %5763, %v7848_v42   ;;  %3808 = vmatprep.subr.mxu1 %v9912_v2  ;;  %9924 = vst [vmem:[#allocation13_spill] sm:$0xff] %v8021_v29  ;;  %v8033_v3 = vpop.f32.mrf.mxu1  ;;  %v5875_v29 = vld [vmem:[%s9900_s1 + $0x150] sm:$0xff]  ;;  %v5128_v33 = vld [vmem:[%s6150_s3 + $0x1b8] sm:$0xff] }
 0x1bf   : > { %3809 = vmatpush1.msra.mxu1 %v5873_v28  ;;  %5395 = vmatprep.mubr.msk.f32.mxu0 %vm2524_vm7, %v9910_v21  ;;  %v8031_v42 = vpop.permute.xlu1 %2726  ;;  %v1653_v48 = vpop.f32.mrf.mxu0  ;;  %vm1315_vm7 = vcmp.eq.s32.totalorder %v6559_v7, %v7856_v6 }
 0x1c0   : > { %5078 = vmatmul.mubr.msk.f32.gmra.mxu1 %vm1304_vm9, %v9910_v21  ;;  %3810 = vmatprep.subr.mxu1 %v9912_v2  ;;  %v1798_v40 = vpop.f32.mrf.mxu1  ;;  %vm1314_vm9 = vcmp.eq.s32.totalorder %v6554_v0, %v7856_v6  ;;  %v5884_v6 = vld [vmem:[%s9900_s1 + $0x108] sm:$0xff] }
 0x1c1   : > { %2492 = vperm.xlu1 %5764, %v5127_v1   ;;  %5079 = vmatprep.mubr.msk.f32.mxu1 %vm1307_vm10, %v9910_v21  ;;  %v8045_v28 = vpop.f32.mrf.mxu0  ;;  %vm1317_vm10 = vcmp.eq.s32.totalorder %v6559_v7, %v7734_v5 }
 0x1c2   : > { %5396 = vmatmul.mubr.msk.f32.gmra.mxu0 %vm2523_vm8, %v9910_v21  ;;  %3811 = vmatpush1.msra.mxu1 %v5874_v47  ;;  %9925 = vst [vmem:[#allocation14_spill] sm:$0xff] %v8045_v28  ;;  %v8048_v48 = vpop.f32.mrf.mxu1  ;;  %vm2529_vm8 = vcmp.eq.s32.totalorder %v6554_v0, %v7993_v12  ;;  %v5883_v12 = vld [vmem:[%s9900_s1 + $0x110] sm:$0xff] }
 0x1c3   : > { %2777 = vperm.xlu0 %5763, %v5126_v14   ;;  %3812 = vmatprep.subr.mxu1 %v9912_v2  ;;  %v8056_v40 = vpop.permute.xlu1 %2729  ;;  %v1658_v47 = vpop.f32.mrf.mxu0  ;;  %v5129_v14 = vld [vmem:[%s6150_s3 + $0x1c0] sm:$0xff] }
 0x1c4   : > { %3813 = vmatpush1.msra.mxu1 %v5875_v29  ;;  %5397 = vmatprep.mubr.msk.f32.mxu0 %vm2526_vm11, %v9910_v21  ;;  %v1803_v28 = vpop.f32.mrf.mxu1  ;;  %v5876_v29 = vld [vmem:[%s9900_s1 + $0x148] sm:$0xff]  ;;  %vm1316_vm11 = vcmp.eq.s32.totalorder %v6554_v0, %v7734_v5 }
 0x1c5   : > { %5080 = vmatmul.mubr.msk.f32.gmra.mxu1 %vm1306_vm12, %v9910_v21  ;;  %3814 = vmatprep.subr.mxu1 %v9912_v2  ;;  %v8066_v30 = vpop.f32.mrf.mxu0 }
 0x1c6   : > { %5765 = vset.pattern.permute.xlu1 %v9926_v37  ;;  %5081 = vmatprep.mubr.msk.f32.mxu1 %vm1309_vm13, %v9910_v21  ;;  %9927 = vst [vmem:[#allocation15_spill] sm:$0xff] %v8066_v30  ;;  %v8071_v47 = vpop.f32.mrf.mxu1  ;;  %v5877_v21 = vld [vmem:[%s9900_s1 + $0x140] sm:$0xff]  ;;  %v9928_v30 = vmov 1.0   ;;  %vm1319_vm13 = vcmp.eq.s32.totalorder %v6559_v7, %v7894_v49 }
 0x1c7   : > { %3815 = vmatpush1.msra.mxu1 %v5876_v29  ;;  %2780 = vperm.xlu1 %5765, %v5127_v1   ;;  %v1663_v28 = vpop.f32.mrf.mxu0 }
 0x1c8   : > { %2786 = vperm.xlu0 %5763, %v5129_v14   ;;  %3816 = vmatprep.subr.mxu1 %v9912_v2  ;;  %v1808_v17 = vpop.f32.mrf.mxu1  ;;  %v8098_v28 = vpop.permute.xlu0 %2714 }
 0x1c9   : > { %3817 = vmatpush1.msra.mxu1 %v5877_v21  ;;  %5398 = vmatmul.mubr.msk.f32.gmra.mxu0 %vm2525_vm14, %v9928_v30  ;;  %v8087_v29 = vpop.f32.mrf.mxu0  ;;  %v5878_v21 = vld [vmem:[%s9900_s1 + $0x138] sm:$0xff]  ;;  %v9930_v17 = vmov 0   ;;  %vm1318_vm14 = vcmp.eq.s32.totalorder %v6554_v0, %v7894_v49 }
 0x1ca   : > { %5082 = vmatmul.mubr.msk.f32.gmra.mxu1 %vm1308_vm15, %v9928_v30  ;;  %3818 = vmatprep.subr.mxu1 %v9912_v2  ;;  %v8085_v1 = vpop.permute.xlu1 %2444  ;;  %9929 = vst [vmem:[#allocation16_spill] sm:$0xff] %v8087_v29  ;;  %v8095_v56 = vpop.f32.mrf.mxu1 }
 0x1cb   : > { %5083 = vmatprep.mubr.msk.f32.mxu1 %vm1311_vm0, %v9928_v30  ;;  %3819 = vmatpush1.msra.mxu1 %v5878_v21  ;;  %v1668_v2 = vpop.f32.mrf.mxu0  ;;  %v5879_v21 = vld [vmem:[%s9900_s1 + $0x130] sm:$0xff]  ;;  %vm1321_vm0 = vcmp.eq.s32.totalorder %v6559_v7, %v7755_v15 }
 0x1cc   : > { %2783 = vperm.xlu1 %5765, %v5128_v33   ;;  %5767 = vset.pattern.permute.xlu0 %v9930_v17  ;;  %v1813_v29 = vpop.f32.mrf.mxu1 }
 0x1cd   : > { %3820 = vmatprep.subr.mxu1 %v9931_v16  ;;  %2495 = vperm.xlu0 %5767, %v5128_v33   ;;  %v8107_v13 = vpop.f32.mrf.mxu0  ;;  %v5880_v33 = vld [vmem:[%s9900_s1 + $0x128] sm:$0xff] }
 0x1ce   : > { %3821 = vmatpush1.msra.mxu1 %v5879_v21  ;;  %5399 = vmatprep.mubr.msk.f32.mxu0 %vm2528_vm1, %v9928_v30  ;;  %9932 = vst [vmem:[#allocation17_spill] sm:$0xff] %v8107_v13  ;;  %v8115_v2 = vpop.permute.xlu1 %2447  ;;  %v8117_v41 = vpop.f32.mrf.mxu1  ;;  %vm2534_vm1 = vcmp.eq.s32.totalorder %v6559_v7, %v8085_v1 }
 0x1cf   : > { %5084 = vmatmul.mubr.msk.f32.gmra.mxu1 %vm1310_vm2, %v9928_v30  ;;  %3822 = vmatprep.subr.mxu1 %v9931_v16  ;;  %v1673_v32 = vpop.f32.mrf.mxu0  ;;  %v8128_v21 = vpop.permute.xlu0 %2723  ;;  %vm1320_vm2 = vcmp.eq.s32.totalorder %v6554_v0, %v7755_v15 }
 0x1d0   : > { %5085 = vmatprep.mubr.msk.f32.mxu1 %vm1313_vm4, %v9928_v30  ;;  %3823 = vmatpush1.msra.mxu1 %v5880_v33  ;;  %v1818_v29 = vpop.f32.mrf.mxu1  ;;  %v5881_v33 = vld [vmem:[%s9900_s1 + $0x120] sm:$0xff]  ;;  %v5130_v32 = vld [vmem:[%s6150_s3 + $0x1c8] sm:$0xff]  ;;  %vm2536_vm4 = vcmp.eq.s32.totalorder %v6559_v7, %v8115_v2 }
 0x1d1   : > { %5766 = vset.pattern.permute.xlu1 %v9930_v17  ;;  %3824 = vmatprep.subr.mxu1 %v9931_v16  ;;  %v8130_v13 = vpop.f32.mrf.mxu0 }
 0x1d2   : > { %2498 = vperm.xlu1 %5766, %v5129_v14   ;;  %5400 = vmatmul.mubr.msk.f32.gmra.mxu0 %vm2527_vm3, %v9928_v30  ;;  %9933 = vst [vmem:[#allocation18_spill] sm:$0xff] %v8130_v13  ;;  %v8139_v36 = vpop.f32.mrf.mxu1  ;;  %vm2533_vm3 = vcmp.eq.s32.totalorder %v6554_v0, %v8085_v1 }
 0x1d3   : > { %3825 = vmatpush1.msra.mxu1 %v5881_v33  ;;  %5401 = vmatprep.mubr.msk.f32.mxu0 %vm2530_vm5, %v9928_v30  ;;  %v1678_v14 = vpop.f32.mrf.mxu0  ;;  %vm1323_vm5 = vcmp.eq.s32.totalorder %v6559_v7, %v7924_v26 }
 0x1d4   : > { %5086 = vmatmul.mubr.msk.f32.gmra.mxu1 %vm1312_vm6, %v9928_v30  ;;  %3826 = vmatprep.subr.mxu1 %v9931_v16  ;;  %v1823_v33 = vpop.f32.mrf.mxu1  ;;  %vm1322_vm6 = vcmp.eq.s32.totalorder %v6554_v0, %v7924_v26 }
 0x1d5   : > { %5087 = vmatprep.mubr.msk.f32.mxu1 %vm1315_vm7, %v9928_v30  ;;  %3827 = vmatpush1.msra.mxu1 %v5882_v43  ;;  %v8151_v29 = vpop.permute.xlu1 %2735  ;;  %v8154_v13 = vpop.f32.mrf.mxu0  ;;  %vm2535_vm7 = vcmp.eq.s32.totalorder %v6554_v0, %v8115_v2  ;;  %v1772_v2 = vadd.f32 %v7914_v31, %v7532_v63 }
 0x1d6   : > { %3828 = vmatprep.subr.mxu1 %v9931_v16  ;;  %2501 = vperm.xlu1 %5766, %v5130_v32   ;;  %9934 = vst [vmem:[#allocation19_spill] sm:$0xff] %v8154_v13  ;;  %v2442_v43 = vpop.permute.xlu0 %2441  ;;  %v1752_v13 = vadd.f32 %v7812_v38, %v7459_v25  ;;  %v5131_v38 = vld [vmem:[%s6150_s3 + $0x1d0] sm:$0xff] }
 0x1d7   : > { %5402 = vmatmul.mubr.msk.f32.gmra.mxu0 %vm2529_vm8, %v9928_v30  ;;  %3829 = vmatpush1.msra.mxu1 %v5883_v12  ;;  %v8162_v14 = vpop.f32.mrf.mxu1  ;;  %v1683_v33 = vpop.f32.mrf.mxu0  ;;  %vm2532_vm12 = vcmp.eq.s32.totalorder %v6559_v7, %v2442_v43  ;;  %vm2531_vm15 = vcmp.eq.s32.totalorder %v6554_v0, %v2442_v43  ;;  %v5889_v43 = vld [vmem:[%s9900_s1 + $0x1e0] sm:$0xff]  ;;  %vm1325_vm8 = vcmp.eq.s32.totalorder %v6559_v7, %v7773_v23 }
 0x1d8   : > { %5088 = vmatmul.mubr.msk.f32.gmra.mxu1 %vm1314_vm9, %v9928_v30  ;;  %3830 = vmatprep.subr.mxu1 %v9931_v16  ;;  %v5885_v33 = vld [vmem:[%s9900_s1 + $0x100] sm:$0xff]  ;;  %vm1324_vm9 = vcmp.eq.s32.totalorder %v6554_v0, %v7773_v23 }
 0x1d9   : > { %5089 = vmatprep.mubr.msk.f32.mxu1 %vm1317_vm10, %v9928_v30  ;;  %3831 = vmatpush1.msra.mxu1 %v5884_v6  ;;  %v1828_v12 = vpop.f32.mrf.mxu1  ;;  %vm1327_vm10 = vcmp.eq.s32.totalorder %v6559_v7, %v7957_v54  ;;  %v5893_v23 = vld [vmem:[%s9900_s1 + $0x1c0] sm:$0xff] }
 0x1da   : > { %3832 = vmatprep.subr.mxu1 %v9931_v16  ;;  %5768 = vset.pattern.permute.xlu1 %v9926_v37  ;;  %v8176_v20 = vpop.permute.xlu1 %2738  ;;  %v1976_v25 = vpop.f32.mrf.mxu0 }
 0x1db   : > { %3833 = vmatpush1.msra.mxu1 %v5885_v33  ;;  %2789 = vperm.xlu1 %5768, %v5130_v32   ;;  %v8184_v6 = vpop.f32.mrf.mxu1  ;;  %v8191_v5 = vadd.f32 %v1976_v25, %v1752_v13  ;;  %v5886_v32 = vld [vmem:[%s9900_s1 + $0x1f8] sm:$0xff]  ;;  %v5887_v13 = vld [vmem:[%s9900_s1 + $0x1f0] sm:$0xff]  ;;  %v2451_v63 = vpop.permute.xlu0 %2450 }
 0x1dc   : > { %5090 = vmatmul.mubr.msk.f32.gmra.mxu1 %vm1316_vm11, %v9928_v30  ;;  %3834 = vmatprep.subr.mxu1 %v9931_v16  ;;  %v1978_v33 = vpop.f32.mrf.mxu0  ;;  %vm1326_vm11 = vcmp.eq.s32.totalorder %v6554_v0, %v7957_v54 }
 0x1dd   : > { %5091 = vmatprep.mubr.msk.f32.mxu1 %vm1319_vm13, %v9928_v30  ;;  %3835 = vmatpush2.msra.mxu1 %v5886_v32  ;;  %v1833_v12 = vpop.f32.mrf.mxu1  ;;  %v5888_v33 = vld [vmem:[%s9900_s1 + $0x1e8] sm:$0xff]  ;;  %vm1329_vm13 = vcmp.eq.s32.totalorder %v6559_v7, %v7799_v58 }
 0x1de   : > { %3836 = vmatprep.subr.mxu1 %v9931_v16  ;;  %5403 = vmatprep.mubr.msk.f32.mxu0 %vm2532_vm12, %v9928_v30  ;;  %v1981_v32 = vpop.f32.mrf.mxu0  ;;  %vm2538_vm12 = vcmp.eq.s32.totalorder %v6559_v7, %v2451_v63 }
 0x1df   : > { %3837 = vmatpush2.msra.mxu1 %v5887_v13  ;;  %2792 = vperm.xlu1 %5768, %v5131_v38   ;;  %v8207_v25 = vpop.f32.mrf.mxu1  ;;  %v8215_v55 = vadd.f32 %v1981_v32, %v1757_v4  ;;  %v1762_v4 = vadd.f32 %v7864_v44, %v7493_v46  ;;  %v8232_v13 = vld [vmem:[%s6150_s3 + $0x1e8] sm:$0xff] }
 0x1e0   : > { %5092 = vmatmul.mubr.msk.f32.gmra.mxu1 %vm1318_vm14, %v9928_v30  ;;  %3838 = vmatprep.subr.mxu1 %v9931_v16  ;;  %v8213_v57 = vpop.permute.xlu1 %2453  ;;  %v1983_v12 = vpop.f32.mrf.mxu0  ;;  %vm2537_vm14 = vcmp.eq.s32.totalorder %v6554_v0, %v2451_v63  ;;  %v1782_v63 = vadd.f32 %v7954_v10, %v7570_v22  ;;  %v5135_v22 = vld [vmem:[%s6150_s3 + $0x1f0] sm:$0xff] }
 0x1e1   : > { %2504 = vperm.xlu0 %5767, %v5131_v38   ;;  %5093 = vmatprep.mubr.msk.f32.mxu1 %vm1321_vm0, %v9928_v30  ;;  %v1838_v49 = vpop.f32.mrf.mxu1  ;;  %v5132_v38 = vld [vmem:[%s6150_s3 + $0x1d8] sm:$0xff]  ;;  %vm1328_vm0 = vcmp.eq.s32.totalorder %v6554_v0, %v7799_v58 }
 0x1e2   : > { %5404 = vmatmul.mubr.msk.f32.gmra.mxu0 %vm2531_vm15, %v9928_v30  ;;  %3839 = vmatpush2.msra.mxu1 %v5888_v33  ;;  %v1986_v44 = vpop.f32.mrf.mxu0  ;;  %v1767_v33 = vadd.f32 %v7888_v39, %v7514_v50  ;;  %vm2540_vm15 = vcmp.eq.s32.totalorder %v6559_v7, %v8213_v57 }
 0x1e3   : > { %3840 = vmatprep.subr.mxu1 %v9931_v16  ;;  %5769 = vset.pattern.permute.xlu1 %v9930_v17  ;;  %v8234_v32 = vpop.f32.mrf.mxu1  ;;  %v8253_v15 = vadd.f32 %v1986_v44, %v1762_v4  ;;  %v5133_v4 = vld [vmem:[%s6150_s3 + $0x1e0] sm:$0xff]  ;;  %v5890_v44 = vld [vmem:[%s9900_s1 + $0x1d8] sm:$0xff]  ;;  %v8328_v54 = vpop.permute.xlu0 %2732 }
 0x1e4   : > { %3841 = vmatpush2.msra.mxu1 %v5889_v43  ;;  %5405 = vmatprep.mubr.msk.f32.mxu0 %vm2534_vm1, %v9928_v30  ;;  %v8247_v46 = vpop.permute.xlu1 %2456  ;;  %v1988_v12 = vpop.f32.mrf.mxu0  ;;  %vm1331_vm1 = vcmp.eq.s32.totalorder %v6559_v7, %v7997_v24 }
 0x1e5   : > { %5094 = vmatmul.mubr.msk.f32.gmra.mxu1 %vm1320_vm2, %v9928_v30  ;;  %3842 = vmatprep.subr.mxu1 %v9931_v16  ;;  %v1843_v49 = vpop.f32.mrf.mxu1  ;;  %vm2539_vm2 = vcmp.eq.s32.totalorder %v6554_v0, %v8213_v57 }
 0x1e6   : > { %2507 = vperm.xlu1 %5769, %v5132_v38   ;;  %2513 = vperm.xlu0 %5767, %v8232_v13   ;;  %v1991_v50 = vpop.f32.mrf.mxu0  ;;  %v5891_v49 = vld [vmem:[%s9900_s1 + $0x1d0] sm:$0xff] }
 0x1e7   : > { %5095 = vmatprep.mubr.msk.f32.mxu1 %vm1323_vm5, %v9928_v30  ;;  %5406 = vmatmul.mubr.msk.f32.gmra.mxu0 %vm2533_vm3, %v9928_v30  ;;  %v8266_v43 = vpop.f32.mrf.mxu1  ;;  %v8280_v1 = vadd.f32 %v1991_v50, %v1767_v33  ;;  %v8366_v10 = vpop.permute.xlu0 %2741  ;;  %vm2542_vm3 = vcmp.eq.s32.totalorder %v6559_v7, %v8247_v46  ;;  %vm2541_vm5 = vcmp.eq.s32.totalorder %v6554_v0, %v8247_v46 }
 0x1e8   : > { %3843 = vmatpush2.msra.mxu1 %v5890_v44  ;;  %5407 = vmatprep.mubr.msk.f32.mxu0 %vm2536_vm4, %v9928_v30  ;;  %v1993_v12 = vpop.f32.mrf.mxu0  ;;  %v5892_v44 = vld [vmem:[%s9900_s1 + $0x1c8] sm:$0xff]  ;;  %vm1330_vm4 = vcmp.eq.s32.totalorder %v6554_v0, %v7997_v24 }
 0x1e9   : > { %3844 = vmatprep.subr.mxu1 %v9931_v16  ;;  %5096 = vmatmul.mubr.msk.f32.gmra.mxu1 %vm1322_vm6, %v9928_v30  ;;  %v8278_v39 = vpop.permute.xlu1 %2744  ;;  %v1848_v26 = vpop.f32.mrf.mxu1  ;;  %v1777_v12 = vadd.f32 %v7937_v9, %v7553_v8  ;;  %v5895_v9 = vld [vmem:[%s9900_s1 + $0x1b0] sm:$0xff]  ;;  %vm2810_vm6 = vcmp.eq.s32.totalorder %v6559_v7, %v8098_v28 }
 0x1ea   : > { %3845 = vmatpush2.msra.mxu1 %v5891_v49  ;;  %2510 = vperm.xlu1 %5769, %v5133_v4  }
 0x1eb   : > { %3846 = vmatprep.subr.mxu1 %v9931_v16  ;;  %5771 = vset.pattern.permute.xlu0 %v9926_v37  ;;  %v8293_v33 = vpop.f32.mrf.mxu1 }
 0x1ec   : > { %5097 = vmatprep.mubr.msk.f32.mxu1 %vm1325_vm8, %v9928_v30  ;;  %5408 = vmatmul.mubr.msk.f32.gmra.mxu0 %vm2535_vm7, %v9928_v30  ;;  %vm2809_vm7 = vcmp.eq.s32.totalorder %v6554_v0, %v8098_v28  ;;  %v9935_v28 = vmov 2  }
 0x1ed   : > { %3847 = vmatpush2.msra.mxu1 %v5892_v44  ;;  %2795 = vperm.xlu0 %5771, %v5132_v38   ;;  %v8300_v50 = vpop.permute.xlu1 %2747  ;;  %v1996_v26 = vpop.f32.mrf.mxu0 }
 0x1ee   : > { %3848 = vmatprep.subr.mxu1 %v9931_v16  ;;  %5098 = vmatmul.mubr.msk.f32.gmra.mxu1 %vm1324_vm9, %v9928_v30  ;;  %v8304_v31 = vadd.f32 %v1996_v26, %v1772_v2  ;;  %v1853_v49 = vpop.f32.mrf.mxu1  ;;  %v5894_v2 = vld [vmem:[%s9900_s1 + $0x1b8] sm:$0xff]  ;;  %vm2812_vm9 = vcmp.eq.s32.totalorder %v6559_v7, %v7897_v62 }
 0x1ef   : > { %3849 = vmatpush2.msra.mxu1 %v5893_v23  ;;  %5770 = vset.pattern.permute.xlu1 %v9926_v37  ;;  %v1998_v38 = vpop.f32.mrf.mxu0 }
 0x1f0   : > { %3850 = vmatprep.subr.mxu1 %v9931_v16  ;;  %5099 = vmatprep.mubr.msk.f32.mxu1 %vm1327_vm10, %v9928_v30  ;;  %v5896_v38 = vld [vmem:[%s9900_s1 + $0x1a8] sm:$0xff] }
 0x1f1   : > { %3851 = vmatpush2.msra.mxu1 %v5894_v2  ;;  %2798 = vperm.xlu1 %5770, %v5133_v4   ;;  %v8322_v44 = vpop.f32.mrf.mxu1  ;;  %v5897_v2 = vld [vmem:[%s9900_s1 + $0x1a0] sm:$0xff] }
 0x1f2   : > { %3852 = vmatprep.subr.mxu1 %v9931_v16  ;;  %5100 = vmatmul.mubr.msk.f32.gmra.mxu1 %vm1326_vm11, %v9928_v30  ;;  %v2001_v8 = vpop.f32.mrf.mxu0 }
 0x1f3   : > { %3853 = vmatpush2.msra.mxu1 %v5895_v9  ;;  %5101 = vmatprep.mubr.msk.f32.mxu1 %vm1329_vm13, %v9928_v30  ;;  %v8335_v4 = vpop.permute.xlu1 %2462  ;;  %v8337_v26 = vadd.f32 %v2001_v8, %v1777_v12  ;;  %v1858_v49 = vpop.f32.mrf.mxu1  ;;  %vm2814_vm13 = vcmp.eq.s32.totalorder %v6559_v7, %v7935_v59 }
 0x1f4   : > { %3854 = vmatprep.subr.mxu1 %v9931_v16  ;;  %5409 = vmatprep.mubr.msk.f32.mxu0 %vm2538_vm12, %v9928_v30  ;;  %v2003_v23 = vpop.f32.mrf.mxu0  ;;  %v5898_v49 = vld [vmem:[%s9900_s1 + $0x198] sm:$0xff]  ;;  %vm2546_vm11 = vcmp.eq.s32.totalorder %v6559_v7, %v8335_v4  ;;  %vm2811_vm12 = vcmp.eq.s32.totalorder %v6554_v0, %v7897_v62 }
 0x1f5   : > { %3855 = vmatpush2.msra.mxu1 %v5896_v38  ;;  %2801 = vperm.xlu1 %5770, %v8232_v13   ;;  %v1787_v38 = vadd.f32 %v7984_v18, %v7594_v34 }
 0x1f6   : > { %3856 = vmatprep.subr.mxu1 %v9931_v16  ;;  %5410 = vmatmul.mubr.msk.f32.gmra.mxu0 %vm2537_vm14, %v9928_v30  ;;  %v8351_v12 = vpop.f32.mrf.mxu1  ;;  %vm2545_vm14 = vcmp.eq.s32.totalorder %v6554_v0, %v8335_v4  ;;  %v5904_v4 = vld [vmem:[%s9900_s1 + $0x278] sm:$0xff] }
 0x1f7   : > { %3857 = vmatpush2.msra.mxu1 %v5897_v2  ;;  %5411 = vmatprep.mubr.msk.f32.mxu0 %vm2540_vm15, %v9928_v30  ;;  %v8359_v13 = vpop.permute.xlu1 %2465  ;;  %v2006_v8 = vpop.f32.mrf.mxu0 }
 0x1f8   : > { %5102 = vmatmul.mubr.msk.f32.gmra.mxu1 %vm1328_vm0, %v9928_v30  ;;  %3858 = vmatprep.subr.mxu1 %v9931_v16  ;;  %v8368_v58 = vadd.f32 %v2006_v8, %v1782_v63  ;;  %v1863_v9 = vpop.f32.mrf.mxu1  ;;  %v5136_v63 = vld [vmem:[%s6150_s3 + $0x1f8] sm:$0xff]  ;;  %v5900_v8 = vld [vmem:[%s9900_s1 + $0x188] sm:$0xff]  ;;  %vm2548_vm15 = vcmp.eq.s32.totalorder %v6559_v7, %v8359_v13  ;;  %vm2816_vm0 = vcmp.eq.s32.totalorder %v6559_v7, %v8128_v21 }
 0x1f9   : > { %5103 = vmatprep.mubr.msk.f32.mxu1 %vm1331_vm1, %v9928_v30  ;;  %3859 = vmatpush2.msra.mxu1 %v5898_v49  ;;  %v2008_v23 = vpop.f32.mrf.mxu0  ;;  %v1792_v49 = vadd.f32 %v8008_v52, %v7621_v53  ;;  %v5902_v52 = vld [vmem:[%s6150_s3 + $0x100] sm:$0xff]  ;;  %vm2813_vm1 = vcmp.eq.s32.totalorder %v6554_v0, %v7935_v59  ;;  %v1802_v59 = vadd.f32 %v8048_v48, %v7660_v51 }
 0x1fa   : > { %5772 = vset.pattern.permute.xlu1 %v9930_v17  ;;  %3860 = vmatprep.subr.mxu1 %v9931_v16  ;;  %v5899_v17 = vld [vmem:[%s9900_s1 + $0x190] sm:$0xff]  ;;  %v5901_v23 = vld [vmem:[%s9900_s1 + $0x180] sm:$0xff] }
 0x1fb   : > { %2516 = vperm.xlu1 %5772, %v5135_v22   ;;  %2804 = vperm.xlu0 %5771, %v5135_v22   ;;  %v8382_v57 = vpop.f32.mrf.mxu1  ;;  %v2460_v22 = vpop.permute.xlu0 %2459 }
 0x1fc   : > { %5412 = vmatmul.mubr.msk.f32.gmra.mxu0 %vm2539_vm2, %v9928_v30  ;;  %3861 = vmatpush2.msra.mxu1 %v5899_v17  ;;  %v2011_v2 = vpop.f32.mrf.mxu0  ;;  %vm2544_vm8 = vcmp.eq.s32.totalorder %v6559_v7, %v2460_v22  ;;  %vm2543_vm10 = vcmp.eq.s32.totalorder %v6554_v0, %v2460_v22  ;;  %vm2547_vm2 = vcmp.eq.s32.totalorder %v6554_v0, %v8359_v13 }
 0x1fd   : > { %5104 = vmatmul.mubr.msk.f32.gmra.mxu1 %vm1330_vm4, %v9928_v30  ;;  %3862 = vmatprep.subr.mxu1 %v9931_v16  ;;  %v8395_v34 = vpop.permute.xlu1 %2753  ;;  %v8397_v18 = vadd.f32 %v2011_v2, %v1787_v38  ;;  %v1868_v24 = vpop.f32.mrf.mxu1 }
 0x1fe   : > { %3863 = vmatpush2.msra.mxu1 %v5900_v8  ;;  %5413 = vmatprep.mubr.msk.f32.mxu0 %vm2542_vm3, %v9928_v30  ;;  %v2013_v9 = vpop.f32.mrf.mxu0  ;;  %v1797_v8 = vadd.f32 %v8033_v3, %v7640_v35  ;;  %v9936_v35 = vmov 3   ;;  %vm2815_vm3 = vcmp.eq.s32.totalorder %v6554_v0, %v8128_v21 }
 0x1ff   : > { %3864 = vmatprep.subr.mxu1 %v9931_v16  ;;  %2519 = vperm.xlu1 %5772, %v5136_v63   ;;  %v5903_v9 = vld [vmem:[%s6150_s3 + $0x108] sm:$0xff] }
 0x200   : > { %5414 = vmatmul.mubr.msk.f32.gmra.mxu0 %vm2541_vm5, %v9928_v30  ;;  %3865 = vmatpush2.msra.mxu1 %v5901_v23  ;;  %v8420_v38 = vpop.f32.mrf.mxu1  ;;  %v2469_v23 = vpop.permute.xlu0 %2468  ;;  %vm2818_vm5 = vcmp.eq.s32.totalorder %v6559_v7, %v8031_v42 }
 0x201   : > { %5457 = vmatprep.mubr.msk.f32.mxu1 %vm2810_vm6, %v9928_v30  ;;  %5774 = vset.pattern.permute.xlu0 %v9935_v28  ;;  %v8425_v17 = vpop.permute.xlu1 %2756  ;;  %v2016_v53 = vpop.f32.mrf.mxu0  ;;  %vm2550_vm4 = vcmp.eq.s32.totalorder %v6559_v7, %v2469_v23  ;;  %vm2549_vm6 = vcmp.eq.s32.totalorder %v6554_v0, %v2469_v23  ;;  %v8524_v23 = vld [vmem:[%s6150_s3 + $0x130] sm:$0xff] }
 0x202   : > { %5458 = vmatmul.mubr.msk.f32.vlgmr.msra.gmra.mxu1 %vm2809_vm7, %v9928_v30  ;;  %3002 = vperm.xlu0 %5774, %v5902_v52   ;;  %v8432_v46 = vadd.f32 %v2016_v53, %v1792_v49  ;;  %v1873_v2 = vpop.f32.mrf.mxu1  ;;  %vm2817_vm7 = vcmp.eq.s32.totalorder %v6554_v0, %v8031_v42 }
 0x203   : > { %5459 = vmatprep.mubr.msk.f32.mxu1 %vm2812_vm9, %v9928_v30  ;;  %5773 = vset.pattern.permute.xlu1 %v9926_v37  ;;  %v2018_v24 = vpop.f32.mrf.mxu0  ;;  %vm2820_vm9 = vcmp.eq.s32.totalorder %v6559_v7, %v8056_v40 }
 0x204   : > { %2807 = vperm.xlu1 %5773, %v5136_v63   ;;  %5415 = vmatprep.mubr.msk.f32.mxu0 %vm2544_vm8, %v9928_v30  ;;  %v1807_v24 = vadd.f32 %v8071_v47, %v7685_v60 }
 0x205   : > { %5416 = vmatmul.mubr.msk.f32.gmra.mxu0 %vm2543_vm10, %v9928_v30  ;;  %v8444_v22 = vpop.f32.mrf.mxu1  ;;  %4027 = vmatprep.subr.mxu0 %v9931_v16 }
 0x206   : > { %5460 = vmatmul.mubr.msk.f32.gmra.mxu1 %vm2811_vm12, %v9928_v30  ;;  %5417 = vmatprep.mubr.msk.f32.mxu0 %vm2546_vm11, %v9928_v30  ;;  %v2021_v62 = vpop.f32.mrf.mxu0  ;;  %vm2822_vm11 = vcmp.eq.s32.totalorder %v6559_v7, %v8328_v54  ;;  %vm2819_vm12 = vcmp.eq.s32.totalorder %v6554_v0, %v8056_v40 }
 0x207   : > { %5461 = vmatprep.mubr.msk.f32.mxu1 %vm2814_vm13, %v9928_v30  ;;  %5777 = vset.pattern.permute.xlu0 %v9936_v35  ;;  %v8457_v37 = vpop.permute.xlu1 %2471  ;;  %v8459_v3 = vadd.f32 %v2021_v62, %v1797_v8  ;;  %v1878_v63 = vpop.f32.mrf.mxu1  ;;  %v5905_v8 = vld [vmem:[%s6150_s3 + $0x118] sm:$0xff] }
 0x208   : > { %5775 = vset.pattern.permute.xlu1 %v9936_v35  ;;  %3293 = vperm.xlu0 %5777, %v5903_v9   ;;  %v2023_v49 = vpop.f32.mrf.mxu0  ;;  %vm2552_vm8 = vcmp.eq.s32.totalorder %v6559_v7, %v8457_v37  ;;  %vm2551_vm10 = vcmp.eq.s32.totalorder %v6554_v0, %v8457_v37 }
 0x209   : > { %3290 = vperm.xlu1 %5775, %v5902_v52   ;;  %5418 = vmatmul.mubr.msk.f32.gmra.mxu0 %vm2545_vm14, %v9928_v30  ;;  %v5907_v49 = vld [vmem:[%s6150_s3 + $0x110] sm:$0xff] }
 0x20a   : > { %5462 = vmatmul.mubr.msk.f32.gmra.mxu1 %vm2813_vm1, %v9928_v30  ;;  %5419 = vmatprep.mubr.msk.f32.mxu0 %vm2548_vm15, %v9928_v30  ;;  %v8475_v53 = vpop.f32.mrf.mxu1  ;;  %vm2821_vm15 = vcmp.eq.s32.totalorder %v6554_v0, %v8328_v54  ;;  %v5911_v54 = vld [vmem:[%s9900_s1 + $0x268] sm:$0xff] }
 0x20b   : > { %5463 = vmatprep.mubr.msk.f32.mxu1 %vm2816_vm0, %v9928_v30  ;;  %4028 = vmatpush1.msra.mxu0 %v5904_v4  ;;  %v2475_v51 = vpop.permute.xlu1 %2474  ;;  %vm2824_vm0 = vcmp.eq.s32.totalorder %v6559_v7, %v8151_v29 }
 0x20c   : > { %5779 = vset.pattern.permute.xlu0 %v9935_v28  ;;  %v2026_v13 = vpop.f32.mrf.mxu0  ;;  %4029 = vmatprep.subr.mxu0 %v9931_v16  ;;  %v1883_v21 = vpop.f32.mrf.mxu1  ;;  %vm2554_vm13 = vcmp.eq.s32.totalorder %v6559_v7, %v2475_v51  ;;  %vm2553_vm14 = vcmp.eq.s32.totalorder %v6554_v0, %v2475_v51 }
 0x20d   : > { %5776 = vset.pattern.permute.xlu1 %v9935_v28  ;;  %5420 = vmatmul.mubr.msk.f32.gmra.mxu0 %vm2547_vm2, %v9928_v30  ;;  %v8490_v48 = vadd.f32 %v2026_v13, %v1802_v59  ;;  %v8496_v52 = vpop.permute.xlu0 %2750  ;;  %v1812_v13 = vadd.f32 %v8095_v56, %v7709_v27 }
 0x20e   : > { %5464 = vmatmul.mubr.msk.f32.gmra.mxu1 %vm2815_vm3, %v9928_v30  ;;  %3005 = vperm.xlu1 %5776, %v5903_v9   ;;  %v2028_v2 = vpop.f32.mrf.mxu0  ;;  %v8502_v62 = vpop.f32.mrf.mxu1  ;;  %v5906_v9 = vld [vmem:[%s9900_s1 + $0x270] sm:$0xff]  ;;  %vm2823_vm3 = vcmp.eq.s32.totalorder %v6554_v0, %v8151_v29 }
 0x20f   : > { %5465 = vmatprep.mubr.msk.f32.mxu1 %vm2818_vm5, %v9928_v30  ;;  %3011 = vperm.xlu0 %5779, %v5905_v8   ;;  %v5909_v2 = vld [vmem:[%s9900_s1 + $0x378] sm:$0xff]  ;;  %vm2828_vm5 = vcmp.eq.s32.totalorder %v6559_v7, %v8366_v10 }
 0x210   : > { %5421 = vmatprep.mubr.msk.f32.mxu0 %vm2550_vm4, %v9928_v30  ;;  %v2031_v63 = vpop.f32.mrf.mxu0  ;;  %4030 = vmatpush1.msra.mxu0 %v5906_v9  ;;  %v1888_v47 = vpop.f32.mrf.mxu1  ;;  %vm2826_vm4 = vcmp.eq.s32.totalorder %v6559_v7, %v8176_v20 }
 0x211   : > { %5422 = vmatmul.mubr.msk.f32.gmra.mxu0 %vm2549_vm6, %v9928_v30  ;;  %v8513_v60 = vadd.f32 %v2031_v63, %v1807_v24  ;;  %4031 = vmatprep.subr.mxu0 %v9931_v16  ;;  %v8527_v59 = vpop.permute.xlu1 %2762  ;;  %v1817_v24 = vadd.f32 %v8117_v41, %v7736_v11  ;;  %v5910_v63 = vld [vmem:[%s6150_s3 + $0x120] sm:$0xff] }
 0x212   : > { %5466 = vmatmul.mubr.msk.f32.gmra.mxu1 %vm2817_vm7, %v9928_v30  ;;  %3008 = vperm.xlu1 %5776, %v5907_v49   ;;  %v2033_v42 = vpop.f32.mrf.mxu0  ;;  %v8529_v4 = vpop.f32.mrf.mxu1 }
 0x213   : > { %5467 = vmatprep.mubr.msk.f32.mxu1 %vm2820_vm9, %v9928_v30  ;;  %3020 = vperm.xlu0 %5779, %v8524_v23   ;;  %vm2827_vm9 = vcmp.eq.s32.totalorder %v6554_v0, %v8366_v10 }
 0x214   : > { %5423 = vmatprep.mubr.msk.f32.mxu0 %vm2552_vm8, %v9928_v30  ;;  %v8539_v21 = vpop.permute.xlu0 %2759  ;;  %4252 = vmatprep.subr.mxu1 %v9931_v16  ;;  %v1893_v56 = vpop.f32.mrf.mxu1  ;;  %vm2825_vm8 = vcmp.eq.s32.totalorder %v6554_v0, %v8176_v20  ;;  %v8627_v20 = vld [vmem:[%s6150_s3 + $0x148] sm:$0xff] }
 0x215   : > { %5424 = vmatmul.mubr.msk.f32.gmra.mxu0 %vm2551_vm10, %v9928_v30  ;;  %v2036_v27 = vpop.f32.mrf.mxu0  ;;  %4253 = vmatpush1.msra.mxu1 %v5909_v2 }
 0x216   : > { %5468 = vmatmul.mubr.msk.f32.gmra.mxu1 %vm2819_vm12, %v9928_v30  ;;  %5778 = vset.pattern.permute.xlu1 %v9936_v35  ;;  %v8552_v37 = vadd.f32 %v2036_v27, %v1812_v13  ;;  %v8568_v9 = vpop.permute.xlu1 %2765  ;;  %v1822_v13 = vadd.f32 %v8139_v36, %v7757_v19  ;;  %v8589_v27 = vld [vmem:[%s6150_s3 + $0x138] sm:$0xff]  ;;  %vm2830_vm12 = vcmp.eq.s32.totalorder %v6559_v7, %v8278_v39 }
 0x217   : > { %3296 = vperm.xlu1 %5778, %v5907_v49   ;;  %5469 = vmatprep.mubr.msk.f32.mxu1 %vm2822_vm11, %v9928_v30  ;;  %v2038_v40 = vpop.f32.mrf.mxu0 }
 0x218   : > { %5782 = vset.pattern.permute.xlu0 %v9936_v35  ;;  %5425 = vmatprep.mubr.msk.f32.mxu0 %vm2554_vm13, %v9928_v30  ;;  %v8564_v51 = vpop.f32.mrf.mxu1  ;;  %v5913_v40 = vld [vmem:[%s9900_s1 + $0x260] sm:$0xff] }
 0x219   : > { %3302 = vperm.xlu0 %5782, %v5910_v63   ;;  %5426 = vmatmul.mubr.msk.f32.gmra.mxu0 %vm2553_vm14, %v9928_v30  ;;  %v2041_v47 = vpop.f32.mrf.mxu0 }
 0x21a   : > { %5470 = vmatmul.mubr.msk.f32.gmra.mxu1 %vm2821_vm15, %v9928_v30  ;;  %v8573_v11 = vadd.f32 %v2041_v47, %v1817_v24  ;;  %v1898_v41 = vpop.f32.mrf.mxu1  ;;  %4032 = vmatpush1.msra.mxu0 %v5911_v54  ;;  %v1827_v24 = vadd.f32 %v8162_v14, %v7775_v61  ;;  %v5915_v61 = vld [vmem:[%s6150_s3 + $0x128] sm:$0xff]  ;;  %vm2829_vm15 = vcmp.eq.s32.totalorder %v6554_v0, %v8278_v39 }
 0x21b   : > { %5471 = vmatprep.mubr.msk.f32.mxu1 %vm2824_vm0, %v9928_v30  ;;  %3299 = vperm.xlu1 %5778, %v5905_v8   ;;  %v2478_v49 = vpop.permute.xlu0 %2477  ;;  %v2043_v42 = vpop.f32.mrf.mxu0  ;;  %vm2832_vm0 = vcmp.eq.s32.totalorder %v6559_v7, %v8300_v50 }
 0x21c   : > { %vm2555_vm1 = vcmp.eq.s32.totalorder %v6554_v0, %v2478_v49  ;;  %vm2556_vm2 = vcmp.eq.s32.totalorder %v6559_v7, %v2478_v49  ;;  %4033 = vmatprep.subr.mxu0 %v9931_v16  ;;  %4254 = vmatprep.subr.mxu1 %v9931_v16 }
 0x21d   : > { %5427 = vmatprep.mubr.msk.f32.mxu0 %vm2556_vm2, %v9928_v30  ;;  %3311 = vperm.xlu0 %5782, %v8589_v27   ;;  %v8592_v8 = vpop.f32.mrf.mxu1  ;;  %vm2831_vm2 = vcmp.eq.s32.totalorder %v6554_v0, %v8300_v50 }
 0x21e   : > { %5472 = vmatmul.mubr.msk.f32.gmra.mxu1 %vm2823_vm3, %v9928_v30  ;;  %5428 = vmatmul.mubr.msk.f32.gmra.mxu0 %vm2555_vm1, %v9928_v30  ;;  %v2046_v56 = vpop.f32.mrf.mxu0  ;;  %vm2834_vm1 = vcmp.eq.s32.totalorder %v6559_v7, %v8496_v52  ;;  %vm2833_vm3 = vcmp.eq.s32.totalorder %v6554_v0, %v8496_v52 }
 0x21f   : > { %5473 = vmatprep.mubr.msk.f32.mxu1 %vm2826_vm4, %v9928_v30  ;;  %5780 = vset.pattern.permute.xlu1 %v9935_v28  ;;  %v2481_v19 = vpop.permute.xlu1 %2480  ;;  %v8600_v36 = vadd.f32 %v2046_v56, %v1822_v13  ;;  %v1903_v29 = vpop.f32.mrf.mxu1  ;;  %v5916_v13 = vld [vmem:[%s9900_s1 + $0x258] sm:$0xff]  ;;  %v5917_v56 = vld [vmem:[%s9900_s1 + $0x370] sm:$0xff]  ;;  %vm2836_vm4 = vcmp.eq.s32.totalorder %v6559_v7, %v8395_v34 }
 0x220   : > { %3014 = vperm.xlu1 %5780, %v5910_v63   ;;  %vm2557_vm6 = vcmp.eq.s32.totalorder %v6554_v0, %v2481_v19  ;;  %vm2558_vm7 = vcmp.eq.s32.totalorder %v6559_v7, %v2481_v19  ;;  %v2048_v2 = vpop.f32.mrf.mxu0  ;;  %4034 = vmatpush1.msra.mxu0 %v5913_v40  ;;  %v1832_v19 = vadd.f32 %v8184_v6, %v7801_v45  ;;  %v8667_v40 = vld [vmem:[%s6150_s3 + $0x160] sm:$0xff] }
 0x221   : > { %5429 = vmatprep.mubr.msk.f32.mxu0 %vm2558_vm7, %v9928_v30  ;;  %5785 = vset.pattern.permute.xlu0 %v9935_v28 }
 0x222   : > { %5474 = vmatmul.mubr.msk.f32.gmra.mxu1 %vm2825_vm8, %v9928_v30  ;;  %5430 = vmatmul.mubr.msk.f32.gmra.mxu0 %vm2557_vm6, %v9928_v30  ;;  %v8618_v63 = vpop.f32.mrf.mxu1  ;;  %vm2838_vm6 = vcmp.eq.s32.totalorder %v6559_v7, %v8425_v17 }
 0x223   : > { %5475 = vmatprep.mubr.msk.f32.mxu1 %vm2828_vm5, %v9928_v30  ;;  %3029 = vperm.xlu0 %5785, %v8627_v20   ;;  %v2051_v47 = vpop.f32.mrf.mxu0  ;;  %vm2835_vm5 = vcmp.eq.s32.totalorder %v6554_v0, %v8395_v34  ;;  %v5926_v34 = vld [vmem:[%s6150_s3 + $0x140] sm:$0xff] }
 0x224   : > { %3017 = vperm.xlu1 %5780, %v5915_v61   ;;  %v2484_v14 = vpop.permute.xlu1 %2483  ;;  %v8631_v41 = vadd.f32 %v2051_v47, %v1827_v24  ;;  %v1908_v54 = vpop.f32.mrf.mxu1  ;;  %4035 = vmatprep.subr.mxu0 %v9931_v16  ;;  %v9937_v47 = vld [vmem:[#allocation5_spill] sm:$0xff] }
 0x225   : > { %vm2559_vm10 = vcmp.eq.s32.totalorder %v6554_v0, %v2484_v14  ;;  %vm2560_vm11 = vcmp.eq.s32.totalorder %v6559_v7, %v2484_v14  ;;  %v2487_v49 = vpop.permute.xlu0 %2486  ;;  %v2053_v42 = vpop.f32.mrf.mxu0  ;;  %4036 = vmatpush1.msra.mxu0 %v5916_v13  ;;  %4255 = vmatpush1.msra.mxu1 %v5917_v56  ;;  %v1837_v14 = vadd.f32 %v8207_v25, %v9937_v47  ;;  %v9938_v56 = vld [vmem:[#allocation6_spill] sm:$0xff] }
 0x226   : > { %5476 = vmatmul.mubr.msk.f32.gmra.mxu1 %vm2827_vm9, %v9928_v30  ;;  %5431 = vmatprep.mubr.msk.f32.mxu0 %vm2560_vm11, %v9928_v30  ;;  %vm2562_vm13 = vcmp.eq.s32.totalorder %v6559_v7, %v2487_v49  ;;  %vm2561_vm14 = vcmp.eq.s32.totalorder %v6554_v0, %v2487_v49  ;;  %v5919_v42 = vld [vmem:[%s9900_s1 + $0x250] sm:$0xff]  ;;  %v5922_v47 = vld [vmem:[%s9900_s1 + $0x248] sm:$0xff]  ;;  %vm2840_vm9 = vcmp.eq.s32.totalorder %v6559_v7, %v8539_v21 }
 0x227   : > { %5477 = vmatprep.mubr.msk.f32.mxu1 %vm2830_vm12, %v9928_v30  ;;  %5432 = vmatmul.mubr.msk.f32.gmra.mxu0 %vm2559_vm10, %v9928_v30  ;;  %v2201_v29 = vpop.f32.mrf.mxu1  ;;  %v2056_v2 = vpop.f32.mrf.mxu0  ;;  %vm2837_vm10 = vcmp.eq.s32.totalorder %v6554_v0, %v8425_v17  ;;  %vm2839_vm11 = vcmp.eq.s32.totalorder %v6554_v0, %v8539_v21 }
 0x228   : > { %5781 = vset.pattern.permute.xlu1 %v9936_v35  ;;  %v2202_v45 = vadd.f32 %v2201_v29, %v8191_v5  ;;  %5433 = vmatprep.mubr.msk.f32.mxu0 %vm2562_vm13, %v9928_v30  ;;  %v8662_v6 = vadd.f32 %v2056_v2, %v1832_v19  ;;  %v1842_v19 = vadd.f32 %v8234_v32, %v9938_v56  ;;  %v5921_v32 = vld [vmem:[%s9900_s1 + $0x368] sm:$0xff] }
 0x229   : > { %3305 = vperm.xlu1 %5781, %v5915_v61   ;;  %v2058_v10 = vpop.f32.mrf.mxu0  ;;  %3038 = vperm.xlu0 %5785, %v8667_v40   ;;  %v2203_v24 = vpop.f32.mrf.mxu1 }
 0x22a   : > { %5478 = vmatmul.mubr.msk.f32.gmra.mxu1 %vm2829_vm15, %v9928_v30  ;;  %v8675_v5 = vpop.permute.xlu1 %2771  ;;  %2360 = vst [vmem:[%s8678_s29] sm:$0xff] %v2202_v45  ;;  %4037 = vmatprep.subr.mxu0 %v9931_v16  ;;  %vm2841_vm15 = vcmp.eq.s32.totalorder %v6554_v0, %v8527_v59 }
 0x22b   : > { %5479 = vmatprep.mubr.msk.f32.mxu1 %vm2832_vm0, %v9928_v30  ;;  %5434 = vmatmul.mubr.msk.f32.gmra.mxu0 %vm2561_vm14, %v9928_v30  ;;  %v2061_v25 = vpop.f32.mrf.mxu0  ;;  %v2206_v39 = vpop.f32.mrf.mxu1  ;;  %vm2842_vm14 = vcmp.eq.s32.totalorder %v6559_v7, %v8527_v59  ;;  %vm2844_vm0 = vcmp.eq.s32.totalorder %v6559_v7, %v8568_v9 }
 0x22c   : > { %v8688_v61 = vadd.f32 %v2061_v25, %v1837_v14  ;;  %v2207_v54 = vadd.f32 %v2206_v39, %v8215_v55  ;;  %4256 = vmatprep.subr.mxu1 %v9931_v16  ;;  %4038 = vmatpush1.msra.mxu0 %v5919_v42  ;;  %v8704_v55 = vld [vmem:[%s6150_s3 + $0x150] sm:$0xff]  ;;  %v5923_v25 = vld [vmem:[%s9900_s1 + $0x360] sm:$0xff] }
 0x22d   : > { %3308 = vperm.xlu1 %5781, %v8524_v23   ;;  %v2063_v49 = vpop.f32.mrf.mxu0  ;;  %5788 = vset.pattern.permute.xlu0 %v9936_v35  ;;  %v2208_v13 = vpop.f32.mrf.mxu1 }
 0x22e   : > { %5480 = vmatmul.mubr.msk.f32.gmra.mxu1 %vm2831_vm2, %v9928_v30  ;;  %2361 = vst [vmem:[%s8678_s29 + $0x8] sm:$0xff] %v2207_v54  ;;  %3320 = vperm.xlu0 %5788, %v8704_v55   ;;  %v8716_v29 = vpop.permute.xlu1 %2774  ;;  %v5925_v54 = vld [vmem:[%s9900_s1 + $0x358] sm:$0xff]  ;;  %vm2843_vm2 = vcmp.eq.s32.totalorder %v6554_v0, %v8568_v9  ;;  %v5934_v9 = vld [vmem:[%s9900_s1 + $0x220] sm:$0xff] }
 0x22f   : > { %5481 = vmatprep.mubr.msk.f32.mxu1 %vm2834_vm1, %v9928_v30  ;;  %v2066_v50 = vpop.f32.mrf.mxu0  ;;  %v2211_v23 = vpop.f32.mrf.mxu1  ;;  %4257 = vmatpush1.msra.mxu1 %v5921_v32 }
 0x230   : > { %v8718_v2 = vadd.f32 %v2066_v50, %v1842_v19  ;;  %v2212_v45 = vadd.f32 %v2211_v23, %v8253_v15  ;;  %4039 = vmatprep.subr.mxu0 %v9931_v16  ;;  %4258 = vmatprep.subr.mxu1 %v9931_v16  ;;  %v9939_v15 = vld [vmem:[#allocation7_spill] sm:$0xff]  ;;  %v9940_v19 = vld [vmem:[#allocation8_spill] sm:$0xff] }
 0x231   : > { %5783 = vset.pattern.permute.xlu1 %v9935_v28  ;;  %v2068_v10 = vpop.f32.mrf.mxu0  ;;  %v2213_v24 = vpop.f32.mrf.mxu1  ;;  %4040 = vmatpush1.msra.mxu0 %v5922_v47  ;;  %v1847_v14 = vadd.f32 %v8266_v43, %v9939_v15  ;;  %v5924_v43 = vld [vmem:[%s9900_s1 + $0x240] sm:$0xff]  ;;  %v1852_v50 = vadd.f32 %v8293_v33, %v9940_v19  ;;  %v5927_v33 = vld [vmem:[%s9900_s1 + $0x350] sm:$0xff]  ;;  %v5928_v15 = vld [vmem:[%s9900_s1 + $0x238] sm:$0xff] }
 0x232   : > { %5482 = vmatmul.mubr.msk.f32.gmra.mxu1 %vm2833_vm3, %v9928_v30  ;;  %3023 = vperm.xlu1 %5783, %v8589_v27   ;;  %2362 = vst [vmem:[%s8678_s29 + $0x10] sm:$0xff] %v2212_v45 }
 0x233   : > { %5483 = vmatprep.mubr.msk.f32.mxu1 %vm2836_vm4, %v9928_v30  ;;  %4259 = vmatpush1.msra.mxu1 %v5923_v25 }
 0x234   : > { %v2071_v39 = vpop.f32.mrf.mxu0  ;;  %4041 = vmatprep.subr.mxu0 %v9931_v16  ;;  %4260 = vmatprep.subr.mxu1 %v9931_v16 }
 0x235   : > { %v8745_v52 = vadd.f32 %v2071_v39, %v1847_v14  ;;  %v2216_v27 = vpop.f32.mrf.mxu1  ;;  %4042 = vmatpush1.msra.mxu0 %v5924_v43  ;;  %4261 = vmatpush1.msra.mxu1 %v5925_v54  ;;  %v9941_v14 = vld [vmem:[#allocation9_spill] sm:$0xff] }
 0x236   : > { %5484 = vmatmul.mubr.msk.f32.gmra.mxu1 %vm2835_vm5, %v9928_v30  ;;  %3026 = vperm.xlu1 %5783, %v5926_v34   ;;  %v2490_v42 = vpop.permute.xlu1 %2489  ;;  %v2217_v49 = vadd.f32 %v2216_v27, %v8280_v1  ;;  %v2073_v13 = vpop.f32.mrf.mxu0  ;;  %v1857_v25 = vadd.f32 %v8322_v44, %v9941_v14 }
 0x237   : > { %5485 = vmatprep.mubr.msk.f32.mxu1 %vm2838_vm6, %v9928_v30  ;;  %vm2563_vm7 = vcmp.eq.s32.totalorder %v6554_v0, %v2490_v42  ;;  %vm2564_vm8 = vcmp.eq.s32.totalorder %v6559_v7, %v2490_v42  ;;  %v2218_v56 = vpop.f32.mrf.mxu1  ;;  %4043 = vmatprep.subr.mxu0 %v9931_v16  ;;  %v5931_v42 = vld [vmem:[%s9900_s1 + $0x340] sm:$0xff]  ;;  %vm2848_vm6 = vcmp.eq.s32.totalorder %v6559_v7, %v8675_v5 }
 0x238   : > { %5435 = vmatprep.mubr.msk.f32.mxu0 %vm2564_vm8, %v9928_v30  ;;  %2363 = vst [vmem:[%s8678_s29 + $0x18] sm:$0xff] %v2217_v49  ;;  %4262 = vmatprep.subr.mxu1 %v9931_v16  ;;  %v9942_v49 = vld [vmem:[#allocation10_spill] sm:$0xff]  ;;  %vm2850_vm8 = vcmp.eq.s32.totalorder %v6559_v7, %v8716_v29 }
 0x239   : > { %v8771_v1 = vpop.permute.xlu0 %2768  ;;  %5436 = vmatmul.mubr.msk.f32.gmra.mxu0 %vm2563_vm7, %v9928_v30  ;;  %v2076_v23 = vpop.f32.mrf.mxu0  ;;  %4263 = vmatpush1.msra.mxu1 %v5927_v33  ;;  %v8853_v33 = vld [vmem:[%s6150_s3 + $0x168] sm:$0xff]  ;;  %vm2847_vm7 = vcmp.eq.s32.totalorder %v6554_v0, %v8675_v5 }
 0x23a   : > { %5486 = vmatmul.mubr.msk.f32.gmra.mxu1 %vm2837_vm10, %v9928_v30  ;;  %5784 = vset.pattern.permute.xlu1 %v9936_v35  ;;  %v8779_v32 = vadd.f32 %v2076_v23, %v1852_v50  ;;  %v2221_v45 = vpop.f32.mrf.mxu1  ;;  %vm2846_vm1 = vcmp.eq.s32.totalorder %v6559_v7, %v8771_v1  ;;  %vm2845_vm3 = vcmp.eq.s32.totalorder %v6554_v0, %v8771_v1  ;;  %v5937_v1 = vld [vmem:[%s9900_s1 + $0x218] sm:$0xff] }
 0x23b   : > { %3314 = vperm.xlu1 %5784, %v5926_v34   ;;  %5487 = vmatprep.mubr.msk.f32.mxu1 %vm2840_vm9, %v9928_v30  ;;  %v2222_v17 = vadd.f32 %v2221_v45, %v8304_v31  ;;  %v2078_v10 = vpop.f32.mrf.mxu0  ;;  %v5929_v31 = vld [vmem:[%s9900_s1 + $0x348] sm:$0xff]  ;;  %v5930_v34 = vld [vmem:[%s9900_s1 + $0x230] sm:$0xff] }
 0x23c   : > { %v2493_v24 = vpop.permute.xlu1 %2492  ;;  %v2223_v47 = vpop.f32.mrf.mxu1  ;;  %4044 = vmatpush1.msra.mxu0 %v5928_v15  ;;  %4264 = vmatprep.subr.mxu1 %v9931_v16 }
 0x23d   : > { %vm2565_vm12 = vcmp.eq.s32.totalorder %v6554_v0, %v2493_v24  ;;  %vm2566_vm13 = vcmp.eq.s32.totalorder %v6559_v7, %v2493_v24  ;;  %2364 = vst [vmem:[%s8678_s29 + $0x20] sm:$0xff] %v2222_v17  ;;  %4045 = vmatprep.subr.mxu0 %v9931_v16  ;;  %4265 = vmatpush1.msra.mxu1 %v5929_v31  ;;  %v9943_v17 = vld [vmem:[#allocation11_spill] sm:$0xff]  ;;  %v5935_v24 = vld [vmem:[%s6150_s3 + $0x158] sm:$0xff] }
 0x23e   : > { %5488 = vmatmul.mubr.msk.f32.gmra.mxu1 %vm2839_vm11, %v9928_v30  ;;  %5437 = vmatprep.mubr.msk.f32.mxu0 %vm2566_vm13, %v9928_v30  ;;  %v8808_v44 = vpop.permute.xlu0 %2777  ;;  %v2081_v39 = vpop.f32.mrf.mxu0  ;;  %v1867_v10 = vadd.f32 %v8382_v57, %v9943_v17  ;;  %v5936_v57 = vld [vmem:[%s9900_s1 + $0x338] sm:$0xff]  ;;  %v9946_v17 = vld [vmem:[#allocation14_spill] sm:$0xff] }
 0x23f   : > { %5489 = vmatprep.mubr.msk.f32.mxu1 %vm2842_vm14, %v9928_v30  ;;  %3317 = vperm.xlu1 %5784, %v8627_v20   ;;  %v8812_v27 = vadd.f32 %v2081_v39, %v1857_v25  ;;  %v2226_v43 = vpop.f32.mrf.mxu1  ;;  %vm2852_vm11 = vcmp.eq.s32.totalorder %v6559_v7, %v8808_v44 }
 0x240   : > { %5438 = vmatmul.mubr.msk.f32.gmra.mxu0 %vm2565_vm12, %v9928_v30  ;;  %v2227_v21 = vadd.f32 %v2226_v43, %v8337_v26  ;;  %v2083_v54 = vpop.f32.mrf.mxu0  ;;  %4266 = vmatprep.subr.mxu1 %v9931_v16  ;;  %v1862_v26 = vadd.f32 %v8351_v12, %v9942_v49  ;;  %v5932_v12 = vld [vmem:[%s9900_s1 + $0x228] sm:$0xff]  ;;  %vm2849_vm12 = vcmp.eq.s32.totalorder %v6554_v0, %v8716_v29 }
 0x241   : > { %4046 = vmatpush1.msra.mxu0 %v5930_v34  ;;  %v2228_v20 = vpop.f32.mrf.mxu1  ;;  %4267 = vmatpush1.msra.mxu1 %v5931_v42 }
 0x242   : > { %5490 = vmatmul.mubr.msk.f32.gmra.mxu1 %vm2841_vm15, %v9928_v30  ;;  %v8830_v59 = vpop.permute.xlu1 %2780  ;;  %2365 = vst [vmem:[%s8678_s29 + $0x28] sm:$0xff] %v2227_v21  ;;  %4047 = vmatprep.subr.mxu0 %v9931_v16  ;;  %v9944_v21 = vld [vmem:[#allocation12_spill] sm:$0xff]  ;;  %vm2851_vm15 = vcmp.eq.s32.totalorder %v6554_v0, %v8808_v44 }
 0x243   : > { %5491 = vmatprep.mubr.msk.f32.mxu1 %vm2844_vm0, %v9928_v30  ;;  %5786 = vset.pattern.permute.xlu1 %v9935_v28  ;;  %v8836_v13 = vpop.permute.xlu0 %2786  ;;  %v2086_v56 = vpop.f32.mrf.mxu0  ;;  %v1872_v54 = vadd.f32 %v8420_v38, %v9944_v21  ;;  %v5938_v38 = vld [vmem:[%s9900_s1 + $0x330] sm:$0xff]  ;;  %vm2854_vm0 = vcmp.eq.s32.totalorder %v6559_v7, %v8830_v59 }
 0x244   : > { %3032 = vperm.xlu1 %5786, %v8704_v55   ;;  %4048 = vmatpush1.msra.mxu0 %v5932_v12  ;;  %v8844_v19 = vadd.f32 %v2086_v56, %v1862_v26  ;;  %v2231_v50 = vpop.f32.mrf.mxu1  ;;  %v9945_v56 = vld [vmem:[#allocation13_spill] sm:$0xff] }
 0x245   : > { %4049 = vmatprep.subr.mxu0 %v9931_v16  ;;  %4268 = vmatprep.subr.mxu1 %v9931_v16  ;;  %v2232_v23 = vadd.f32 %v2231_v50, %v8368_v58  ;;  %v2088_v55 = vpop.f32.mrf.mxu0  ;;  %v1877_v12 = vadd.f32 %v8444_v22, %v9945_v56 }
 0x246   : > { %5492 = vmatmul.mubr.msk.f32.gmra.mxu1 %vm2843_vm2, %v9928_v30  ;;  %3329 = vperm.xlu0 %5788, %v8853_v33   ;;  %v2233_v45 = vpop.f32.mrf.mxu1 }
 0x247   : > { %5493 = vmatprep.mubr.msk.f32.mxu1 %vm2846_vm1, %v9928_v30  ;;  %v8864_v58 = vpop.permute.xlu1 %2783  ;;  %2366 = vst [vmem:[%s8678_s29 + $0x30] sm:$0xff] %v2232_v23  ;;  %4050 = vmatpush1.msra.mxu0 %v5934_v9  ;;  %v5940_v23 = vld [vmem:[%s9900_s1 + $0x328] sm:$0xff]  ;;  %vm2853_vm1 = vcmp.eq.s32.totalorder %v6554_v0, %v8830_v59 }
 0x248   : > { %3035 = vperm.xlu1 %5786, %v5935_v24   ;;  %v2496_v47 = vpop.permute.xlu0 %2495  ;;  %4269 = vmatpush1.msra.mxu1 %v5936_v57  ;;  %v2091_v15 = vpop.f32.mrf.mxu0  ;;  %vm2856_vm2 = vcmp.eq.s32.totalorder %v6559_v7, %v8864_v58 }
 0x249   : > { %vm2567_vm4 = vcmp.eq.s32.totalorder %v6554_v0, %v2496_v47  ;;  %vm2568_vm5 = vcmp.eq.s32.totalorder %v6559_v7, %v2496_v47  ;;  %4051 = vmatprep.subr.mxu0 %v9931_v16  ;;  %4270 = vmatprep.subr.mxu1 %v9931_v16  ;;  %v8878_v14 = vadd.f32 %v2091_v15, %v1867_v10  ;;  %v2236_v25 = vpop.f32.mrf.mxu1 }
 0x24a   : > { %5494 = vmatmul.mubr.msk.f32.gmra.mxu1 %vm2845_vm3, %v9928_v30  ;;  %5439 = vmatprep.mubr.msk.f32.mxu0 %vm2568_vm5, %v9928_v30  ;;  %v2237_v31 = vadd.f32 %v2236_v25, %v8397_v18  ;;  %v2093_v39 = vpop.f32.mrf.mxu0  ;;  %v1882_v10 = vadd.f32 %v8475_v53, %v9946_v17  ;;  %v5942_v53 = vld [vmem:[%s9900_s1 + $0x208] sm:$0xff]  ;;  %vm2858_vm3 = vcmp.eq.s32.totalorder %v6559_v7, %v8836_v13 }
 0x24b   : > { %5495 = vmatprep.mubr.msk.f32.mxu1 %vm2848_vm6, %v9928_v30  ;;  %5440 = vmatmul.mubr.msk.f32.gmra.mxu0 %vm2567_vm4, %v9928_v30  ;;  %v2238_v43 = vpop.f32.mrf.mxu1  ;;  %vm2855_vm4 = vcmp.eq.s32.totalorder %v6554_v0, %v8864_v58 }
 0x24c   : > { %5787 = vset.pattern.permute.xlu1 %v9936_v35  ;;  %4052 = vmatpush1.msra.mxu0 %v5937_v1  ;;  %2367 = vst [vmem:[%s8678_s29 + $0x38] sm:$0xff] %v2237_v31  ;;  %v5944_v31 = vld [vmem:[%s6150_s3 + $0x170] sm:$0xff] }
 0x24d   : > { %3323 = vperm.xlu1 %5787, %v5935_v24   ;;  %v2499_v18 = vpop.permute.xlu1 %2498  ;;  %4271 = vmatpush1.msra.mxu1 %v5938_v38  ;;  %v2096_v34 = vpop.f32.mrf.mxu0  ;;  %v5941_v24 = vld [vmem:[%s6150_s3 + $0x178] sm:$0xff]  ;;  %v9947_v43 = vld [vmem:[#allocation15_spill] sm:$0xff] }
 0x24e   : > { %5496 = vmatmul.mubr.msk.f32.gmra.mxu1 %vm2847_vm7, %v9928_v30  ;;  %vm2569_vm9 = vcmp.eq.s32.totalorder %v6554_v0, %v2499_v18  ;;  %vm2570_vm10 = vcmp.eq.s32.totalorder %v6559_v7, %v2499_v18  ;;  %4053 = vmatprep.subr.mxu0 %v9931_v16  ;;  %v8908_v5 = vadd.f32 %v2096_v34, %v1872_v54  ;;  %v2241_v20 = vpop.f32.mrf.mxu1  ;;  %v5946_v54 = vld [vmem:[%s9900_s1 + $0x318] sm:$0xff] }
 0x24f   : > { %5497 = vmatprep.mubr.msk.f32.mxu1 %vm2850_vm8, %v9928_v30  ;;  %5441 = vmatprep.mubr.msk.f32.mxu0 %vm2570_vm10, %v9928_v30  ;;  %v2242_v42 = vadd.f32 %v2241_v20, %v8432_v46  ;;  %v2098_v49 = vpop.f32.mrf.mxu0  ;;  %v5939_v46 = vld [vmem:[%s9900_s1 + $0x210] sm:$0xff]  ;;  %v1887_v59 = vadd.f32 %v8502_v62, %v9947_v43  ;;  %vm2857_vm7 = vcmp.eq.s32.totalorder %v6554_v0, %v8836_v13 }
 0x250   : > { %5442 = vmatmul.mubr.msk.f32.gmra.mxu0 %vm2569_vm9, %v9928_v30  ;;  %4272 = vmatprep.subr.mxu1 %v9931_v16  ;;  %v2243_v26 = vpop.f32.mrf.mxu1 }
 0x251   : > { %3326 = vperm.xlu1 %5787, %v8667_v40   ;;  %v2502_v50 = vpop.permute.xlu1 %2501  ;;  %4054 = vmatpush1.msra.mxu0 %v5939_v46  ;;  %2368 = vst [vmem:[%s8678_s29 + $0x40] sm:$0xff] %v2242_v42  ;;  %v5947_v42 = vld [vmem:[%s9900_s1 + $0x2f8] sm:$0xff]  ;;  %v5948_v26 = vld [vmem:[%s9900_s1 + $0x310] sm:$0xff] }
 0x252   : > { %5498 = vmatmul.mubr.msk.f32.gmra.mxu1 %vm2849_vm12, %v9928_v30  ;;  %vm2571_vm13 = vcmp.eq.s32.totalorder %v6554_v0, %v2502_v50  ;;  %vm2572_vm14 = vcmp.eq.s32.totalorder %v6559_v7, %v2502_v50  ;;  %5791 = vset.pattern.permute.xlu0 %v9935_v28  ;;  %v2101_v22 = vpop.f32.mrf.mxu0  ;;  %v5949_v46 = vld [vmem:[%s9900_s1 + $0x2f0] sm:$0xff] }
 0x253   : > { %5499 = vmatprep.mubr.msk.f32.mxu1 %vm2852_vm11, %v9928_v30  ;;  %5443 = vmatprep.mubr.msk.f32.mxu0 %vm2572_vm14, %v9928_v30  ;;  %v8937_v40 = vadd.f32 %v2101_v22, %v1877_v12  ;;  %v2246_v29 = vpop.f32.mrf.mxu1 }
 0x254   : > { %5444 = vmatmul.mubr.msk.f32.gmra.mxu0 %vm2571_vm13, %v9928_v30  ;;  %4273 = vmatpush1.msra.mxu1 %v5940_v23  ;;  %v2247_v55 = vadd.f32 %v2246_v29, %v8459_v3  ;;  %v2103_v45 = vpop.f32.mrf.mxu0  ;;  %v9949_v23 = vld [vmem:[#allocation17_spill] sm:$0xff] }
 0x255   : > { %5789 = vset.pattern.permute.xlu1 %v9935_v28  ;;  %4055 = vmatprep.subr.mxu0 %v9931_v16  ;;  %v2248_v44 = vpop.f32.mrf.mxu1 }
 0x256   : > { %5500 = vmatmul.mubr.msk.f32.gmra.mxu1 %vm2851_vm15, %v9928_v30  ;;  %3041 = vperm.xlu1 %5789, %v8853_v33   ;;  %v8952_v9 = vpop.permute.xlu1 %2789  ;;  %2369 = vst [vmem:[%s8678_s29 + $0x48] sm:$0xff] %v2247_v55  ;;  %v5943_v33 = vld [vmem:[%s9900_s1 + $0x320] sm:$0xff]  ;;  %v1897_v55 = vadd.f32 %v8564_v51, %v9949_v23  ;;  %v9043_v44 = vld [vmem:[%s6150_s3 + $0x190] sm:$0xff] }
 0x257   : > { %5501 = vmatprep.mubr.msk.f32.mxu1 %vm2854_vm0, %v9928_v30  ;;  %4274 = vmatprep.subr.mxu1 %v9931_v16  ;;  %v2106_v3 = vpop.f32.mrf.mxu0  ;;  %vm2860_vm8 = vcmp.eq.s32.totalorder %v6559_v7, %v8952_v9  ;;  %vm2859_vm9 = vcmp.eq.s32.totalorder %v6554_v0, %v8952_v9 }
 0x258   : > { %3047 = vperm.xlu0 %5791, %v5941_v24   ;;  %4056 = vmatpush1.msra.mxu0 %v5942_v53  ;;  %v8961_v47 = vadd.f32 %v2106_v3, %v1882_v10  ;;  %v2251_v57 = vpop.f32.mrf.mxu1  ;;  %v5952_v3 = vld [vmem:[%s9900_s1 + $0x2e8] sm:$0xff] }
 0x259   : > { %4275 = vmatpush1.msra.mxu1 %v5943_v33  ;;  %4057 = vmatprep.subr.mxu0 %v9931_v16  ;;  %v2252_v15 = vadd.f32 %v2251_v57, %v8490_v48  ;;  %v2108_v25 = vpop.f32.mrf.mxu0  ;;  %v5945_v48 = vld [vmem:[%s9900_s1 + $0x200] sm:$0xff] }
 0x25a   : > { %5502 = vmatmul.mubr.msk.f32.gmra.mxu1 %vm2853_vm1, %v9928_v30  ;;  %3044 = vperm.xlu1 %5789, %v5944_v31   ;;  %v2253_v39 = vpop.f32.mrf.mxu1  ;;  %v8977_v21 = vpop.permute.xlu1 %2792  ;;  %v5953_v57 = vld [vmem:[%s9900_s1 + $0x300] sm:$0xff] }
 0x25b   : > { %5503 = vmatprep.mubr.msk.f32.mxu1 %vm2856_vm2, %v9928_v30  ;;  %4276 = vmatprep.subr.mxu1 %v9931_v16  ;;  %2370 = vst [vmem:[%s8678_s29 + $0x50] sm:$0xff] %v2252_v15  ;;  %vm2862_vm11 = vcmp.eq.s32.totalorder %v6559_v7, %v8977_v21  ;;  %v9950_v15 = vld [vmem:[#allocation18_spill] sm:$0xff]  ;;  %vm2861_vm13 = vcmp.eq.s32.totalorder %v6554_v0, %v8977_v21  ;;  %v5956_v21 = vld [vmem:[%s9900_s1 + $0x3f8] sm:$0xff] }
 0x25c   : > { %4058 = vmatpush1.msra.mxu0 %v5945_v48  ;;  %4277 = vmatpush1.msra.mxu1 %v5946_v54  ;;  %v2505_v62 = vpop.permute.xlu0 %2504  ;;  %v2111_v1 = vpop.f32.mrf.mxu0  ;;  %v1902_v25 = vadd.f32 %v8592_v8, %v9950_v15  ;;  %v5955_v8 = vld [vmem:[%s9900_s1 + $0x2e0] sm:$0xff] }
 0x25d   : > { %vm2574_vm5 = vcmp.eq.s32.totalorder %v6559_v7, %v2505_v62  ;;  %4059 = vmatprep.subr.mxu0 %v9931_v16  ;;  %4278 = vmatprep.subr.mxu1 %v9931_v16  ;;  %v8994_v18 = vadd.f32 %v2111_v1, %v1887_v59  ;;  %v2256_v38 = vpop.f32.mrf.mxu1  ;;  %vm2573_vm6 = vcmp.eq.s32.totalorder %v6554_v0, %v2505_v62 }
 0x25e   : > { %5504 = vmatmul.mubr.msk.f32.gmra.mxu1 %vm2855_vm4, %v9928_v30  ;;  %5790 = vset.pattern.permute.xlu1 %v9936_v35  ;;  %v2257_v34 = vadd.f32 %v2256_v38, %v8513_v60  ;;  %v2113_v20 = vpop.f32.mrf.mxu0  ;;  %v9948_v60 = vld [vmem:[#allocation16_spill] sm:$0xff]  ;;  %v9951_v38 = vld [vmem:[#allocation19_spill] sm:$0xff] }
 0x25f   : > { %3332 = vperm.xlu1 %5790, %v5944_v31   ;;  %5505 = vmatprep.mubr.msk.f32.mxu1 %vm2858_vm3, %v9928_v30  ;;  %v2258_v58 = vpop.f32.mrf.mxu1  ;;  %v1892_v49 = vadd.f32 %v8529_v4, %v9948_v60  ;;  %v5957_v20 = vld [vmem:[%s9900_s1 + $0x2d8] sm:$0xff] }
 0x260   : > { %5445 = vmatprep.mubr.msk.f32.mxu0 %vm2574_vm5, %v9928_v30  ;;  %4060 = vmatpush2.msra.mxu0 %v5947_v42  ;;  %2371 = vst [vmem:[%s8678_s29 + $0x58] sm:$0xff] %v2257_v34  ;;  %v1907_v34 = vadd.f32 %v8618_v63, %v9951_v38 }
 0x261   : > { %4279 = vmatpush1.msra.mxu1 %v5948_v26  ;;  %5446 = vmatmul.mubr.msk.f32.gmra.mxu0 %vm2573_vm6, %v9928_v30  ;;  %v2508_v13 = vpop.permute.xlu1 %2507  ;;  %v2116_v56 = vpop.f32.mrf.mxu0 }
 0x262   : > { %5506 = vmatmul.mubr.msk.f32.gmra.mxu1 %vm2857_vm7, %v9928_v30  ;;  %4061 = vmatprep.subr.mxu0 %v9931_v16  ;;  %v2261_v12 = vpop.f32.mrf.mxu1  ;;  %v9022_v4 = vadd.f32 %v2116_v56, %v1892_v49  ;;  %vm2576_vm10 = vcmp.eq.s32.totalorder %v6559_v7, %v2508_v13  ;;  %v9038_v45 = vpop.permute.xlu0 %2513  ;;  %vm2575_vm12 = vcmp.eq.s32.totalorder %v6554_v0, %v2508_v13  ;;  %v5959_v13 = vld [vmem:[%s6150_s3 + $0x188] sm:$0xff] }
 0x263   : > { %5507 = vmatprep.mubr.msk.f32.mxu1 %vm2860_vm8, %v9928_v30  ;;  %3335 = vperm.xlu1 %5790, %v5941_v24   ;;  %v2262_v50 = vadd.f32 %v2261_v12, %v8552_v37  ;;  %v2118_v22 = vpop.f32.mrf.mxu0  ;;  %v5950_v37 = vld [vmem:[%s9900_s1 + $0x308] sm:$0xff]  ;;  %v5960_v12 = vld [vmem:[%s9900_s1 + $0x2d0] sm:$0xff]  ;;  %vm2580_vm4 = vcmp.eq.s32.totalorder %v6559_v7, %v9038_v45  ;;  %vm2579_vm6 = vcmp.eq.s32.totalorder %v6554_v0, %v9038_v45 }
 0x264   : > { %4280 = vmatprep.subr.mxu1 %v9931_v16  ;;  %4062 = vmatpush2.msra.mxu0 %v5949_v46  ;;  %v2263_v29 = vpop.f32.mrf.mxu1  ;;  %v5962_v46 = vld [vmem:[%s9900_s1 + $0x2c8] sm:$0xff]  ;;  %v5963_v22 = vld [vmem:[%s9900_s1 + $0x3e0] sm:$0xff]  ;;  %v5968_v45 = vld [vmem:[%s9900_s1 + $0x2b0] sm:$0xff] }
 0x265   : > { %4281 = vmatpush1.msra.mxu1 %v5950_v37  ;;  %4063 = vmatprep.subr.mxu0 %v9931_v16  ;;  %2372 = vst [vmem:[%s8678_s29 + $0x60] sm:$0xff] %v2262_v50  ;;  %v2511_v51 = vpop.permute.xlu1 %2510  ;;  %v5961_v50 = vld [vmem:[%s9900_s1 + $0x3e8] sm:$0xff]  ;;  %v5964_v37 = vld [vmem:[%s9900_s1 + $0x2c0] sm:$0xff] }
 0x266   : > { %5508 = vmatmul.mubr.msk.f32.gmra.mxu1 %vm2859_vm9, %v9928_v30  ;;  %3056 = vperm.xlu0 %5791, %v9043_v44   ;;  %v2121_v17 = vpop.f32.mrf.mxu0  ;;  %vm2578_vm14 = vcmp.eq.s32.totalorder %v6559_v7, %v2511_v51  ;;  %vm2577_vm15 = vcmp.eq.s32.totalorder %v6554_v0, %v2511_v51 }
 0x267   : > { %5509 = vmatprep.mubr.msk.f32.mxu1 %vm2862_vm11, %v9928_v30  ;;  %4282 = vmatprep.subr.mxu1 %v9931_v16  ;;  %v9051_v10 = vadd.f32 %v2121_v17, %v1897_v55  ;;  %v2266_v9 = vpop.f32.mrf.mxu1 }
 0x268   : > { %5447 = vmatprep.mubr.msk.f32.mxu0 %vm2576_vm10, %v9928_v30  ;;  %4064 = vmatpush2.msra.mxu0 %v5952_v3  ;;  %v2267_v24 = vadd.f32 %v2266_v9, %v8573_v11  ;;  %v2123_v53 = vpop.f32.mrf.mxu0  ;;  %v5954_v11 = vld [vmem:[%s6150_s3 + $0x180] sm:$0xff]  ;;  %v2796_v31 = vpop.permute.xlu0 %2795 }
 0x269   : > { %4283 = vmatpush1.msra.mxu1 %v5953_v57  ;;  %5792 = vset.pattern.permute.xlu1 %v9935_v28  ;;  %v2268_v33 = vpop.f32.mrf.mxu1  ;;  %vm2864_vm0 = vcmp.eq.s32.totalorder %v6559_v7, %v2796_v31  ;;  %vm2863_vm1 = vcmp.eq.s32.totalorder %v6554_v0, %v2796_v31 }
 0x26a   : > { %5448 = vmatmul.mubr.msk.f32.gmra.mxu0 %vm2575_vm12, %v9928_v30  ;;  %4065 = vmatprep.subr.mxu0 %v9931_v16  ;;  %2373 = vst [vmem:[%s8678_s29 + $0x68] sm:$0xff] %v2267_v24  ;;  %v5966_v24 = vld [vmem:[%s9900_s1 + $0x2b8] sm:$0xff] }
 0x26b   : > { %4284 = vmatprep.subr.mxu1 %v9931_v16  ;;  %3050 = vperm.xlu1 %5792, %v5954_v11   ;;  %v2126_v39 = vpop.f32.mrf.mxu0 }
 0x26c   : > { %5510 = vmatmul.mubr.msk.f32.gmra.mxu1 %vm2861_vm13, %v9928_v30  ;;  %4066 = vmatpush2.msra.mxu0 %v5955_v8  ;;  %v2799_v43 = vpop.permute.xlu1 %2798  ;;  %v9077_v59 = vadd.f32 %v2126_v39, %v1902_v25  ;;  %v2271_v48 = vpop.f32.mrf.mxu1  ;;  %v5969_v25 = vld [vmem:[%s9900_s1 + $0x3c8] sm:$0xff] }
 0x26d   : > { %4285 = vmatpush2.msra.mxu1 %v5956_v21  ;;  %4067 = vmatprep.subr.mxu0 %v9931_v16  ;;  %v2272_v54 = vadd.f32 %v2271_v48, %v8600_v36  ;;  %v2128_v62 = vpop.f32.mrf.mxu0  ;;  %v5958_v36 = vld [vmem:[%s9900_s1 + $0x3f0] sm:$0xff]  ;;  %vm2866_vm2 = vcmp.eq.s32.totalorder %v6559_v7, %v2799_v43  ;;  %vm2865_vm3 = vcmp.eq.s32.totalorder %v6554_v0, %v2799_v43  ;;  %v5970_v39 = vld [vmem:[%s9900_s1 + $0x2a8] sm:$0xff]  ;;  %v5972_v21 = vld [vmem:[%s9900_s1 + $0x2a0] sm:$0xff] }
 0x26e   : > { %5794 = vset.pattern.permute.xlu0 %v9936_v35  ;;  %4286 = vmatprep.subr.mxu1 %v9931_v16  ;;  %v2273_v1 = vpop.f32.mrf.mxu1  ;;  %v5973_v62 = vld [vmem:[%s9900_s1 + $0x3b8] sm:$0xff] }
 0x26f   : > { %4068 = vmatpush2.msra.mxu0 %v5957_v20  ;;  %3338 = vperm.xlu0 %5794, %v5954_v11   ;;  %2374 = vst [vmem:[%s8678_s29 + $0x70] sm:$0xff] %v2272_v54  ;;  %v5975_v20 = vld [vmem:[%s9900_s1 + $0x298] sm:$0xff] }
 0x270   : > { %5449 = vmatprep.mubr.msk.f32.mxu0 %vm2578_vm14, %v9928_v30  ;;  %4287 = vmatpush2.msra.mxu1 %v5958_v36  ;;  %v9102_v63 = vpop.permute.xlu1 %2801  ;;  %v2131_v58 = vpop.f32.mrf.mxu0 }
 0x271   : > { %5450 = vmatmul.mubr.msk.f32.gmra.mxu0 %vm2577_vm15, %v9928_v30  ;;  %5511 = vmatprep.mubr.msk.f32.mxu1 %vm2864_vm0, %v9928_v30  ;;  %v9108_v42 = vadd.f32 %v2131_v58, %v1907_v34  ;;  %v2276_v60 = vpop.f32.mrf.mxu1  ;;  %vm2868_vm5 = vcmp.eq.s32.totalorder %v6559_v7, %v9102_v63  ;;  %vm2867_vm7 = vcmp.eq.s32.totalorder %v6554_v0, %v9102_v63  ;;  %v5974_v34 = vld [vmem:[%s6150_s3 + $0x198] sm:$0xff]  ;;  %v5976_v63 = vld [vmem:[%s9900_s1 + $0x3b0] sm:$0xff] }
 0x272   : > { %4069 = vmatprep.subr.mxu0 %v9931_v16  ;;  %4288 = vmatprep.subr.mxu1 %v9931_v16  ;;  %v2277_v49 = vadd.f32 %v2276_v60, %v8631_v41  ;;  %v2133_v26 = vpop.f32.mrf.mxu0  ;;  %v5977_v60 = vld [vmem:[%s9900_s1 + $0x290] sm:$0xff] }
 0x273   : > { %3053 = vperm.xlu1 %5792, %v5959_v13   ;;  %5512 = vmatmul.mubr.msk.f32.gmra.mxu1 %vm2863_vm1, %v9928_v30  ;;  %v2278_v56 = vpop.f32.mrf.mxu1 }
 0x274   : > { %4070 = vmatpush2.msra.mxu0 %v5960_v12  ;;  %4289 = vmatpush2.msra.mxu1 %v5961_v50  ;;  %2375 = vst [vmem:[%s8678_s29 + $0x78] sm:$0xff] %v2277_v49  ;;  %v5978_v12 = vld [vmem:[%s9900_s1 + $0x3a8] sm:$0xff]  ;;  %v5979_v50 = vld [vmem:[%s6150_s3 + $0x1a0] sm:$0xff] }
 0x275   : > { %4071 = vmatprep.subr.mxu0 %v9931_v16  ;;  %4290 = vmatprep.subr.mxu1 %v9931_v16  ;;  %v2281_v41 = vpop.f32.mrf.mxu1 }
 0x276   : > { %4072 = vmatpush2.msra.mxu0 %v5962_v46  ;;  %4291 = vmatpush2.msra.mxu1 %v5963_v22  ;;  %v9134_v29 = vpop.permute.xlu1 %2516  ;;  %v2282_v23 = vadd.f32 %v2281_v41, %v8662_v6  ;;  %v5965_v6 = vld [vmem:[%s9900_s1 + $0x3d8] sm:$0xff]  ;;  %v2805_v57 = vpop.permute.xlu0 %2804  ;;  %v5980_v41 = vld [vmem:[%s9900_s1 + $0x288] sm:$0xff]  ;;  %v5981_v22 = vld [vmem:[%s9900_s1 + $0x3a0] sm:$0xff] }
 0x277   : > { %5513 = vmatprep.mubr.msk.f32.mxu1 %vm2866_vm2, %v9928_v30  ;;  %4073 = vmatprep.subr.mxu0 %v9931_v16  ;;  %v2283_v55 = vpop.f32.mrf.mxu1  ;;  %vm2582_vm8 = vcmp.eq.s32.totalorder %v6559_v7, %v9134_v29  ;;  %vm2870_vm9 = vcmp.eq.s32.totalorder %v6559_v7, %v2805_v57  ;;  %vm2581_vm10 = vcmp.eq.s32.totalorder %v6554_v0, %v9134_v29 }
 0x278   : > { %4292 = vmatprep.subr.mxu1 %v9931_v16  ;;  %5793 = vset.pattern.permute.xlu1 %v9936_v35  ;;  %2376 = vst [vmem:[%s8678_s29 + $0x80] sm:$0xff] %v2282_v23  ;;  %vm2869_vm11 = vcmp.eq.s32.totalorder %v6554_v0, %v2805_v57  ;;  %v5982_v23 = vld [vmem:[%s9900_s1 + $0x280] sm:$0xff] }
 0x279   : > { %5514 = vmatmul.mubr.msk.f32.gmra.mxu1 %vm2865_vm3, %v9928_v30  ;;  %4074 = vmatpush2.msra.mxu0 %v5964_v37  ;;  %v2286_v51 = vpop.f32.mrf.mxu1  ;;  %v5983_v37 = vld [vmem:[%s9900_s1 + $0x398] sm:$0xff] }
 0x27a   : > { %4293 = vmatpush2.msra.mxu1 %v5965_v6  ;;  %3341 = vperm.xlu1 %5793, %v5959_v13   ;;  %v9153_v17 = vpop.permute.xlu1 %2519  ;;  %v2287_v9 = vadd.f32 %v2286_v51, %v8688_v61  ;;  %v5967_v61 = vld [vmem:[%s9900_s1 + $0x3d0] sm:$0xff] }
 0x27b   : > { %4075 = vmatprep.subr.mxu0 %v9931_v16  ;;  %4294 = vmatprep.subr.mxu1 %v9931_v16  ;;  %v2288_v3 = vpop.f32.mrf.mxu1  ;;  %vm2584_vm12 = vcmp.eq.s32.totalorder %v6559_v7, %v9153_v17  ;;  %vm2583_vm13 = vcmp.eq.s32.totalorder %v6554_v0, %v9153_v17 }
 0x27c   : > { %4076 = vmatpush2.msra.mxu0 %v5966_v24  ;;  %4295 = vmatpush2.msra.mxu1 %v5967_v61  ;;  %2377 = vst [vmem:[%s8678_s29 + $0x88] sm:$0xff] %v2287_v9  ;;  %v5984_v9 = vld [vmem:[%s6150_s3 + $0x1a8] sm:$0xff] }
 0x27d   : > { %5451 = vmatprep.mubr.msk.f32.mxu0 %vm2580_vm4, %v9928_v30  ;;  %5515 = vmatprep.mubr.msk.f32.mxu1 %vm2868_vm5, %v9928_v30  ;;  %v9174_v53 = vpop.f32.mrf.mxu0  ;;  %v3003_v13 = vpop.permute.xlu0 %3002 }
 0x27e   : > { %4077 = vmatprep.subr.mxu0 %v9931_v16  ;;  %4296 = vmatprep.subr.mxu1 %v9931_v16  ;;  %vm3098_vm14 = vcmp.eq.s32.totalorder %v6559_v7, %v3003_v13  ;;  %vm3097_vm0 = vcmp.eq.s32.totalorder %v6554_v0, %v3003_v13 }
 0x27f   : > { %5452 = vmatmul.mubr.msk.f32.gmra.mxu0 %vm2579_vm6, %v9928_v30  ;;  %5516 = vmatmul.mubr.msk.f32.gmra.mxu1 %vm2867_vm7, %v9928_v30  ;;  %v9180_v33 = vpop.permute.xlu1 %2807  ;;  %v3645_v15 = vpop.f32.mrf.mxu0 }
 0x280   : > { %4078 = vmatpush2.msra.mxu0 %v5968_v45  ;;  %4297 = vmatpush2.msra.mxu1 %v5969_v25  ;;  %v2291_v11 = vpop.f32.mrf.mxu1  ;;  %vm2872_vm15 = vcmp.eq.s32.totalorder %v6559_v7, %v9180_v33  ;;  %vm2871_vm1 = vcmp.eq.s32.totalorder %v6554_v0, %v9180_v33  ;;  %v5985_v33 = vld [vmem:[%s9900_s1 + $0x390] sm:$0xff]  ;;  %v5986_v45 = vld [vmem:[%s9900_s1 + $0x388] sm:$0xff]  ;;  %v9325_v25 = vld [vmem:[%s6150_s3 + $0x1c0] sm:$0xff] }
 0x281   : > { %3344 = vperm.xlu1 %5793, %v9043_v44   ;;  %4079 = vmatprep.subr.mxu0 %v9931_v16  ;;  %v2292_v31 = vadd.f32 %v2291_v11, %v8718_v2  ;;  %v5971_v44 = vld [vmem:[%s9900_s1 + $0x3c0] sm:$0xff] }
 0x282   : > { %4298 = vmatprep.subr.mxu1 %v9931_v16  ;;  %4080 = vmatpush2.msra.mxu0 %v5970_v39  ;;  %v9198_v8 = vpop.f32.mrf.mxu0  ;;  %v2293_v43 = vpop.f32.mrf.mxu1 }
 0x283   : > { %4299 = vmatpush2.msra.mxu1 %v5971_v44  ;;  %4081 = vmatprep.subr.mxu0 %v9931_v16  ;;  %2378 = vst [vmem:[%s8678_s29 + $0x90] sm:$0xff] %v2292_v31  ;;  %v3294_v3 = vpop.permute.xlu0 %3293  ;;  %v5988_v44 = vld [vmem:[%s9900_s1 + $0x380] sm:$0xff] }
 0x284   : > { %4300 = vmatprep.subr.mxu1 %v9931_v16  ;;  %5453 = vmatprep.mubr.msk.f32.mxu0 %vm2582_vm8, %v9928_v30  ;;  %v9210_v2 = vpop.permute.xlu1 %3290  ;;  %v3650_v48 = vpop.f32.mrf.mxu0  ;;  %vm3388_vm7 = vcmp.eq.s32.totalorder %v6559_v7, %v3294_v3 }
 0x285   : > { %5517 = vmatprep.mubr.msk.f32.mxu1 %vm2870_vm9, %v9928_v30  ;;  %4082 = vmatpush2.msra.mxu0 %v5972_v21  ;;  %v2296_v54 = vpop.f32.mrf.mxu1  ;;  %vm3386_vm2 = vcmp.eq.s32.totalorder %v6559_v7, %v9210_v2  ;;  %vm3385_vm5 = vcmp.eq.s32.totalorder %v6554_v0, %v9210_v2  ;;  %vm3387_vm9 = vcmp.eq.s32.totalorder %v6554_v0, %v3294_v3  ;;  %v5989_v21 = vld [vmem:[%s6150_s3 + $0x1b0] sm:$0xff] }
 0x286   : > { %4301 = vmatpush2.msra.mxu1 %v5973_v62  ;;  %5795 = vset.pattern.permute.xlu1 %v9935_v28  ;;  %v2297_v1 = vadd.f32 %v2296_v54, %v8745_v52 }
 0x287   : > { %5454 = vmatmul.mubr.msk.f32.gmra.mxu0 %vm2581_vm10, %v9928_v30  ;;  %5518 = vmatmul.mubr.msk.f32.gmra.mxu1 %vm2869_vm11, %v9928_v30  ;;  %v2298_v38 = vpop.f32.mrf.mxu1 }
 0x288   : > { %4083 = vmatprep.subr.mxu0 %v9931_v16  ;;  %4302 = vmatprep.subr.mxu1 %v9931_v16  ;;  %2379 = vst [vmem:[%s8678_s29 + $0x98] sm:$0xff] %v2297_v1  ;;  %v9372_v38 = vld [vmem:[%s6150_s3 + $0x1c8] sm:$0xff] }
 0x289   : > { %3059 = vperm.xlu1 %5795, %v5974_v34   ;;  %4084 = vmatpush2.msra.mxu0 %v5975_v20  ;;  %v9232_v52 = vpop.permute.xlu1 %3005  ;;  %v9234_v36 = vpop.f32.mrf.mxu0 }
 0x28a   : > { %4303 = vmatpush2.msra.mxu1 %v5976_v63  ;;  %4085 = vmatprep.subr.mxu0 %v9931_v16  ;;  %v2301_v58 = vpop.f32.mrf.mxu1  ;;  %vm3100_vm3 = vcmp.eq.s32.totalorder %v6559_v7, %v9232_v52  ;;  %vm3099_vm4 = vcmp.eq.s32.totalorder %v6554_v0, %v9232_v52  ;;  %v3012_v11 = vpop.permute.xlu0 %3011  ;;  %v5991_v52 = vld [vmem:[%s6150_s3 + $0x1b8] sm:$0xff] }
 0x28b   : > { %4304 = vmatprep.subr.mxu1 %v9931_v16  ;;  %4086 = vmatpush2.msra.mxu0 %v5977_v60  ;;  %v2302_v49 = vadd.f32 %v2301_v58, %v8779_v32  ;;  %v3655_v26 = vpop.f32.mrf.mxu0  ;;  %vm3104_vm10 = vcmp.eq.s32.totalorder %v6559_v7, %v3012_v11 }
 0x28c   : > { %3347 = vperm.xlu0 %5794, %v5974_v34   ;;  %5455 = vmatprep.mubr.msk.f32.mxu0 %vm2584_vm12, %v9928_v30  ;;  %v2303_v56 = vpop.f32.mrf.mxu1  ;;  %vm3103_vm12 = vcmp.eq.s32.totalorder %v6554_v0, %v3012_v11 }
 0x28d   : > { %4305 = vmatpush2.msra.mxu1 %v5978_v12  ;;  %5456 = vmatmul.mubr.msk.f32.gmra.mxu0 %vm2583_vm13, %v9928_v30  ;;  %v9258_v32 = vpop.permute.xlu1 %3008  ;;  %2380 = vst [vmem:[%s8678_s29 + $0xa0] sm:$0xff] %v2302_v49 }
 0x28e   : > { %4087 = vmatprep.subr.mxu0 %v9931_v16  ;;  %4306 = vmatprep.subr.mxu1 %v9931_v16  ;;  %vm3102_vm6 = vcmp.eq.s32.totalorder %v6559_v7, %v9258_v32  ;;  %vm3101_vm8 = vcmp.eq.s32.totalorder %v6554_v0, %v9258_v32  ;;  %v9407_v32 = vld [vmem:[%s6150_s3 + $0x1d8] sm:$0xff] }
 0x28f   : > { %3062 = vperm.xlu1 %5795, %v5979_v50   ;;  %4088 = vmatpush2.msra.mxu0 %v5980_v41  ;;  %v2306_v46 = vpop.f32.mrf.mxu1 }
 0x290   : > { %4307 = vmatpush2.msra.mxu1 %v5981_v22  ;;  %4089 = vmatprep.subr.mxu0 %v9931_v16  ;;  %v2307_v29 = vadd.f32 %v2306_v46, %v8812_v27 }
 0x291   : > { %4308 = vmatprep.subr.mxu1 %v9931_v16  ;;  %4090 = vmatpush2.msra.mxu0 %v5982_v23  ;;  %v2308_v55 = vpop.f32.mrf.mxu1 }
 0x292   : > { %5521 = vmatprep.mubr.msk.f32.mxu0 %vm3098_vm14, %v9928_v30  ;;  %4309 = vmatpush2.msra.mxu1 %v5983_v37  ;;  %v9284_v51 = vpop.permute.xlu1 %3296  ;;  %2381 = vst [vmem:[%s8678_s29 + $0xa8] sm:$0xff] %v2307_v29  ;;  %v9287_v27 = vpop.f32.mrf.mxu0  ;;  %v9428_v37 = vld [vmem:[%s6150_s3 + $0x1e0] sm:$0xff] }
 0x293   : > { %5797 = vset.pattern.permute.xlu0 %v9935_v28  ;;  %5519 = vmatprep.mubr.msk.f32.mxu1 %vm2872_vm15, %v9928_v30  ;;  %vm3390_vm11 = vcmp.eq.s32.totalorder %v6559_v7, %v9284_v51  ;;  %vm3389_vm13 = vcmp.eq.s32.totalorder %v6554_v0, %v9284_v51 }
 0x294   : > { %5522 = vmatmul.mubr.msk.f32.vlgmr.msra.gmra.mxu0 %vm3097_vm0, %v9928_v30  ;;  %4310 = vmatprep.subr.mxu1 %v9931_v16  ;;  %v2311_v6 = vpop.f32.mrf.mxu1  ;;  %v3660_v17 = vpop.f32.mrf.mxu0 }
 0x295   : > { %5796 = vset.pattern.permute.xlu1 %v9936_v35  ;;  %3065 = vperm.xlu0 %5797, %v5984_v9   ;;  %v2312_v24 = vadd.f32 %v2311_v6, %v8844_v19 }
 0x296   : > { %5520 = vmatmul.mubr.msk.f32.gmra.mxu1 %vm2871_vm1, %v9928_v30  ;;  %3350 = vperm.xlu1 %5796, %v5979_v50   ;;  %v9306_v61 = vpop.permute.xlu1 %3299  ;;  %v2313_v57 = vpop.f32.mrf.mxu1 }
 0x297   : > { %4311 = vmatpush2.msra.mxu1 %v5985_v33  ;;  %5585 = vmatprep.mubr.msk.f32.mxu1 %vm3386_vm2, %v9928_v30  ;;  %2382 = vst [vmem:[%s8678_s29 + $0xb0] sm:$0xff] %v2312_v24  ;;  %v9313_v15 = vpop.f32.mrf.mxu0  ;;  %vm3392_vm15 = vcmp.eq.s32.totalorder %v6559_v7, %v9306_v61  ;;  %vm3391_vm1 = vcmp.eq.s32.totalorder %v6554_v0, %v9306_v61  ;;  %v5994_v24 = vld [vmem:[%s6150_s3 + $0x1d0] sm:$0xff] }
 0x298   : > { %4312 = vmatprep.subr.mxu1 %v9931_v16  ;;  %5523 = vmatprep.mubr.msk.f32.mxu0 %vm3100_vm3, %v9928_v30  ;;  %v2316_v19 = vpop.f32.mrf.mxu1  ;;  %v9457_v33 = vld [vmem:[%s6150_s3 + $0x1f0] sm:$0xff] }
 0x299   : > { %4313 = vmatpush2.msra.mxu1 %v5986_v45  ;;  %3074 = vperm.xlu0 %5797, %v9325_v25   ;;  %v2317_v31 = vadd.f32 %v2316_v19, %v8878_v14  ;;  %v3665_v39 = vpop.f32.mrf.mxu0  ;;  %v9352_v14 = vpop.permute.xlu0 %3020 }
 0x29a   : > { %4314 = vmatprep.subr.mxu1 %v9931_v16  ;;  %3353 = vperm.xlu1 %5796, %v5984_v9   ;;  %v2318_v43 = vpop.f32.mrf.mxu1  ;;  %v9474_v39 = vld [vmem:[%s6150_s3 + $0x1f8] sm:$0xff] }
 0x29b   : > { %4315 = vmatpush2.msra.mxu1 %v5988_v44  ;;  %5524 = vmatmul.mubr.msk.f32.gmra.mxu0 %vm3099_vm4, %v9928_v30  ;;  %v3015_v48 = vpop.permute.xlu1 %3014  ;;  %2383 = vst [vmem:[%s8678_s29 + $0xb8] sm:$0xff] %v2317_v31 }
 0x29c   : > { %5586 = vmatmul.mubr.msk.f32.vlgmr.msra.gmra.mxu1 %vm3385_vm5, %v9928_v30  ;;  %5525 = vmatprep.mubr.msk.f32.mxu0 %vm3102_vm6, %v9928_v30  ;;  %v2321_v16 = vpop.f32.mrf.mxu1  ;;  %vm3106_vm14 = vcmp.eq.s32.totalorder %v6559_v7, %v3015_v48  ;;  %vm3105_vm0 = vcmp.eq.s32.totalorder %v6554_v0, %v3015_v48  ;;  %vm3110_vm6 = vcmp.eq.s32.totalorder %v6559_v7, %v9352_v14 }
 0x29d   : > { %5800 = vset.pattern.permute.xlu0 %v9936_v35  ;;  %5587 = vmatprep.mubr.msk.f32.mxu1 %vm3388_vm7, %v9928_v30  ;;  %v2322_v2 = vadd.f32 %v2321_v16, %v8908_v5  ;;  %v3303_v63 = vpop.permute.xlu0 %3302 }
 0x29e   : > { %5798 = vset.pattern.permute.xlu1 %v9935_v28  ;;  %3356 = vperm.xlu0 %5800, %v5989_v21   ;;  %v2323_v54 = vpop.f32.mrf.mxu1  ;;  %vm3394_vm2 = vcmp.eq.s32.totalorder %v6559_v7, %v3303_v63  ;;  %vm3393_vm5 = vcmp.eq.s32.totalorder %v6554_v0, %v3303_v63 }
 0x29f   : > { %3068 = vperm.xlu1 %5798, %v5989_v21   ;;  %5526 = vmatmul.mubr.msk.f32.gmra.mxu0 %vm3101_vm8, %v9928_v30  ;;  %v3018_v62 = vpop.permute.xlu1 %3017  ;;  %2384 = vst [vmem:[%s8678_s29 + $0xc0] sm:$0xff] %v2322_v2  ;;  %vm3109_vm8 = vcmp.eq.s32.totalorder %v6554_v0, %v9352_v14 }
 0x2a0   : > { %5588 = vmatmul.mubr.msk.f32.gmra.mxu1 %vm3387_vm9, %v9928_v30  ;;  %5527 = vmatprep.mubr.msk.f32.mxu0 %vm3104_vm10, %v9928_v30  ;;  %v2326_v5 = vpop.f32.mrf.mxu1  ;;  %vm3108_vm3 = vcmp.eq.s32.totalorder %v6559_v7, %v3018_v62  ;;  %vm3107_vm4 = vcmp.eq.s32.totalorder %v6554_v0, %v3018_v62 }
 0x2a1   : > { %5589 = vmatprep.mubr.msk.f32.mxu1 %vm3390_vm11, %v9928_v30  ;;  %v2327_v1 = vadd.f32 %v2326_v5, %v8937_v40  ;;  %v3312_v22 = vpop.permute.xlu0 %3311 }
 0x2a2   : > { %3365 = vperm.xlu0 %5800, %v9372_v38   ;;  %v9375_v34 = vpop.f32.mrf.mxu0  ;;  %v2328_v20 = vpop.f32.mrf.mxu1 }
 0x2a3   : > { %3071 = vperm.xlu1 %5798, %v5991_v52   ;;  %5528 = vmatmul.mubr.msk.f32.gmra.mxu0 %vm3103_vm12, %v9928_v30  ;;  %2385 = vst [vmem:[%s8678_s29 + $0xc8] sm:$0xff] %v2327_v1  ;;  %v5997_v20 = vld [vmem:[%s6150_s3 + $0x1e8] sm:$0xff]  ;;  %s5686_s3 = sshll.u32 %s6105_s13, 13  ;;  %s9859_s13 = scalar_lea.sflag [#allocation3], %s135_s23 }
 0x2a4   : > { %5590 = vmatmul.mubr.msk.f32.gmra.mxu1 %vm3389_vm13, %v9928_v30  ;;  %5529 = vmatprep.mubr.msk.f32.mxu0 %vm3106_vm14, %v9928_v30  ;;  %v3306_v40 = vpop.permute.xlu1 %3305  ;;  %v3670_v58 = vpop.f32.mrf.mxu0  ;;  %vm3400_vm14 = vcmp.eq.s32.totalorder %v6559_v7, %v3312_v22  ;;  %s9852_s8 = scalar_lea.hbm %s9901_s2, %s5686_s3 }
 0x2a5   : > { %5591 = vmatprep.mubr.msk.f32.mxu1 %vm3392_vm15, %v9928_v30  ;;  %v2331_v60 = vpop.f32.mrf.mxu1  ;;  %vm3396_vm7 = vcmp.eq.s32.totalorder %v6559_v7, %v3306_v40  ;;  %vm3395_vm9 = vcmp.eq.s32.totalorder %v6554_v0, %v3306_v40  ;;  %v3030_v6 = vpop.permute.xlu0 %3029 }
 0x2a6   : > { %5803 = vset.pattern.permute.xlu0 %v9935_v28  ;;  %v2332_v49 = vadd.f32 %v2331_v60, %v8961_v47 }
 0x2a7   : > { %5799 = vset.pattern.permute.xlu1 %v9936_v35  ;;  %5530 = vmatmul.mubr.msk.f32.gmra.mxu0 %vm3105_vm0, %v9928_v30  ;;  %v9395_v26 = vpop.f32.mrf.mxu0  ;;  %v2333_v13 = vpop.f32.mrf.mxu1 }
 0x2a8   : > { %3359 = vperm.xlu1 %5799, %v5991_v52   ;;  %5592 = vmatmul.mubr.msk.f32.gmra.mxu1 %vm3391_vm1, %v9928_v30  ;;  %v3309_v56 = vpop.permute.xlu1 %3308  ;;  %2386 = vst [vmem:[%s8678_s29 + $0xd0] sm:$0xff] %v2332_v49  ;;  %vm3399_vm1 = vcmp.eq.s32.totalorder %v6554_v0, %v3312_v22 }
 0x2a9   : > { %5593 = vmatprep.mubr.msk.f32.mxu1 %vm3394_vm2, %v9928_v30  ;;  %5531 = vmatprep.mubr.msk.f32.mxu0 %vm3108_vm3, %v9928_v30  ;;  %v3675_v47 = vpop.f32.mrf.mxu0  ;;  %v2336_v12 = vpop.f32.mrf.mxu1  ;;  %vm3398_vm10 = vcmp.eq.s32.totalorder %v6559_v7, %v3309_v56  ;;  %vm3397_vm13 = vcmp.eq.s32.totalorder %v6554_v0, %v3309_v56  ;;  %vm3116_vm2 = vcmp.eq.s32.totalorder %v6559_v7, %v3030_v6 }
 0x2aa   : > { %3083 = vperm.xlu0 %5803, %v9407_v32   ;;  %v2337_v50 = vadd.f32 %v2336_v12, %v8994_v18  ;;  %v9452_v61 = vpop.permute.xlu0 %3038 }
 0x2ab   : > { %5532 = vmatmul.mubr.msk.f32.gmra.mxu0 %vm3107_vm4, %v9928_v30  ;;  %v2338_v41 = vpop.f32.mrf.mxu1  ;;  %vm3115_vm4 = vcmp.eq.s32.totalorder %v6554_v0, %v3030_v6 }
 0x2ac   : > { %3362 = vperm.xlu1 %5799, %v9325_v25   ;;  %5594 = vmatmul.mubr.msk.f32.gmra.mxu1 %vm3393_vm5, %v9928_v30  ;;  %2387 = vst [vmem:[%s8678_s29 + $0xd8] sm:$0xff] %v2337_v50  ;;  %v9417_v46 = vpop.f32.mrf.mxu0 }
 0x2ad   : > { %5533 = vmatprep.mubr.msk.f32.mxu0 %vm3110_vm6, %v9928_v30  ;;  %5595 = vmatprep.mubr.msk.f32.mxu1 %vm3396_vm7, %v9928_v30  ;;  %v3024_v18 = vpop.permute.xlu1 %3023 }
 0x2ae   : > { %v3680_v29 = vpop.f32.mrf.mxu0  ;;  %v2341_v23 = vpop.f32.mrf.mxu1  ;;  %5805 = vset.pattern.permute.xlu0 %v9936_v35  ;;  %vm3112_vm11 = vcmp.eq.s32.totalorder %v6559_v7, %v3024_v18  ;;  %vm3111_vm12 = vcmp.eq.s32.totalorder %v6554_v0, %v3024_v18 }
 0x2af   : > { %5534 = vmatmul.mubr.msk.f32.gmra.mxu0 %vm3109_vm8, %v9928_v30  ;;  %v2342_v55 = vadd.f32 %v2341_v23, %v9022_v4  ;;  %3374 = vperm.xlu0 %5805, %v9428_v37   ;;  %v3321_v43 = vpop.permute.xlu0 %3320 }
 0x2b0   : > { %5801 = vset.pattern.permute.xlu1 %v9935_v28  ;;  %5596 = vmatmul.mubr.msk.f32.gmra.mxu1 %vm3395_vm9, %v9928_v30  ;;  %v2343_v51 = vpop.f32.mrf.mxu1  ;;  %vm3406_vm8 = vcmp.eq.s32.totalorder %v6559_v7, %v3321_v43 }
 0x2b1   : > { %3077 = vperm.xlu1 %5801, %v9372_v38   ;;  %5597 = vmatprep.mubr.msk.f32.mxu1 %vm3398_vm10, %v9928_v30  ;;  %2388 = vst [vmem:[%s8678_s29 + $0xe0] sm:$0xff] %v2342_v55  ;;  %v3027_v4 = vpop.permute.xlu1 %3026 }
 0x2b2   : > { %5535 = vmatprep.mubr.msk.f32.mxu0 %vm3112_vm11, %v9928_v30  ;;  %vm3114_vm15 = vcmp.eq.s32.totalorder %v6559_v7, %v3027_v4  ;;  %v2346_v17 = vpop.f32.mrf.mxu1  ;;  %vm3113_vm0 = vcmp.eq.s32.totalorder %v6554_v0, %v3027_v4  ;;  %vm3405_vm11 = vcmp.eq.s32.totalorder %v6554_v0, %v3321_v43 }
 0x2b3   : > { %5536 = vmatmul.mubr.msk.f32.gmra.mxu0 %vm3111_vm12, %v9928_v30  ;;  %v2347_v9 = vadd.f32 %v2346_v17, %v9051_v10  ;;  %5807 = vset.pattern.permute.xlu0 %v9935_v28  ;;  %vm3122_vm12 = vcmp.eq.s32.totalorder %v6559_v7, %v9452_v61 }
 0x2b4   : > { %5598 = vmatmul.mubr.msk.f32.gmra.mxu1 %vm3397_vm13, %v9928_v30  ;;  %5537 = vmatprep.mubr.msk.f32.mxu0 %vm3114_vm15, %v9928_v30  ;;  %v2348_v3 = vpop.f32.mrf.mxu1  ;;  %vm3121_vm15 = vcmp.eq.s32.totalorder %v6554_v0, %v9452_v61 }
 0x2b5   : > { %3080 = vperm.xlu1 %5801, %v5994_v24   ;;  %5599 = vmatprep.mubr.msk.f32.mxu1 %vm3400_vm14, %v9928_v30  ;;  %2389 = vst [vmem:[%s8678_s29 + $0xe8] sm:$0xff] %v2347_v9 }
 0x2b6   : > { %v3315_v10 = vpop.permute.xlu1 %3314  ;;  %v9454_v57 = vpop.f32.mrf.mxu0  ;;  %3092 = vperm.xlu0 %5807, %v9457_v33  }
 0x2b7   : > { %5538 = vmatmul.mubr.msk.f32.gmra.mxu0 %vm3113_vm0, %v9928_v30  ;;  %vm3402_vm3 = vcmp.eq.s32.totalorder %v6559_v7, %v3315_v10  ;;  %vm3401_vm5 = vcmp.eq.s32.totalorder %v6554_v0, %v3315_v10 }
 0x2b8   : > { %5600 = vmatmul.mubr.msk.f32.gmra.mxu1 %vm3399_vm1, %v9928_v30  ;;  %5539 = vmatprep.mubr.msk.f32.mxu0 %vm3116_vm2, %v9928_v30  ;;  %v2351_v19 = vpop.f32.mrf.mxu1  ;;  %v3685_v45 = vpop.f32.mrf.mxu0 }
 0x2b9   : > { %5802 = vset.pattern.permute.xlu1 %v9936_v35  ;;  %v2352_v25 = vadd.f32 %v2351_v19, %v9077_v59  ;;  %5601 = vmatprep.mubr.msk.f32.mxu1 %vm3402_vm3, %v9928_v30 }
 0x2ba   : > { %3368 = vperm.xlu1 %5802, %v5994_v24   ;;  %v3318_v11 = vpop.permute.xlu1 %3317  ;;  %v2353_v31 = vpop.f32.mrf.mxu1  ;;  %5809 = vset.pattern.permute.xlu0 %v9936_v35 }
 0x2bb   : > { %2390 = vst [vmem:[%s8678_s29 + $0xf0] sm:$0xff] %v2352_v25  ;;  %5540 = vmatmul.mubr.msk.f32.gmra.mxu0 %vm3115_vm4, %v9928_v30  ;;  %vm3404_vm6 = vcmp.eq.s32.totalorder %v6559_v7, %v3318_v11  ;;  %3383 = vperm.xlu0 %5809, %v9474_v39   ;;  %vm3403_vm7 = vcmp.eq.s32.totalorder %v6554_v0, %v3318_v11 }
 0x2bc   : > { %5602 = vmatmul.mubr.msk.f32.gmra.mxu1 %vm3401_vm5, %v9928_v30  ;;  %v9478_v59 = vpop.f32.mrf.mxu0 }
 0x2bd   : > { %v2356_v44 = vpop.f32.mrf.mxu1  ;;  %5603 = vmatprep.mubr.msk.f32.mxu1 %vm3404_vm6, %v9928_v30 }
 0x2be   : > { %3371 = vperm.xlu1 %5802, %v9407_v32   ;;  %v2357_v48 = vadd.f32 %v2356_v44, %v9108_v42  ;;  %v3690_v16 = vpop.f32.mrf.mxu0 }
 0x2bf   : > { %v2358_v14 = vpop.f32.mrf.mxu1  ;;  %v3033_v2 = vpop.permute.xlu1 %3032 }
 0x2c0   : > { %2391 = vst [vmem:[%s8678_s29 + $0xf8] sm:$0xff] %v2357_v48  ;;  %5604 = vmatmul.mubr.msk.f32.gmra.mxu1 %vm3403_vm7, %v9928_v30  ;;  %vm3117_vm9 = vcmp.eq.s32.totalorder %v6554_v0, %v3033_v2  ;;  %vm3118_vm10 = vcmp.eq.s32.totalorder %v6559_v7, %v3033_v2  ;;  %v9489_v21 = vpop.f32.mrf.mxu0 }
 0x2c1   : > { %5541 = vmatprep.mubr.msk.f32.mxu0 %vm3118_vm10, %v9928_v30  ;;  %5605 = vmatprep.mubr.msk.f32.mxu1 %vm3406_vm8, %v9928_v30  ;;  %v3330_v49 = vpop.permute.xlu0 %3329 }
 0x2c2   : > { %5804 = vset.pattern.permute.xlu1 %v9935_v28  ;;  %v9495_v42 = vpop.f32.mrf.mxu1  ;;  %v3695_v54 = vpop.f32.mrf.mxu0  ;;  %5542 = vmatmul.mubr.msk.f32.gmra.mxu0 %vm3117_vm9, %v9928_v30  ;;  %vm3412_vm4 = vcmp.eq.s32.totalorder %v6559_v7, %v3330_v49  ;;  %vm3411_vm5 = vcmp.eq.s32.totalorder %v6554_v0, %v3330_v49 }
 0x2c3   : > { %3086 = vperm.xlu1 %5804, %v9428_v37   ;;  %v3036_v62 = vpop.permute.xlu1 %3035 }
 0x2c4   : > { %v3870_v5 = vpop.f32.mrf.mxu1  ;;  %vm3119_vm13 = vcmp.eq.s32.totalorder %v6554_v0, %v3036_v62  ;;  %vm3120_vm14 = vcmp.eq.s32.totalorder %v6559_v7, %v3036_v62  ;;  %5606 = vmatmul.mubr.msk.f32.gmra.mxu1 %vm3405_vm11, %v9928_v30 }
 0x2c5   : > { %5543 = vmatprep.mubr.msk.f32.mxu0 %vm3120_vm14, %v9928_v30  ;;  %v9505_v1 = vpop.f32.mrf.mxu0 }
 0x2c6   : > { %v9507_v38 = vpop.f32.mrf.mxu1  ;;  %5544 = vmatmul.mubr.msk.f32.gmra.mxu0 %vm3119_vm13, %v9928_v30 }
 0x2c7   : > { %3089 = vperm.xlu1 %5804, %v5997_v20   ;;  %5545 = vmatprep.mubr.msk.f32.mxu0 %vm3122_vm12, %v9928_v30  ;;  %v3700_v52 = vpop.f32.mrf.mxu0 }
 0x2c8   : > { %v3875_v63 = vpop.f32.mrf.mxu1  ;;  %v3324_v40 = vpop.permute.xlu1 %3323 }
 0x2c9   : > { %vm3407_vm0 = vcmp.eq.s32.totalorder %v6554_v0, %v3324_v40  ;;  %vm3408_vm1 = vcmp.eq.s32.totalorder %v6559_v7, %v3324_v40  ;;  %v9516_v58 = vpop.f32.mrf.mxu0 }
 0x2ca   : > { %v3878_v60 = vpop.f32.mrf.mxu1  ;;  %5546 = vmatmul.mubr.msk.f32.gmra.mxu0 %vm3121_vm15, %v9928_v30  ;;  %5607 = vmatprep.mubr.msk.f32.mxu1 %vm3408_vm1, %v9928_v30 }
 0x2cb   : > { %5806 = vset.pattern.permute.xlu1 %v9936_v35  ;;  %v9522_v13 = vadd.f32 %v3878_v60, %v9234_v36  ;;  %5608 = vmatmul.mubr.msk.f32.gmra.mxu1 %vm3407_vm0, %v9928_v30  ;;  %v3705_v56 = vpop.f32.mrf.mxu0 }
 0x2cc   : > { %3377 = vperm.xlu1 %5806, %v5997_v20   ;;  %v3880_v47 = vpop.f32.mrf.mxu1  ;;  %v3327_v12 = vpop.permute.xlu1 %3326 }
 0x2cd   : > { %vm3409_vm2 = vcmp.eq.s32.totalorder %v6554_v0, %v3327_v12  ;;  %vm3410_vm3 = vcmp.eq.s32.totalorder %v6559_v7, %v3327_v12  ;;  %v9527_v32 = vpop.f32.mrf.mxu0 }
 0x2ce   : > { %v3883_v50 = vpop.f32.mrf.mxu1  ;;  %5609 = vmatprep.mubr.msk.f32.mxu1 %vm3410_vm3, %v9928_v30 }
 0x2cf   : > { %v9532_v35 = vadd.f32 %v3883_v50, %v9287_v27  ;;  %5610 = vmatmul.mubr.msk.f32.gmra.mxu1 %vm3409_vm2, %v9928_v30  ;;  %v3710_v36 = vpop.f32.mrf.mxu0 }
 0x2d0   : > { %3380 = vperm.xlu1 %5806, %v9457_v33   ;;  %v3885_v41 = vpop.f32.mrf.mxu1  ;;  %5611 = vmatprep.mubr.msk.f32.mxu1 %vm3412_vm4, %v9928_v30 }
 0x2d1   : > { %v3042_v18 = vpop.permute.xlu1 %3041  ;;  %v9538_v22 = vpop.f32.mrf.mxu0 }
 0x2d2   : > { %v3888_v29 = vpop.f32.mrf.mxu1  ;;  %vm3123_vm6 = vcmp.eq.s32.totalorder %v6554_v0, %v3042_v18  ;;  %vm3124_vm7 = vcmp.eq.s32.totalorder %v6559_v7, %v3042_v18 }
 0x2d3   : > { %v9543_v27 = vadd.f32 %v3888_v29, %v9313_v15  ;;  %5547 = vmatprep.mubr.msk.f32.mxu0 %vm3124_vm7, %v9928_v30  ;;  %5612 = vmatmul.mubr.msk.f32.gmra.mxu1 %vm3411_vm5, %v9928_v30  ;;  %v3048_v23 = vpop.permute.xlu0 %3047  ;;  %v3715_v55 = vpop.f32.mrf.mxu0 }
 0x2d4   : > { %5808 = vset.pattern.permute.xlu1 %v9935_v28  ;;  %v3890_v37 = vpop.f32.mrf.mxu1  ;;  %5548 = vmatmul.mubr.msk.f32.gmra.mxu0 %vm3123_vm6, %v9928_v30  ;;  %vm3128_vm10 = vcmp.eq.s32.totalorder %v6559_v7, %v3048_v23  ;;  %vm3127_vm11 = vcmp.eq.s32.totalorder %v6554_v0, %v3048_v23 }
 0x2d5   : > { %3095 = vperm.xlu1 %5808, %v9474_v39   ;;  %v3045_v51 = vpop.permute.xlu1 %3044  ;;  %v9550_v4 = vpop.f32.mrf.mxu0 }
 0x2d6   : > { %v3893_v6 = vpop.f32.mrf.mxu1  ;;  %vm3125_vm8 = vcmp.eq.s32.totalorder %v6554_v0, %v3045_v51  ;;  %vm3126_vm9 = vcmp.eq.s32.totalorder %v6559_v7, %v3045_v51 }
 0x2d7   : > { %v9556_v15 = vadd.f32 %v3893_v6, %v9375_v34  ;;  %5549 = vmatprep.mubr.msk.f32.mxu0 %vm3126_vm9, %v9928_v30  ;;  %v3720_v28 = vpop.f32.mrf.mxu0 }
 0x2d8   : > { %v3895_v17 = vpop.f32.mrf.mxu1  ;;  %5550 = vmatmul.mubr.msk.f32.gmra.mxu0 %vm3125_vm8, %v9928_v30 }
 0x2d9   : > { %5551 = vmatprep.mubr.msk.f32.mxu0 %vm3128_vm10, %v9928_v30  ;;  %v9562_v9 = vpop.f32.mrf.mxu0 }
 0x2da   : > { %v3898_v3 = vpop.f32.mrf.mxu1  ;;  %v3333_v24 = vpop.permute.xlu1 %3332 }
 0x2db   : > { %v9565_v61 = vadd.f32 %v3898_v3, %v9395_v26  ;;  %vm3413_vm12 = vcmp.eq.s32.totalorder %v6554_v0, %v3333_v24  ;;  %vm3414_vm13 = vcmp.eq.s32.totalorder %v6559_v7, %v3333_v24  ;;  %v3725_v34 = vpop.f32.mrf.mxu0 }
 0x2dc   : > { %v3900_v10 = vpop.f32.mrf.mxu1  ;;  %5552 = vmatmul.mubr.msk.f32.gmra.mxu0 %vm3127_vm11, %v9928_v30  ;;  %5613 = vmatprep.mubr.msk.f32.mxu1 %vm3414_vm13, %v9928_v30 }
 0x2dd   : > { %5614 = vmatmul.mubr.msk.f32.gmra.mxu1 %vm3413_vm12, %v9928_v30 }
 0x2de   : > { %v3903_v33 = vpop.f32.mrf.mxu1  ;;  %v3336_v19 = vpop.permute.xlu1 %3335 }
 0x2df   : > { %v9573_v45 = vadd.f32 %v3903_v33, %v9417_v46  ;;  %vm3415_vm14 = vcmp.eq.s32.totalorder %v6554_v0, %v3336_v19  ;;  %vm3416_vm15 = vcmp.eq.s32.totalorder %v6559_v7, %v3336_v19  ;;  %v9577_v26 = vpop.f32.mrf.mxu0 }
 0x2e0   : > { %v3905_v25 = vpop.f32.mrf.mxu1  ;;  %5615 = vmatprep.mubr.msk.f32.mxu1 %vm3416_vm15, %v9928_v30 }
 0x2e1   : > { %5616 = vmatmul.mubr.msk.f32.gmra.mxu1 %vm3415_vm14, %v9928_v30  ;;  %v3730_v11 = vpop.f32.mrf.mxu0  ;;  %v3057_v46 = vpop.permute.xlu0 %3056 }
 0x2e2   : > { %v3908_v31 = vpop.f32.mrf.mxu1  ;;  %vm3134_vm4 = vcmp.eq.s32.totalorder %v6559_v7, %v3057_v46  ;;  %vm3133_vm7 = vcmp.eq.s32.totalorder %v6554_v0, %v3057_v46 }
 0x2e3   : > { %v9582_v39 = vadd.f32 %v3908_v31, %v9454_v57  ;;  %v9584_v43 = vpop.f32.mrf.mxu0 }
 0x2e4   : > { %v3910_v44 = vpop.f32.mrf.mxu1 }
 0x2e5   : > { %v3735_v48 = vpop.f32.mrf.mxu0 }
 0x2e6   : > { %v3051_v16 = vpop.permute.xlu1 %3050  ;;  %v3913_v14 = vpop.f32.mrf.mxu1 }
 0x2e7   : > { %vm3129_vm0 = vcmp.eq.s32.totalorder %v6554_v0, %v3051_v16  ;;  %vm3130_vm1 = vcmp.eq.s32.totalorder %v6559_v7, %v3051_v16  ;;  %v9589_v2 = vadd.f32 %v3913_v14, %v9478_v59  ;;  %v9591_v54 = vpop.f32.mrf.mxu0 }
 0x2e8   : > { %5553 = vmatprep.mubr.msk.f32.mxu0 %vm3130_vm1, %v9928_v30  ;;  %v3915_v57 = vpop.f32.mrf.mxu1 }
 0x2e9   : > { %5554 = vmatmul.mubr.msk.f32.gmra.mxu0 %vm3129_vm0, %v9928_v30  ;;  %v3740_v62 = vpop.f32.mrf.mxu0 }
 0x2ea   : > { %v3339_v5 = vpop.permute.xlu0 %3338  ;;  %v3918_v20 = vpop.f32.mrf.mxu1 }
 0x2eb   : > { %vm3417_vm2 = vcmp.eq.s32.totalorder %v6554_v0, %v3339_v5  ;;  %vm3418_vm3 = vcmp.eq.s32.totalorder %v6559_v7, %v3339_v5  ;;  %v9598_v52 = vadd.f32 %v3918_v20, %v9489_v21  ;;  %v9600_v63 = vpop.f32.mrf.mxu0 }
 0x2ec   : > { %5617 = vmatprep.mubr.msk.f32.mxu1 %vm3418_vm3, %v9928_v30  ;;  %v3920_v59 = vpop.f32.mrf.mxu1 }
 0x2ed   : > { %5618 = vmatmul.mubr.msk.f32.gmra.mxu1 %vm3417_vm2, %v9928_v30  ;;  %v3745_v40 = vpop.f32.mrf.mxu0 }
 0x2ee   : > { %v3054_v60 = vpop.permute.xlu1 %3053  ;;  %v3923_v49 = vpop.f32.mrf.mxu1 }
 0x2ef   : > { %vm3131_vm5 = vcmp.eq.s32.totalorder %v6554_v0, %v3054_v60  ;;  %vm3132_vm6 = vcmp.eq.s32.totalorder %v6559_v7, %v3054_v60  ;;  %v9608_v56 = vadd.f32 %v3923_v49, %v9505_v1 }
 0x2f0   : > { %5555 = vmatprep.mubr.msk.f32.mxu0 %vm3132_vm6, %v9928_v30  ;;  %v3925_v21 = vpop.f32.mrf.mxu1 }
 0x2f1   : > { %5556 = vmatmul.mubr.msk.f32.gmra.mxu0 %vm3131_vm5, %v9928_v30 }
 0x2f2   : > { %5557 = vmatprep.mubr.msk.f32.mxu0 %vm3134_vm4, %v9928_v30  ;;  %v3928_v47 = vpop.f32.mrf.mxu1 }
 0x2f3   : > { %v9615_v12 = vadd.f32 %v3928_v47, %v9516_v58 }
 0x2f4   : > { %v3930_v50 = vpop.f32.mrf.mxu1 }
 0x2f5   : > { %v3342_v36 = vpop.permute.xlu1 %3341  ;;  %5558 = vmatmul.mubr.msk.f32.gmra.mxu0 %vm3133_vm7, %v9928_v30 }
 0x2f6   : > { %vm3419_vm8 = vcmp.eq.s32.totalorder %v6554_v0, %v3342_v36  ;;  %vm3420_vm9 = vcmp.eq.s32.totalorder %v6559_v7, %v3342_v36  ;;  %v3933_v1 = vpop.f32.mrf.mxu1 }
 0x2f7   : > { %5619 = vmatprep.mubr.msk.f32.mxu1 %vm3420_vm9, %v9928_v30  ;;  %v9622_v41 = vadd.f32 %v3933_v1, %v9527_v32 }
 0x2f8   : > { %5620 = vmatmul.mubr.msk.f32.gmra.mxu1 %vm3419_vm8, %v9928_v30  ;;  %v3935_v18 = vpop.f32.mrf.mxu1 }
 0x2f9   : > { %v9625_v29 = vpop.f32.mrf.mxu0 }
 0x2fa   : > { %v3938_v58 = vpop.f32.mrf.mxu1 }
 0x2fb   : > { %v9628_v23 = vadd.f32 %v3938_v58, %v9538_v22  ;;  %v3750_v55 = vpop.f32.mrf.mxu0 }
 0x2fc   : > { %v3345_v37 = vpop.permute.xlu1 %3344  ;;  %v3940_v51 = vpop.f32.mrf.mxu1 }
 0x2fd   : > { %vm3421_vm10 = vcmp.eq.s32.totalorder %v6554_v0, %v3345_v37  ;;  %vm3422_vm11 = vcmp.eq.s32.totalorder %v6559_v7, %v3345_v37 }
 0x2fe   : > { %5621 = vmatprep.mubr.msk.f32.mxu1 %vm3422_vm11, %v9928_v30  ;;  %v3943_v32 = vpop.f32.mrf.mxu1 }
 0x2ff   : > { %5622 = vmatmul.mubr.msk.f32.gmra.mxu1 %vm3421_vm10, %v9928_v30  ;;  %v9635_v6 = vadd.f32 %v3943_v32, %v9550_v4 }
 0x300   : > { %v3945_v28 = vpop.f32.mrf.mxu1  ;;  %v9637_v17 = vpop.f32.mrf.mxu0 }
 0x302   : > { %v3948_v22 = vpop.f32.mrf.mxu1  ;;  %v3755_v3 = vpop.f32.mrf.mxu0 }
 0x303   : > { %v9640_v24 = vadd.f32 %v3948_v22, %v9562_v9 }
 0x304   : > { %v3060_v34 = vpop.permute.xlu1 %3059  ;;  %v3950_v10 = vpop.f32.mrf.mxu1 }
 0x305   : > { %vm3135_vm12 = vcmp.eq.s32.totalorder %v6554_v0, %v3060_v34  ;;  %vm3136_vm13 = vcmp.eq.s32.totalorder %v6559_v7, %v3060_v34 }
 0x306   : > { %5559 = vmatprep.mubr.msk.f32.mxu0 %vm3136_vm13, %v9928_v30  ;;  %v3953_v33 = vpop.f32.mrf.mxu1 }
 0x307   : > { %v3348_v19 = vpop.permute.xlu0 %3347  ;;  %5560 = vmatmul.mubr.msk.f32.gmra.mxu0 %vm3135_vm12, %v9928_v30  ;;  %v9647_v4 = vadd.f32 %v3953_v33, %v9577_v26 }
 0x308   : > { %vm3423_vm14 = vcmp.eq.s32.totalorder %v6554_v0, %v3348_v19  ;;  %vm3424_vm15 = vcmp.eq.s32.totalorder %v6559_v7, %v3348_v19  ;;  %v3955_v9 = vpop.f32.mrf.mxu1 }
 0x309   : > { %5623 = vmatprep.mubr.msk.f32.mxu1 %vm3424_vm15, %v9928_v30 }
 0x30a   : > { %v3063_v25 = vpop.permute.xlu1 %3062  ;;  %5624 = vmatmul.mubr.msk.f32.gmra.mxu1 %vm3423_vm14, %v9928_v30  ;;  %v3958_v11 = vpop.f32.mrf.mxu1 }
 0x30b   : > { %vm3137_vm0 = vcmp.eq.s32.totalorder %v6554_v0, %v3063_v25  ;;  %vm3138_vm1 = vcmp.eq.s32.totalorder %v6559_v7, %v3063_v25  ;;  %v9656_v31 = vadd.f32 %v3958_v11, %v9584_v43  ;;  %v3758_v26 = vpop.f32.mrf.mxu0 }
 0x30c   : > { %5561 = vmatprep.mubr.msk.f32.mxu0 %vm3138_vm1, %v9928_v30  ;;  %v3960_v46 = vpop.f32.mrf.mxu1 }
 0x30d   : > { %5562 = vmatmul.mubr.msk.f32.gmra.mxu0 %vm3137_vm0, %v9928_v30  ;;  %v3760_v44 = vpop.f32.mrf.mxu0 }
 0x30e   : > { %v3963_v48 = vpop.f32.mrf.mxu1 }
 0x30f   : > { %v9661_v16 = vadd.f32 %v3963_v48, %v9591_v54 }
 0x310   : > { %v3066_v14 = vpop.permute.xlu0 %3065  ;;  %v3965_v57 = vpop.f32.mrf.mxu1 }
 0x311   : > { %vm3139_vm2 = vcmp.eq.s32.totalorder %v6554_v0, %v3066_v14  ;;  %vm3140_vm3 = vcmp.eq.s32.totalorder %v6559_v7, %v3066_v14  ;;  %v3351_v62 = vpop.permute.xlu1 %3350  ;;  %v3763_v43 = vpop.f32.mrf.mxu0 }
 0x312   : > { %vm3425_vm4 = vcmp.eq.s32.totalorder %v6554_v0, %v3351_v62  ;;  %vm3426_vm5 = vcmp.eq.s32.totalorder %v6559_v7, %v3351_v62  ;;  %5563 = vmatprep.mubr.msk.f32.mxu0 %vm3140_vm3, %v9928_v30  ;;  %v3968_v5 = vpop.f32.mrf.mxu1 }
 0x313   : > { %5564 = vmatmul.mubr.msk.f32.gmra.mxu0 %vm3139_vm2, %v9928_v30  ;;  %5625 = vmatprep.mubr.msk.f32.mxu1 %vm3426_vm5, %v9928_v30  ;;  %v9671_v54 = vadd.f32 %v3968_v5, %v9600_v63  ;;  %v3765_v20 = vpop.f32.mrf.mxu0 }
 0x314   : > { %5626 = vmatmul.mubr.msk.f32.gmra.mxu1 %vm3425_vm4, %v9928_v30  ;;  %v3075_v59 = vpop.permute.xlu0 %3074  ;;  %v3970_v40 = vpop.f32.mrf.mxu1 }
 0x315   : > { %v3354_v60 = vpop.permute.xlu1 %3353  ;;  %v3768_v49 = vpop.f32.mrf.mxu0  ;;  %vm3146_vm12 = vcmp.eq.s32.totalorder %v6559_v7, %v3075_v59  ;;  %vm3145_vm15 = vcmp.eq.s32.totalorder %v6554_v0, %v3075_v59 }
 0x316   : > { %vm3427_vm6 = vcmp.eq.s32.totalorder %v6554_v0, %v3354_v60  ;;  %vm3428_vm7 = vcmp.eq.s32.totalorder %v6559_v7, %v3354_v60  ;;  %v3973_v21 = vpop.f32.mrf.mxu1 }
 0x317   : > { %5627 = vmatprep.mubr.msk.f32.mxu1 %vm3428_vm7, %v9928_v30  ;;  %v9678_v47 = vadd.f32 %v3973_v21, %v9625_v29  ;;  %v3770_v50 = vpop.f32.mrf.mxu0 }
 0x318   : > { %5628 = vmatmul.mubr.msk.f32.gmra.mxu1 %vm3427_vm6, %v9928_v30  ;;  %v3975_v63 = vpop.f32.mrf.mxu1 }
 0x319   : > { %v3357_v36 = vpop.permute.xlu0 %3356 }
 0x31a   : > { %v3069_v1 = vpop.permute.xlu1 %3068  ;;  %vm3429_vm8 = vcmp.eq.s32.totalorder %v6554_v0, %v3357_v36  ;;  %vm3430_vm9 = vcmp.eq.s32.totalorder %v6559_v7, %v3357_v36  ;;  %v3978_v18 = vpop.f32.mrf.mxu1 }
 0x31b   : > { %vm3141_vm10 = vcmp.eq.s32.totalorder %v6554_v0, %v3069_v1  ;;  %vm3142_vm11 = vcmp.eq.s32.totalorder %v6559_v7, %v3069_v1  ;;  %5629 = vmatprep.mubr.msk.f32.mxu1 %vm3430_vm9, %v9928_v30  ;;  %v9687_v29 = vadd.f32 %v3978_v18, %v9637_v17 }
 0x31c   : > { %5565 = vmatprep.mubr.msk.f32.mxu0 %vm3142_vm11, %v9928_v30  ;;  %5630 = vmatmul.mubr.msk.f32.gmra.mxu1 %vm3429_vm8, %v9928_v30  ;;  %v3980_v58 = vpop.f32.mrf.mxu1 }
 0x31d   : > { %5566 = vmatmul.mubr.msk.f32.gmra.mxu0 %vm3141_vm10, %v9928_v30  ;;  %v3366_v33 = vpop.permute.xlu0 %3365 }
 0x31e   : > { %v3072_v55 = vpop.permute.xlu1 %3071  ;;  %v3983_v37 = vpop.f32.mrf.mxu1  ;;  %vm3436_vm4 = vcmp.eq.s32.totalorder %v6559_v7, %v3366_v33  ;;  %vm3435_vm5 = vcmp.eq.s32.totalorder %v6554_v0, %v3366_v33 }
 0x31f   : > { %vm3143_vm13 = vcmp.eq.s32.totalorder %v6554_v0, %v3072_v55  ;;  %vm3144_vm14 = vcmp.eq.s32.totalorder %v6559_v7, %v3072_v55  ;;  %v9695_v51 = vadd.f32 %v3983_v37, %v3758_v26 }
 0x320   : > { %5567 = vmatprep.mubr.msk.f32.mxu0 %vm3144_vm14, %v9928_v30  ;;  %v3985_v32 = vpop.f32.mrf.mxu1 }
 0x321   : > { %5568 = vmatmul.mubr.msk.f32.gmra.mxu0 %vm3143_vm13, %v9928_v30  ;;  %v3773_v28 = vpop.f32.mrf.mxu0 }
 0x322   : > { %5569 = vmatprep.mubr.msk.f32.mxu0 %vm3146_vm12, %v9928_v30  ;;  %v3988_v17 = vpop.f32.mrf.mxu1 }
 0x323   : > { %v3360_v22 = vpop.permute.xlu1 %3359  ;;  %v9701_v3 = vadd.f32 %v3988_v17, %v3763_v43  ;;  %v3775_v34 = vpop.f32.mrf.mxu0 }
 0x324   : > { %vm3431_vm0 = vcmp.eq.s32.totalorder %v6554_v0, %v3360_v22  ;;  %vm3432_vm1 = vcmp.eq.s32.totalorder %v6559_v7, %v3360_v22  ;;  %v3990_v10 = vpop.f32.mrf.mxu1 }
 0x325   : > { %5570 = vmatmul.mubr.msk.f32.gmra.mxu0 %vm3145_vm15, %v9928_v30  ;;  %5631 = vmatprep.mubr.msk.f32.mxu1 %vm3432_vm1, %v9928_v30  ;;  %v3084_v57 = vpop.permute.xlu0 %3083 }
 0x326   : > { %5632 = vmatmul.mubr.msk.f32.gmra.mxu1 %vm3431_vm0, %v9928_v30  ;;  %v3993_v19 = vpop.f32.mrf.mxu1  ;;  %vm3152_vm10 = vcmp.eq.s32.totalorder %v6559_v7, %v3084_v57  ;;  %vm3151_vm11 = vcmp.eq.s32.totalorder %v6554_v0, %v3084_v57 }
 0x327   : > { %v3363_v9 = vpop.permute.xlu1 %3362  ;;  %v9708_v25 = vadd.f32 %v3993_v19, %v3768_v49 }
 0x328   : > { %vm3433_vm2 = vcmp.eq.s32.totalorder %v6554_v0, %v3363_v9  ;;  %vm3434_vm3 = vcmp.eq.s32.totalorder %v6559_v7, %v3363_v9  ;;  %v3995_v11 = vpop.f32.mrf.mxu1 }
 0x329   : > { %5633 = vmatprep.mubr.msk.f32.mxu1 %vm3434_vm3, %v9928_v30 }
 0x32a   : > { %5634 = vmatmul.mubr.msk.f32.gmra.mxu1 %vm3433_vm2, %v9928_v30  ;;  %v3778_v26 = vpop.f32.mrf.mxu0  ;;  %v3375_v21 = vpop.permute.xlu0 %3374 }
 0x32b   : > { %5635 = vmatprep.mubr.msk.f32.mxu1 %vm3436_vm4, %v9928_v30  ;;  %vm3442_vm0 = vcmp.eq.s32.totalorder %v6559_v7, %v3375_v21  ;;  %vm3441_vm1 = vcmp.eq.s32.totalorder %v6554_v0, %v3375_v21 }
 0x32c   : > { %v3078_v46 = vpop.permute.xlu1 %3077  ;;  %v3998_v44 = vpop.f32.mrf.mxu1 }
 0x32d   : > { %vm3147_vm6 = vcmp.eq.s32.totalorder %v6554_v0, %v3078_v46  ;;  %vm3148_vm7 = vcmp.eq.s32.totalorder %v6559_v7, %v3078_v46  ;;  %v9719_v48 = vadd.f32 %v3998_v44, %v3773_v28  ;;  %v3780_v14 = vpop.f32.mrf.mxu0 }
 0x32e   : > { %5571 = vmatprep.mubr.msk.f32.mxu0 %vm3148_vm7, %v9928_v30  ;;  %5636 = vmatmul.mubr.msk.f32.gmra.mxu1 %vm3435_vm5, %v9928_v30  ;;  %v4000_v62 = vpop.f32.mrf.mxu1 }
 0x32f   : > { %5572 = vmatmul.mubr.msk.f32.gmra.mxu0 %vm3147_vm6, %v9928_v30 }
 0x330   : > { %v3081_v43 = vpop.permute.xlu1 %3080 }
 0x331   : > { %vm3149_vm8 = vcmp.eq.s32.totalorder %v6554_v0, %v3081_v43  ;;  %vm3150_vm9 = vcmp.eq.s32.totalorder %v6559_v7, %v3081_v43  ;;  %v3783_v5 = vpop.f32.mrf.mxu0  ;;  %v3093_v37 = vpop.permute.xlu0 %3092 }
 0x332   : > { %5573 = vmatprep.mubr.msk.f32.mxu0 %vm3150_vm9, %v9928_v30  ;;  %vm3158_vm6 = vcmp.eq.s32.totalorder %v6559_v7, %v3093_v37  ;;  %vm3157_vm7 = vcmp.eq.s32.totalorder %v6554_v0, %v3093_v37 }
 0x333   : > { %5574 = vmatmul.mubr.msk.f32.gmra.mxu0 %vm3149_vm8, %v9928_v30  ;;  %v4003_v20 = vpop.f32.mrf.mxu1  ;;  %v3785_v59 = vpop.f32.mrf.mxu0 }
 0x334   : > { %5575 = vmatprep.mubr.msk.f32.mxu0 %vm3152_vm10, %v9928_v30  ;;  %v9731_v40 = vadd.f32 %v4003_v20, %v3778_v26 }
 0x335   : > { %v3369_v60 = vpop.permute.xlu1 %3368  ;;  %v4005_v49 = vpop.f32.mrf.mxu1 }
 0x336   : > { %vm3437_vm12 = vcmp.eq.s32.totalorder %v6554_v0, %v3369_v60  ;;  %vm3438_vm13 = vcmp.eq.s32.totalorder %v6559_v7, %v3369_v60  ;;  %v3384_v11 = vpop.permute.xlu0 %3383  ;;  %v3869_v60 = vadd.f32 %v9495_v42, %v9174_v53 }
 0x337   : > { %5576 = vmatmul.mubr.msk.f32.gmra.mxu0 %vm3151_vm11, %v9928_v30  ;;  %5637 = vmatprep.mubr.msk.f32.mxu1 %vm3438_vm13, %v9928_v30  ;;  %vm3447_vm13 = vcmp.eq.s32.totalorder %v6554_v0, %v3384_v11 }
 0x338   : > { %5638 = vmatmul.mubr.msk.f32.gmra.mxu1 %vm3437_vm12, %v9928_v30  ;;  %vm3448_vm12 = vcmp.eq.s32.totalorder %v6559_v7, %v3384_v11 }
 0x339   : > { %v3372_v50 = vpop.permute.xlu1 %3371  ;;  %v4008_v63 = vpop.f32.mrf.mxu1 }
 0x33a   : > { %vm3439_vm14 = vcmp.eq.s32.totalorder %v6554_v0, %v3372_v50  ;;  %vm3440_vm15 = vcmp.eq.s32.totalorder %v6559_v7, %v3372_v50  ;;  %v9741_v36 = vadd.f32 %v4008_v63, %v3783_v5 }
 0x33b   : > { %5639 = vmatprep.mubr.msk.f32.mxu1 %vm3440_vm15, %v9928_v30  ;;  %v4010_v1 = vpop.f32.mrf.mxu1 }
 0x33c   : > { %5640 = vmatmul.mubr.msk.f32.gmra.mxu1 %vm3439_vm14, %v9928_v30 }
 0x33d   : > { %5641 = vmatprep.mubr.msk.f32.mxu1 %vm3442_vm0, %v9928_v30 }
 0x33e   : > { %v3087_v18 = vpop.permute.xlu1 %3086 }
 0x33f   : > { %vm3153_vm2 = vcmp.eq.s32.totalorder %v6554_v0, %v3087_v18  ;;  %vm3154_vm3 = vcmp.eq.s32.totalorder %v6559_v7, %v3087_v18  ;;  %v3788_v58 = vpop.f32.mrf.mxu0  ;;  %v4013_v55 = vpop.f32.mrf.mxu1 }
 0x340   : > { %5577 = vmatprep.mubr.msk.f32.mxu0 %vm3154_vm3, %v9928_v30  ;;  %5642 = vmatmul.mubr.msk.f32.gmra.mxu1 %vm3441_vm1, %v9928_v30  ;;  %v9751_v32 = vadd.f32 %v4013_v55, %v3788_v58 }
 0x341   : > { %5578 = vmatmul.mubr.msk.f32.gmra.mxu0 %vm3153_vm2, %v9928_v30  ;;  %v4015_v28 = vpop.f32.mrf.mxu1  ;;  %v3790_v17 = vpop.f32.mrf.mxu0 }
 0x342   : > { %v3090_v22 = vpop.permute.xlu1 %3089 }
 0x343   : > { %vm3155_vm4 = vcmp.eq.s32.totalorder %v6554_v0, %v3090_v22  ;;  %vm3156_vm5 = vcmp.eq.s32.totalorder %v6559_v7, %v3090_v22 }
 0x344   : > { %5579 = vmatprep.mubr.msk.f32.mxu0 %vm3156_vm5, %v9928_v30 }
 0x345   : > { %5580 = vmatmul.mubr.msk.f32.gmra.mxu0 %vm3155_vm4, %v9928_v30 }
 0x346   : > { %5581 = vmatprep.mubr.msk.f32.mxu0 %vm3158_vm6, %v9928_v30 }
 0x347   : > { %v3378_v34 = vpop.permute.xlu1 %3377  ;;  %v3793_v10 = vpop.f32.mrf.mxu0 }
 0x348   : > { %vm3443_vm8 = vcmp.eq.s32.totalorder %v6554_v0, %v3378_v34  ;;  %vm3444_vm9 = vcmp.eq.s32.totalorder %v6559_v7, %v3378_v34  ;;  %v4018_v33 = vpop.f32.mrf.mxu1 }
 0x349   : > { %5582 = vmatmul.mubr.msk.f32.gmra.mxu0 %vm3157_vm7, %v9928_v30  ;;  %5643 = vmatprep.mubr.msk.f32.mxu1 %vm3444_vm9, %v9928_v30  ;;  %v9765_v19 = vadd.f32 %v4018_v33, %v3793_v10  ;;  %v3795_v9 = vpop.f32.mrf.mxu0 }
 0x34a   : > { %5644 = vmatmul.mubr.msk.f32.gmra.mxu1 %vm3443_vm8, %v9928_v30  ;;  %v4020_v26 = vpop.f32.mrf.mxu1 }
 0x34b   : > { %v3381_v46 = vpop.permute.xlu1 %3380 }
 0x34c   : > { %vm3445_vm10 = vcmp.eq.s32.totalorder %v6554_v0, %v3381_v46  ;;  %vm3446_vm11 = vcmp.eq.s32.totalorder %v6559_v7, %v3381_v46 }
 0x34d   : > { %5645 = vmatprep.mubr.msk.f32.mxu1 %vm3446_vm11, %v9928_v30  ;;  %v3798_v44 = vpop.f32.mrf.mxu0 }
 0x34e   : > { %5646 = vmatmul.mubr.msk.f32.gmra.mxu1 %vm3445_vm10, %v9928_v30 }
 0x34f   : > { %5647 = vmatprep.mubr.msk.f32.mxu1 %vm3448_vm12, %v9928_v30  ;;  %v3800_v14 = vpop.f32.mrf.mxu0 }
 0x350   : > { %v3096_v57 = vpop.permute.xlu1 %3095 }
 0x351   : > { %vm3159_vm14 = vcmp.eq.s32.totalorder %v6554_v0, %v3096_v57  ;;  %vm3160_vm15 = vcmp.eq.s32.totalorder %v6559_v7, %v3096_v57  ;;  %v3874_v0 = vadd.f32 %v9507_v38, %v9198_v8 }
 0x352   : > { %5583 = vmatprep.mubr.msk.f32.mxu0 %vm3160_vm15, %v9928_v30  ;;  %5648 = vmatmul.mubr.msk.f32.gmra.mxu1 %vm3447_vm13, %v9928_v30 }
 0x353   : > { %5584 = vmatmul.mubr.msk.f32.gmra.mxu0 %vm3159_vm14, %v9928_v30 }
 0x354   : > { %v4093_v62 = vpop.f32.mrf.mxu0 }
 0x355   : > { %v4094_v7 = vadd.f32 %v4093_v62, %v3869_v60 }
 0x356   : > { %v4023_v43 = vpop.f32.mrf.mxu1  ;;  %v4095_v5 = vpop.f32.mrf.mxu0 }
 0x357   : > { %v9780_v20 = vadd.f32 %v4023_v43, %v3798_v44 }
 0x358   : > { %v4025_v59 = vpop.f32.mrf.mxu1 }
 0x35b   : > { %v4098_v49 = vpop.f32.mrf.mxu0 }
 0x35c   : > { %v4318_v21 = vpop.f32.mrf.mxu1  ;;  %v4099_v63 = vadd.f32 %v4098_v49, %v3874_v0 }
 0x35d   : > { %v4319_v50 = vadd.f32 %v4318_v21, %v4094_v7  ;;  %v4100_v1 = vpop.f32.mrf.mxu0 }
 0x35e   : > { %v4320_v30 = vpop.f32.mrf.mxu1 }
 0x35f   : > { %5649 = vst [vmem:[%s8678_s29 + $0x100] sm:$0xff] %v4319_v50  ;;  %v4103_v18 = vpop.f32.mrf.mxu0 }
 0x360   : > { %v4323_v58 = vpop.f32.mrf.mxu1  ;;  %v4104_v53 = vadd.f32 %v4103_v18, %v9522_v13 }
 0x361   : > { %v4324_v55 = vadd.f32 %v4323_v58, %v4099_v63  ;;  %v4105_v37 = vpop.f32.mrf.mxu0 }
 0x362   : > { %v4325_v28 = vpop.f32.mrf.mxu1 }
 0x363   : > { %5650 = vst [vmem:[%s8678_s29 + $0x108] sm:$0xff] %v4324_v55  ;;  %v4108_v42 = vpop.f32.mrf.mxu0 }
 0x364   : > { %v4328_v8 = vpop.f32.mrf.mxu1  ;;  %v4109_v34 = vadd.f32 %v4108_v42, %v9532_v35 }
 0x365   : > { %v4329_v38 = vadd.f32 %v4328_v8, %v4104_v53  ;;  %v4110_v17 = vpop.f32.mrf.mxu0 }
 0x366   : > { %v4330_v22 = vpop.f32.mrf.mxu1 }
 0x367   : > { %5651 = vst [vmem:[%s8678_s29 + $0x110] sm:$0xff] %v4329_v38  ;;  %v4113_v10 = vpop.f32.mrf.mxu0 }
 0x368   : > { %v4333_v33 = vpop.f32.mrf.mxu1  ;;  %v4114_v11 = vadd.f32 %v4113_v10, %v9543_v27 }
 0x369   : > { %v4334_v9 = vadd.f32 %v4333_v33, %v4109_v34  ;;  %v4115_v26 = vpop.f32.mrf.mxu0 }
 0x36a   : > { %v4335_v46 = vpop.f32.mrf.mxu1 }
 0x36b   : > { %5652 = vst [vmem:[%s8678_s29 + $0x118] sm:$0xff] %v4334_v9  ;;  %v4118_v44 = vpop.f32.mrf.mxu0 }
 0x36c   : > { %v4338_v13 = vpop.f32.mrf.mxu1  ;;  %v4119_v43 = vadd.f32 %v4118_v44, %v9556_v15 }
 0x36d   : > { %v4339_v14 = vadd.f32 %v4338_v13, %v4114_v11  ;;  %v4120_v57 = vpop.f32.mrf.mxu0 }
 0x36e   : > { %v4340_v62 = vpop.f32.mrf.mxu1 }
 0x36f   : > { %5653 = vst [vmem:[%s8678_s29 + $0x120] sm:$0xff] %v4339_v14  ;;  %v4123_v35 = vpop.f32.mrf.mxu0 }
 0x370   : > { %v4343_v5 = vpop.f32.mrf.mxu1  ;;  %v4124_v27 = vadd.f32 %v4123_v35, %v9565_v61 }
 0x371   : > { %v4344_v59 = vadd.f32 %v4343_v5, %v4119_v43  ;;  %v4125_v60 = vpop.f32.mrf.mxu0 }
 0x372   : > { %v4345_v0 = vpop.f32.mrf.mxu1 }
 0x373   : > { %5654 = vst [vmem:[%s8678_s29 + $0x128] sm:$0xff] %v4344_v59  ;;  %v4128_v7 = vpop.f32.mrf.mxu0 }
 0x374   : > { %v4348_v49 = vpop.f32.mrf.mxu1  ;;  %v4129_v50 = vadd.f32 %v4128_v7, %v9573_v45 }
 0x375   : > { %v4349_v21 = vadd.f32 %v4348_v49, %v4124_v27  ;;  %v4130_v63 = vpop.f32.mrf.mxu0 }
 0x376   : > { %v4350_v1 = vpop.f32.mrf.mxu1 }
 0x377   : > { %5655 = vst [vmem:[%s8678_s29 + $0x130] sm:$0xff] %v4349_v21  ;;  %v4133_v30 = vpop.f32.mrf.mxu0 }
 0x378   : > { %v4353_v15 = vpop.f32.mrf.mxu1  ;;  %v4134_v37 = vadd.f32 %v4133_v30, %v9582_v39 }
 0x379   : > { %v4354_v18 = vadd.f32 %v4353_v15, %v4129_v50  ;;  %v4135_v58 = vpop.f32.mrf.mxu0 }
 0x37a   : > { %v4355_v55 = vpop.f32.mrf.mxu1 }
 0x37b   : > { %5656 = vst [vmem:[%s8678_s29 + $0x138] sm:$0xff] %v4354_v18  ;;  %v4138_v61 = vpop.f32.mrf.mxu0 }
 0x37c   : > { %v4358_v28 = vpop.f32.mrf.mxu1  ;;  %v4139_v45 = vadd.f32 %v4138_v61, %v9589_v2 }
 0x37d   : > { %v4359_v53 = vadd.f32 %v4358_v28, %v4134_v37  ;;  %v4140_v42 = vpop.f32.mrf.mxu0 }
 0x37e   : > { %v4360_v8 = vpop.f32.mrf.mxu1 }
 0x37f   : > { %5657 = vst [vmem:[%s8678_s29 + $0x140] sm:$0xff] %v4359_v53 }
 0x380   : > { %v4363_v38 = vpop.f32.mrf.mxu1 }
 0x381   : > { %v4364_v17 = vadd.f32 %v4363_v38, %v4139_v45 }
 0x382   : > { %v4365_v22 = vpop.f32.mrf.mxu1  ;;  %v4143_v34 = vpop.f32.mrf.mxu0 }
 0x383   : > { %5658 = vst [vmem:[%s8678_s29 + $0x148] sm:$0xff] %v4364_v17  ;;  %v4144_v10 = vadd.f32 %v4143_v34, %v9598_v52 }
 0x384   : > { %v4145_v33 = vpop.f32.mrf.mxu0  ;;  %v4368_v9 = vpop.f32.mrf.mxu1 }
 0x385   : > { %v4369_v39 = vadd.f32 %v4368_v9, %v4144_v10 }
 0x386   : > { %v4148_v11 = vpop.f32.mrf.mxu0  ;;  %v4370_v26 = vpop.f32.mrf.mxu1 }
 0x387   : > { %5659 = vst [vmem:[%s8678_s29 + $0x150] sm:$0xff] %v4369_v39  ;;  %v4149_v44 = vadd.f32 %v4148_v11, %v9608_v56 }
 0x388   : > { %v4150_v46 = vpop.f32.mrf.mxu0 }
 0x38a   : > { %v4153_v2 = vpop.f32.mrf.mxu0 }
 0x38b   : > { %v4373_v13 = vpop.f32.mrf.mxu1  ;;  %v4154_v43 = vadd.f32 %v4153_v2, %v9615_v12 }
 0x38c   : > { %v4374_v14 = vadd.f32 %v4373_v13, %v4149_v44  ;;  %v4155_v57 = vpop.f32.mrf.mxu0 }
 0x38d   : > { %v4375_v62 = vpop.f32.mrf.mxu1 }
 0x38e   : > { %5660 = vst [vmem:[%s8678_s29 + $0x158] sm:$0xff] %v4374_v14 }
 0x38f   : > { %v4378_v52 = vpop.f32.mrf.mxu1 }
 0x390   : > { %v4379_v35 = vadd.f32 %v4378_v52, %v4154_v43 }
 0x391   : > { %v4380_v5 = vpop.f32.mrf.mxu1 }
 0x392   : > { %5661 = vst [vmem:[%s8678_s29 + $0x160] sm:$0xff] %v4379_v35 }
 0x393   : > { %v4383_v59 = vpop.f32.mrf.mxu1 }
 0x394   : > { %v4158_v60 = vpop.f32.mrf.mxu0 }
 0x395   : > { %v4159_v0 = vadd.f32 %v4158_v60, %v9622_v41  ;;  %v4385_v27 = vpop.f32.mrf.mxu1 }
 0x396   : > { %v4160_v56 = vpop.f32.mrf.mxu0 }
 0x397   : > { %v4384_v7 = vadd.f32 %v4383_v59, %v4159_v0 }
 0x398   : > { %v4163_v49 = vpop.f32.mrf.mxu0 }
 0x399   : > { %5662 = vst [vmem:[%s8678_s29 + $0x168] sm:$0xff] %v4384_v7  ;;  %v4164_v50 = vadd.f32 %v4163_v49, %v9628_v23 }
 0x39a   : > { %v4165_v21 = vpop.f32.mrf.mxu0 }
 0x39c   : > { %v4168_v12 = vpop.f32.mrf.mxu0 }
 0x39d   : > { %v4388_v63 = vpop.f32.mrf.mxu1  ;;  %v4169_v18 = vadd.f32 %v4168_v12, %v9635_v6 }
 0x39e   : > { %v4389_v1 = vadd.f32 %v4388_v63, %v4164_v50  ;;  %v4170_v30 = vpop.f32.mrf.mxu0 }
 0x39f   : > { %v4390_v15 = vpop.f32.mrf.mxu1 }
 0x3a0   : > { %5663 = vst [vmem:[%s8678_s29 + $0x170] sm:$0xff] %v4389_v1 }
 0x3a1   : > { %v4393_v58 = vpop.f32.mrf.mxu1 }
 0x3a2   : > { %v4394_v41 = vadd.f32 %v4393_v58, %v4169_v18 }
 0x3a3   : > { %v4395_v55 = vpop.f32.mrf.mxu1 }
 0x3a4   : > { %5664 = vst [vmem:[%s8678_s29 + $0x178] sm:$0xff] %v4394_v41 }
 0x3a9   : > { %v4173_v37 = vpop.f32.mrf.mxu0 }
 0x3aa   : > { %v4174_v61 = vadd.f32 %v4173_v37, %v9640_v24 }
 0x3ab   : > { %v4175_v28 = vpop.f32.mrf.mxu0 }
 0x3ad   : > { %v4398_v53 = vpop.f32.mrf.mxu1 }
 0x3ae   : > { %v4399_v23 = vadd.f32 %v4398_v53, %v4174_v61 }
 0x3af   : > { %v4400_v42 = vpop.f32.mrf.mxu1 }
 0x3b0   : > { %5665 = vst [vmem:[%s8678_s29 + $0x180] sm:$0xff] %v4399_v23 }
 0x3b1   : > { %v4178_v8 = vpop.f32.mrf.mxu0 }
 0x3b2   : > { %v4179_v6 = vadd.f32 %v4178_v8, %v9647_v4 }
 0x3b3   : > { %v4180_v45 = vpop.f32.mrf.mxu0 }
 0x3b5   : > { %v4183_v38 = vpop.f32.mrf.mxu0 }
 0x3b6   : > { %v4184_v33 = vadd.f32 %v4183_v38, %v9656_v31 }
 0x3b7   : > { %v4185_v17 = vpop.f32.mrf.mxu0 }
 0x3b8   : > { %v4403_v22 = vpop.f32.mrf.mxu1 }
 0x3b9   : > { %v4404_v34 = vadd.f32 %v4403_v22, %v4179_v6 }
 0x3ba   : > { %v4405_v10 = vpop.f32.mrf.mxu1 }
 0x3bb   : > { %5666 = vst [vmem:[%s8678_s29 + $0x188] sm:$0xff] %v4404_v34 }
 0x3bf   : > { %v4408_v24 = vpop.f32.mrf.mxu1 }
 0x3c0   : > { %v4409_v9 = vadd.f32 %v4408_v24, %v4184_v33 }
 0x3c1   : > { %v4410_v39 = vpop.f32.mrf.mxu1 }
 0x3c2   : > { %5667 = vst [vmem:[%s8678_s29 + $0x190] sm:$0xff] %v4409_v9 }
 0x3c7   : > { %v4188_v11 = vpop.f32.mrf.mxu0 }
 0x3c8   : > { %v4189_v26 = vadd.f32 %v4188_v11, %v9661_v16 }
 0x3c9   : > { %v4190_v46 = vpop.f32.mrf.mxu0 }
 0x3ca   : > { %v4413_v44 = vpop.f32.mrf.mxu1 }
 0x3cb   : > { %v4414_v2 = vadd.f32 %v4413_v44, %v4189_v26 }
 0x3cc   : > { %v4415_v4 = vpop.f32.mrf.mxu1 }
 0x3cd   : > { %5668 = vst [vmem:[%s8678_s29 + $0x198] sm:$0xff] %v4414_v2  ;;  %v4193_v13 = vpop.f32.mrf.mxu0 }
 0x3ce   : > { %v4194_v57 = vadd.f32 %v4193_v13, %v9671_v54 }
 0x3cf   : > { %v4195_v14 = vpop.f32.mrf.mxu0 }
 0x3d3   : > { %v4198_v62 = vpop.f32.mrf.mxu0 }
 0x3d4   : > { %v4418_v31 = vpop.f32.mrf.mxu1  ;;  %v4199_v5 = vadd.f32 %v4198_v62, %v9678_v47 }
 0x3d5   : > { %v4419_v43 = vadd.f32 %v4418_v31, %v4194_v57  ;;  %v4200_v52 = vpop.f32.mrf.mxu0 }
 0x3d6   : > { %v4420_v35 = vpop.f32.mrf.mxu1 }
 0x3d7   : > { %5669 = vst [vmem:[%s8678_s29 + $0x1a0] sm:$0xff] %v4419_v43 }
 0x3d8   : > { %v4423_v16 = vpop.f32.mrf.mxu1 }
 0x3d9   : > { %v4424_v59 = vadd.f32 %v4423_v16, %v4199_v5 }
 0x3da   : > { %v4425_v60 = vpop.f32.mrf.mxu1 }
 0x3db   : > { %5670 = vst [vmem:[%s8678_s29 + $0x1a8] sm:$0xff] %v4424_v59 }
 0x3dc   : > { %v4428_v0 = vpop.f32.mrf.mxu1 }
 0x3dd   : > { %v4203_v27 = vpop.f32.mrf.mxu0 }
 0x3de   : > { %v4204_v56 = vadd.f32 %v4203_v27, %v9687_v29  ;;  %v4430_v7 = vpop.f32.mrf.mxu1 }
 0x3df   : > { %v4205_v54 = vpop.f32.mrf.mxu0 }
 0x3e0   : > { %v4429_v49 = vadd.f32 %v4428_v0, %v4204_v56 }
 0x3e1   : > { %v4208_v21 = vpop.f32.mrf.mxu0 }
 0x3e2   : > { %5671 = vst [vmem:[%s8678_s29 + $0x1b0] sm:$0xff] %v4429_v49  ;;  %v4209_v12 = vadd.f32 %v4208_v21, %v9695_v51 }
 0x3e3   : > { %v4210_v50 = vpop.f32.mrf.mxu0 }
 0x3e5   : > { %v4213_v47 = vpop.f32.mrf.mxu0 }
 0x3e6   : > { %v4433_v63 = vpop.f32.mrf.mxu1  ;;  %v4214_v18 = vadd.f32 %v4213_v47, %v9701_v3 }
 0x3e7   : > { %v4434_v1 = vadd.f32 %v4433_v63, %v4209_v12  ;;  %v4215_v30 = vpop.f32.mrf.mxu0 }
 0x3e8   : > { %v4435_v15 = vpop.f32.mrf.mxu1 }
 0x3e9   : > { %5672 = vst [vmem:[%s8678_s29 + $0x1b8] sm:$0xff] %v4434_v1 }
 0x3ea   : > { %v4438_v58 = vpop.f32.mrf.mxu1 }
 0x3eb   : > { %v4439_v29 = vadd.f32 %v4438_v58, %v4214_v18 }
 0x3ec   : > { %v4440_v41 = vpop.f32.mrf.mxu1 }
 0x3ed   : > { %5673 = vst [vmem:[%s8678_s29 + $0x1c0] sm:$0xff] %v4439_v29 }
 0x3ee   : > { %v4443_v55 = vpop.f32.mrf.mxu1 }
 0x3ef   : > { %v4218_v37 = vpop.f32.mrf.mxu0 }
 0x3f0   : > { %v4219_v61 = vadd.f32 %v4218_v37, %v9708_v25  ;;  %v4445_v28 = vpop.f32.mrf.mxu1 }
 0x3f1   : > { %v4220_v51 = vpop.f32.mrf.mxu0 }
 0x3f2   : > { %v4444_v53 = vadd.f32 %v4443_v55, %v4219_v61 }
 0x3f3   : > { %v4223_v23 = vpop.f32.mrf.mxu0 }
 0x3f4   : > { %5674 = vst [vmem:[%s8678_s29 + $0x1c8] sm:$0xff] %v4444_v53  ;;  %v4224_v8 = vadd.f32 %v4223_v23, %v9719_v48 }
 0x3f5   : > { %v4225_v42 = vpop.f32.mrf.mxu0 }
 0x3f7   : > { %v4228_v3 = vpop.f32.mrf.mxu0 }
 0x3f8   : > { %v4448_v45 = vpop.f32.mrf.mxu1  ;;  %v4229_v22 = vadd.f32 %v4228_v3, %v9731_v40 }
 0x3f9   : > { %v4449_v38 = vadd.f32 %v4448_v45, %v4224_v8  ;;  %v4230_v6 = vpop.f32.mrf.mxu0 }
 0x3fa   : > { %v4450_v17 = vpop.f32.mrf.mxu1 }
 0x3fb   : > { %5675 = vst [vmem:[%s8678_s29 + $0x1d0] sm:$0xff] %v4449_v38 }
 0x3fc   : > { %v4453_v34 = vpop.f32.mrf.mxu1 }
 0x3fd   : > { %v4454_v25 = vadd.f32 %v4453_v34, %v4229_v22 }
 0x3fe   : > { %v4455_v10 = vpop.f32.mrf.mxu1 }
 0x3ff   : > { %5676 = vst [vmem:[%s8678_s29 + $0x1d8] sm:$0xff] %v4454_v25 }
 0x400   : > { %v4458_v33 = vpop.f32.mrf.mxu1 }
 0x401   : > { %v4233_v24 = vpop.f32.mrf.mxu0 }
 0x402   : > { %v4234_v9 = vadd.f32 %v4233_v24, %v9741_v36  ;;  %v4460_v39 = vpop.f32.mrf.mxu1 }
 0x403   : > { %v4235_v48 = vpop.f32.mrf.mxu0 }
 0x404   : > { %v4459_v11 = vadd.f32 %v4458_v33, %v4234_v9 }
 0x405   : > { %v4238_v26 = vpop.f32.mrf.mxu0 }
 0x406   : > { %5677 = vst [vmem:[%s8678_s29 + $0x1e0] sm:$0xff] %v4459_v11  ;;  %v4239_v40 = vadd.f32 %v4238_v26, %v9751_v32 }
 0x407   : > { %v4240_v46 = vpop.f32.mrf.mxu0 }
 0x409   : > { %v4243_v44 = vpop.f32.mrf.mxu0 }
 0x40a   : > { %v4463_v2 = vpop.f32.mrf.mxu1  ;;  %v4244_v57 = vadd.f32 %v4243_v44, %v9765_v19 }
 0x40b   : > { %v4464_v4 = vadd.f32 %v4463_v2, %v4239_v40  ;;  %v4245_v13 = vpop.f32.mrf.mxu0 }
 0x40c   : > { %v4465_v14 = vpop.f32.mrf.mxu1 }
 0x40d   : > { %5678 = vst [vmem:[%s8678_s29 + $0x1e8] sm:$0xff] %v4464_v4 }
 0x40e   : > { %v4468_v36 = vpop.f32.mrf.mxu1 }
 0x40f   : > { %v4469_v62 = vadd.f32 %v4468_v36, %v4244_v57 }
 0x410   : > { %v4470_v31 = vpop.f32.mrf.mxu1 }
 0x411   : > { %5679 = vst [vmem:[%s8678_s29 + $0x1f0] sm:$0xff] %v4469_v62 }
 0x412   : > { %v4473_v43 = vpop.f32.mrf.mxu1 }
 0x413   : > { %v4248_v52 = vpop.f32.mrf.mxu0 }
 0x414   : > { %v4249_v32 = vadd.f32 %v4248_v52, %v9780_v20  ;;  %v4475_v35 = vpop.f32.mrf.mxu1 }
 0x415   : > { %v4250_v5 = vpop.f32.mrf.mxu0 }
 0x416   : > { %v4474_v19 = vadd.f32 %v4473_v43, %v4249_v32 }
 0x418   : > { %5680 = vst [vmem:[%s8678_s29 + $0x1f8] sm:$0xff] %v4474_v19 }
 0x419   : > { %6011 = shalt.err (!%p6008_p3)
}
 0x41a   : > { %s6012_s23 = scalar_lea.hbm %s9852_s8, 8192  ;;  %s6016_s24 = scalar_lea.hbm %s9901_s2, 16384 }
 0x41b   : > { %p6013_p4 = scmp.ne.s32.totalorder %s9852_s8, %s6012_s23  ;;  %p6017_p9 = scmp.lt.s32.totalorder %s9852_s8, %s9901_s2 }
 0x41c   : > { %p6018_p10 = scmp.lt.s32.totalorder %s6016_s24, %s6012_s23 }
 0x41d   : > { %p6014_p7 = pnand %p6013_p4, %p6122_p5 }
 0x41e   : > { %p6019_p11 = por %p6018_p10, %p6017_p9 }
 0x41f   : > { %p6015_p8 = pneg %p6014_p7 }
 0x421   : > { %p6020_p12 = pnand %p6019_p11, %p6015_p8 }
 0x423   : > { %6023 = shalt.err (!%p6020_p12)
}
 0x424   : > { %s6067_s27 = smov 128   ;;  %s6068_s28 = smov 8  }
 0x425   : > { %5687 = dma.vmem_to_hbm [thread:$0]  (%p6122_p5), %s9854_s5, 8192, %s9852_s8, %s9859_s13, %s6067_s27, %s6067_s27, %s6068_s28  }
 0x426 PF: > { %p5693_p13 = scmp.ge.s32.totalorder %s6058_s12, 2  ;;  %s4539_s30 = sand.u32 1, %s6046_s9  }
 0x427   : > { %s4540_s4 = scalar_lea.sflag [#allocation3], %s4539_s30 }
 0x428   : > { %p5690_p0 = pnand %p5693_p13, %p6126_p6 }
 0x42a   : > { %p5691_p1 = pneg %p5690_p0 }
 0x42c   : > { %6041 = dma.done.wait (%p5691_p1), %s4540_s4, 8192  }
 0x42d   : > { %6043 = vsyncadd (%p5691_p1), %s4540_s4, 4294959104  ;;  %p12_p2 = scmp.ge.s32.totalorder %s6109_s15, 4   ;;  %s9952_s9 = smov %s6050_s10 }
 0x42e   : > { %s9953_s10 = smov %s6054_s11  ;;  %s9954_s11 = smov %s6120_s18 }
 0x42f   : > { %s9955_s12 = smov %s6109_s15  ;;  %14 = sbr.rel (!%p12_p2) target bundleno = 3 (0x3), region = 65 }
 0x434   :  { %4545 = vsyncpa [#allocation3], 1 }
 0x435   :  { %4547 = vsyncpa [#allocation3 + $0x1], 1 }

</bundles_post_ra>
